<compile_context>
chip_gen: v7x
topology: tpu7x:2x2x1
jax: 0.10.0
libtpu: 0.0.40
codegen_flags: <defaults>
</compile_context>

<pallas_src>
import jax
import jax.numpy as jnp
import numpy as np
from jax.experimental import pallas as pl
from jax.experimental.pallas import tpu as pltpu

LANE = 128
SUB = 8
NEG_SLOPE = 0.01
BN_EPS = 1e-5
LOG2PI = float(np.log(2.0 * np.pi))


def _ru(a, b):
    return ((a + b - 1) // b) * b


class Config:
    nx = 256          # 1 x 16 x 16
    nhq = 128
    nhp = 128
    nz = 16
    nw = 8
    nclasses = 4
    numhiddenq = 2
    numhiddenp = 2
    dscale = 1.0
    wscale = 1.0
    yscale = 1.0
    zscale = 1.0
    concentration = 0.5
    compute_dtype = jnp.bfloat16   # jnp.float32 for f32 parity testing


def _lane_offsets(cfg):
    """Lane offsets of the q_y / d logits inside the packed (tm,128) output."""
    nwz = cfg.nw + cfg.nz
    qy_off = _ru(2 * nwz, SUB)
    qd_off = qy_off + _ru(cfg.nclasses, SUB)
    assert qd_off + cfg.nclasses <= LANE, "packed-output lane layout overflow"
    return qy_off, qd_off


# -----------------------------------------------------------------------------
# Parameter init (weights pre-padded / pre-placed / pre-cast ONCE here)
# -----------------------------------------------------------------------------

def _linear_init(key, fan_in, fan_out):
    kw, kb = jax.random.split(key)
    bound = 1.0 / np.sqrt(fan_in)
    W = jax.random.uniform(kw, (fan_in, fan_out), minval=-bound, maxval=bound,
                           dtype=jnp.float32)
    b = jax.random.uniform(kb, (fan_out,), minval=-bound, maxval=bound,
                           dtype=jnp.float32)
    return W, b


def _pad_w(W, rows, cols, row_off=0, col_off=0, dtype=jnp.float32):
    out = jnp.zeros((rows, cols), jnp.float32)
    out = out.at[row_off:row_off + W.shape[0], col_off:col_off + W.shape[1]].set(W)
    return out.astype(dtype)


def _pad_b(b, cols, col_off=0):
    out = jnp.zeros((1, cols), jnp.float32)
    return out.at[0, col_off:col_off + b.shape[0]].set(b)


def init_params(key, cfg):
    assert cfg.numhiddenq >= 1 and cfg.numhiddenp >= 1
    nw, nz, nx = cfg.nw, cfg.nz, cfg.nx
    nwz = nw + nz
    nc = cfg.nclasses
    cdt = cfg.compute_dtype
    bn_scale = 1.0 / np.sqrt(1.0 + BN_EPS)
    qy_off, qd_off = _lane_offsets(cfg)

    keys = iter(jax.random.split(key, 32))

    def hidden_stack(dims, first_row_off=0):
        """[Linear -> BN(folded) -> LeakyReLU] layers; the first layer's K rows
        are placed at `first_row_off` inside a lane-aligned padded weight."""
        layers = []
        for i in range(1, len(dims)):
            W, b = _linear_init(next(keys), dims[i - 1], dims[i])
            W, b = W * bn_scale, b * bn_scale
            roff = first_row_off if i == 1 else 0
            rows = _ru(roff + dims[i - 1], LANE)
            layers.append((_pad_w(W, rows, _ru(dims[i], LANE),
                                  row_off=roff, dtype=cdt),
                           _pad_b(b, _ru(dims[i], LANE))))
        return layers

    def final_layer(kin, kout, col_off=0):
        W, b = _linear_init(next(keys), kin, kout)
        cols = _ru(col_off + kout, LANE)
        return (_pad_w(W, _ru(kin, LANE), cols, col_off=col_off, dtype=cdt),
                _pad_b(b, cols, col_off=col_off))

    p = {}

    # ---- Qwz : x -> [mu_w|mu_z|logvar_w|logvar_z]  (torch layout, lanes 0:2*nwz)
    p["qwz_trunk"] = hidden_stack([nx] + cfg.numhiddenq * [cfg.nhq])
    Wf, bf = _linear_init(next(keys), cfg.nhq, 2 * nwz)           # final Linear
    p["qwz_head_wz"] = (_pad_w(Wf, _ru(cfg.nhq, LANE), LANE, dtype=cdt),
                        _pad_b(bf, LANE))
    # duplicated logvar columns, aligned to lanes [0:nwz], for in-kernel sampling
    p["qwz_head_lv"] = (_pad_w(Wf[:, nwz:], _ru(cfg.nhq, LANE), LANE, dtype=cdt),
                        _pad_b(bf[nwz:], LANE))

    # ---- Qy : [w, z, x] -> nclasses ; first layer split into wz-/x- K-blocks
    W1, b1 = _linear_init(next(keys), nwz + nx, cfg.nhq)
    W1, b1 = W1 * bn_scale, b1 * bn_scale
    p["qy_first"] = (_pad_w(W1[:nwz], LANE, _ru(cfg.nhq, LANE), dtype=cdt),
                     _pad_w(W1[nwz:], _ru(nx, LANE), _ru(cfg.nhq, LANE), dtype=cdt),
                     _pad_b(b1, _ru(cfg.nhq, LANE)))
    p["qy_mid"] = hidden_stack(cfg.numhiddenq * [cfg.nhq])
    p["qy_out"] = final_layer(cfg.nhq, nc, col_off=qy_off)

    # ---- Qd : [w, z] -> nclasses  (reads the sample tile, rows 0:nwz)
    p["qd_hidden"] = hidden_stack([nwz] + cfg.numhiddenq * [cfg.nhq])
    p["qd_out"] = final_layer(cfg.nhq, nc, col_off=qd_off)

    # ---- Px : z -> nx  (reads the sample tile, rows nw:nw+nz)
    p["px_hidden"] = hidden_stack([nz] + cfg.numhiddenp * [cfg.nhp],
                                  first_row_off=nw)
    p["px_out"] = final_layer(cfg.nhp, nx)

    # ---- Pz : w -> 2*nclasses*nz  (reads the sample tile, rows 0:nw)
    p["pz_hidden"] = hidden_stack([nw] + cfg.numhiddenp * [cfg.nhp])
    p["pz_out"] = final_layer(cfg.nhp, 2 * nc * nz)

    # Gaussian observation log-sigma, stored pre-padded (no per-step pad op).
    p["logsigma_x"] = jnp.zeros((1, _ru(nx, LANE)), jnp.float32)
    return p


def _flatten_params(p):
    flat = []
    for W, b in p["qwz_trunk"]:
        flat += [W, b]
    flat += [*p["qwz_head_wz"], *p["qwz_head_lv"], *p["qy_first"]]
    for W, b in p["qy_mid"]:
        flat += [W, b]
    flat += [*p["qy_out"]]
    for W, b in p["qd_hidden"]:
        flat += [W, b]
    flat += [*p["qd_out"]]
    for W, b in p["px_hidden"]:
        flat += [W, b]
    flat += [*p["px_out"]]
    for W, b in p["pz_hidden"]:
        flat += [W, b]
    flat += [*p["pz_out"]]
    return flat


# -----------------------------------------------------------------------------
# Fused Pallas kernel
# -----------------------------------------------------------------------------

def _make_fused_kernel(cfg, nx, nx_pad):
    nhid_q = cfg.numhiddenq
    nhid_p = cfg.numhiddenp
    cdt = cfg.compute_dtype

    def leaky(h):
        return jnp.where(h >= 0, h, NEG_SLOPE * h)

    def lin(h_c, w_ref, b_ref):
        return (jnp.dot(h_c, w_ref[...], preferred_element_type=jnp.float32)
                + b_ref[...])

    def block(h, w_ref, b_ref):
        return leaky(lin(h.astype(cdt), w_ref, b_ref))

    def softplus(v):                                    # stable, Mosaic-friendly
        return jnp.where(v > 0.0, v, 0.0) + jnp.log(1.0 + jnp.exp(-jnp.abs(v)))

    def kernel(x_ref, eps_ref, ls_ref, *refs):
        it = iter(refs)

        def pairs(n):
            return [(next(it), next(it)) for _ in range(n)]

        qwz_trunk = pairs(nhid_q)
        hwz_w, hwz_b = next(it), next(it)
        hlv_w, hlv_b = next(it), next(it)
        qy_ws, qy_wx, qy_b1 = next(it), next(it), next(it)
        qy_mid = pairs(nhid_q - 1)
        qy_ow, qy_ob = next(it), next(it)
        qd_hidden = pairs(nhid_q)
        qd_ow, qd_ob = next(it), next(it)
        px_hidden = pairs(nhid_p)
        px_ow, px_ob = next(it), next(it)
        pz_hidden = pairs(nhid_p)
        pz_ow, pz_ob = next(it), next(it)
        packed_o, rec_o, zw_o, nll_o = next(it), next(it), next(it), next(it)

        x = x_ref[...]                         # (tm, nx_pad) f32
        x_c = x.astype(cdt)

        # ---- Q(w,z | x) ----
        h = x
        for w, b in qwz_trunk:
            h = block(h, w, b)
        h_c = h.astype(cdt)
        wz = lin(h_c, hwz_w, hwz_b)            # [mu|logvar] in lanes [0:2*nwz]
        lv = lin(h_c, hlv_w, hlv_b)            # logvar aligned to lanes [0:nwz]
        # Reparameterization: lanes [0:nwz] = [w|z]; higher lanes contain
        # harmless finite garbage that only multiplies zero-padded weight rows.
        sample = wz + eps_ref[...] * jnp.exp(0.5 * lv)
        s_c = sample.astype(cdt)

        # ---- Q(y | w,z,x) : first layer = two K-block matmuls (no concat) ----
        h = leaky(jnp.dot(s_c, qy_ws[...], preferred_element_type=jnp.float32)
                  + jnp.dot(x_c, qy_wx[...], preferred_element_type=jnp.float32)
                  + qy_b1[...])
        for w, b in qy_mid:
            h = block(h, w, b)
        qy_logits = lin(h.astype(cdt), qy_ow, qy_ob)   # lanes [qy_off:+nc]

        # ---- Q(d | w,z) ----
        h = sample
        for w, b in qd_hidden:
            h = block(h, w, b)
        qd_logits = lin(h.astype(cdt), qd_ow, qd_ob)   # lanes [qd_off:+nc]

        # Lane-dense packed output: wz | q_y logits | d logits (disjoint lanes).
        packed_o[...] = wz + qy_logits + qd_logits

        # ---- P(x | z) + Gaussian NLL lane-partial ----
        h = sample
        for w, b in px_hidden:
            h = block(h, w, b)
        rec = lin(h.astype(cdt), px_ow, px_ob)
        rec_o[...] = rec

        ls_raw = ls_ref[...]                    # (1, nx_pad)
        ls = ls_raw + softplus(-8.0 - ls_raw) - softplus(ls_raw - 8.0)  # softclip
        diff = x - rec
        term = 0.5 * diff * diff * jnp.exp(-2.0 * ls) + ls + 0.5 * LOG2PI
        if nx_pad != nx:                        # only when nx is not lane-aligned
            lane_col = jax.lax.broadcasted_iota(jnp.int32, (1, nx_pad), 1)
            term = term * (lane_col < nx).astype(jnp.float32)
        part = term[:, 0:LANE]
        for c in range(LANE, nx_pad, LANE):
            part = part + term[:, c:c + LANE]
        nll_o[...] = part

        # ---- P(z | w) ----
        h = sample
        for w, b in pz_hidden:
            h = block(h, w, b)
        zw_o[...] = lin(h.astype(cdt), pz_ow, pz_ob)

    return kernel


def _fused_call(xp, eps_p, ls_p, param_list, cfg, tm):
    Mp, nx_pad = xp.shape
    zw_pad = _ru(2 * cfg.nclasses * cfg.nz, LANE)

    kernel = _make_fused_kernel(cfg, cfg.nx, nx_pad)

    in_specs = ([pl.BlockSpec((tm, nx_pad), lambda i: (i, 0)),
                 pl.BlockSpec((tm, LANE), lambda i: (i, 0)),
                 pl.BlockSpec((1, nx_pad), lambda i: (0, 0))]
                + [pl.BlockSpec(a.shape, lambda i: (0, 0)) for a in param_list])

    out_shapes = (
        jax.ShapeDtypeStruct((Mp, LANE), jnp.float32),     # packed wz|qy|qd
        jax.ShapeDtypeStruct((Mp, nx_pad), jnp.float32),   # reconstruction
        jax.ShapeDtypeStruct((Mp, zw_pad), jnp.float32),   # Pz output
        jax.ShapeDtypeStruct((Mp, LANE), jnp.float32),     # NLL lane-partial
    )
    out_specs = (
        pl.BlockSpec((tm, LANE), lambda i: (i, 0)),
        pl.BlockSpec((tm, nx_pad), lambda i: (i, 0)),
        pl.BlockSpec((tm, zw_pad), lambda i: (i, 0)),
        pl.BlockSpec((tm, LANE), lambda i: (i, 0)),
    )

    return pl.pallas_call(
        kernel,
        out_shape=out_shapes,
        grid_spec=pltpu.PrefetchScalarGridSpec(
            num_scalar_prefetch=0,
            grid=(Mp // tm,),
            in_specs=in_specs,
            out_specs=out_specs,
        ),
        compiler_params=pltpu.CompilerParams(
            dimension_semantics=("parallel",),
            vmem_limit_bytes=32 * 1024 * 1024,
        ),
    )(xp, eps_p, ls_p, *param_list)


# -----------------------------------------------------------------------------
# Host-side loss helpers (tiny per-element math / special functions)
# -----------------------------------------------------------------------------

def kld2normal(mu, logvar, mu2, logvar2):
    return 0.5 * (-1.0 + logvar2 - logvar
                  + (jnp.exp(logvar) + (mu - mu2) ** 2) * jnp.exp(-logvar2))


def kld_unreduced(mu, logvar):
    return -0.5 * (1.0 + logvar - mu ** 2 - jnp.exp(logvar))


def dirichlet_kl(alpha, beta):
    gln = jax.scipy.special.gammaln
    dig = jax.scipy.special.digamma
    a0 = alpha.sum(-1)
    b0 = beta.sum(-1)
    return (gln(a0) - gln(alpha).sum(-1)
            - gln(b0) + gln(beta).sum(-1)
            + ((alpha - beta) * (dig(alpha) - dig(a0)[..., None])).sum(-1))


# -----------------------------------------------------------------------------
# Forward
# -----------------------------------------------------------------------------

def forward(params, x_img, key, cfg):
    eps = 1e-6
    nw, nz, nc = cfg.nw, cfg.nz, cfg.nclasses
    nwz = nw + nz
    qy_off, qd_off = _lane_offsets(cfg)

    B = x_img.shape[0]
    x = x_img.reshape(B, -1).astype(jnp.float32)
    nx = x.shape[1]
    assert nx == cfg.nx
    nx_pad = _ru(nx, LANE)

    # Single M tile up to 512 rows; 512-row tiles beyond (amortizes MXU fill).
    tm = _ru(B, 16) if B <= 512 else 512
    Mp = _ru(B, tm)

    xp = jnp.zeros((Mp, nx_pad), jnp.float32).at[:B, :nx].set(x)

    key_eps, key_dir = jax.random.split(key)
    # N(0,1) reparameterization noise; only lanes [0:nwz] are consumed.
    eps_p = jax.random.normal(key_eps, (Mp, LANE), jnp.float32)

    packed, rec_p, zw_p, nll_p = _fused_call(
        xp, eps_p, params["logsigma_x"], _flatten_params(params), cfg, tm)

    # --- unpack lane-packed small outputs -------------------------------------
    wz_flat = packed[:B, :2 * nwz]
    wz = wz_flat.reshape(B, 2, nwz)
    mu_w, mu_z = wz_flat[:, :nw], wz_flat[:, nw:nwz]
    logvar_w = wz_flat[:, nwz:nwz + nw]
    logvar_z = wz_flat[:, nwz + nw:2 * nwz]
    eps_wz = eps_p[:B, :nwz]
    w = mu_w + eps_wz[:, :nw] * jnp.exp(0.5 * logvar_w)   # same values the kernel used
    z = mu_z + eps_wz[:, nw:] * jnp.exp(0.5 * logvar_z)

    q_y_logits = packed[:B, qy_off:qy_off + nc]
    d_logits = packed[:B, qd_off:qd_off + nc]
    q_y = jax.nn.softmax(q_y_logits, axis=-1)
    q_y = eps / nc + (1.0 - eps) * q_y
    alpha = jnp.exp(d_logits)                    # Dirichlet concentration (unclamped)

    rec = rec_p[:B, :nx]
    loss_rec = nll_p[:B].sum(-1).mean()          # Gauss NLL (reclosstype='Gauss')

    z_w = zw_p[:B, :2 * nc * nz].reshape(B, nc, 2 * nz)
    mu_z_w, logvar_z_w = z_w[:, :, :nz], z_w[:, :, nz:]
    loss_z_mat = cfg.zscale * kld2normal(
        mu_z[:, None, :], logvar_z[:, None, :], mu_z_w, logvar_z_w).sum(-1)

    p_y = jax.random.dirichlet(key_dir, alpha)
    p_y = eps / nc + (1.0 - eps) * p_y

    # --- losses (y == None branch) ---------------------------------------------
    loss_z = (q_y * loss_z_mat).sum(-1).mean()
    loss_y_alt = cfg.yscale * (q_y * (jnp.log(q_y) - jnp.log(p_y))).sum(-1).mean()
    loss_y_alt2 = jnp.asarray(0.0, jnp.float32)
    loss_w = cfg.wscale * kld_unreduced(mu_w, logvar_w).sum(-1).mean()
    loss_y = -1.0 * q_y.max(-1).mean()           # reported, not in total
    beta = jnp.ones_like(q_y) * cfg.concentration
    loss_d = cfg.dscale * dirichlet_kl(alpha, beta).mean()

    total_loss = loss_rec + loss_z + loss_w + loss_d + loss_y_alt + loss_y_alt2
    num_clusters = jnp.sum(jnp.where(q_y > 0.5, q_y, 0.0).sum(0) > 0)

    losses = dict(rec=loss_rec, loss_z=loss_z, loss_w=loss_w, loss_y=loss_y,
                  loss_d=loss_d, loss_y_alt=loss_y_alt, loss_y_alt2=loss_y_alt2,
                  total_loss=total_loss, num_clusters=num_clusters)
    output = dict(wz=wz, mu_w=mu_w, logvar_w=logvar_w, mu_z=mu_z,
                  logvar_z=logvar_z, w=w, z=z, q_y=q_y, d_logits=d_logits,
                  rec=rec, losses=losses)
    return output


# -----------------------------------------------------------------------------

if __name__ == "__main__":
    cfg = Config()
    key = jax.random.PRNGKey(0)
    k_param, k_data, k_noise = jax.random.split(key, 3)

    params = init_params(k_param, cfg)
    x_img = jax.random.normal(k_data, (2, 1, 16, 16), jnp.float32)   # NCHW

    fwd = jax.jit(lambda p, xi, k: forward(p, xi, k, cfg))
    out = fwd(params, x_img, k_noise)
    total = jax.block_until_ready(out["losses"]["total_loss"])
    assert np.isfinite(float(total)), "total_loss is not finite"
    print("KERNEL_OK")
</pallas_src>

<mosaic_0001>
module attributes {stable_mosaic.version = 11 : i64} {
  func.func @kernel(%arg0: i32, %arg1: memref<16x256xf32, #tpu.memory_space<vmem>>, %arg2: memref<16x128xf32, #tpu.memory_space<vmem>>, %arg3: memref<1x256xf32, #tpu.memory_space<vmem>>, %arg4: memref<256x128xbf16, #tpu.memory_space<vmem>>, %arg5: memref<1x128xf32, #tpu.memory_space<vmem>>, %arg6: memref<128x128xbf16, #tpu.memory_space<vmem>>, %arg7: memref<1x128xf32, #tpu.memory_space<vmem>>, %arg8: memref<128x128xbf16, #tpu.memory_space<vmem>>, %arg9: memref<1x128xf32, #tpu.memory_space<vmem>>, %arg10: memref<128x128xbf16, #tpu.memory_space<vmem>>, %arg11: memref<1x128xf32, #tpu.memory_space<vmem>>, %arg12: memref<128x128xbf16, #tpu.memory_space<vmem>>, %arg13: memref<256x128xbf16, #tpu.memory_space<vmem>>, %arg14: memref<1x128xf32, #tpu.memory_space<vmem>>, %arg15: memref<128x128xbf16, #tpu.memory_space<vmem>>, %arg16: memref<1x128xf32, #tpu.memory_space<vmem>>, %arg17: memref<128x128xbf16, #tpu.memory_space<vmem>>, %arg18: memref<1x128xf32, #tpu.memory_space<vmem>>, %arg19: memref<128x128xbf16, #tpu.memory_space<vmem>>, %arg20: memref<1x128xf32, #tpu.memory_space<vmem>>, %arg21: memref<128x128xbf16, #tpu.memory_space<vmem>>, %arg22: memref<1x128xf32, #tpu.memory_space<vmem>>, %arg23: memref<128x128xbf16, #tpu.memory_space<vmem>>, %arg24: memref<1x128xf32, #tpu.memory_space<vmem>>, %arg25: memref<128x128xbf16, #tpu.memory_space<vmem>>, %arg26: memref<1x128xf32, #tpu.memory_space<vmem>>, %arg27: memref<128x128xbf16, #tpu.memory_space<vmem>>, %arg28: memref<1x128xf32, #tpu.memory_space<vmem>>, %arg29: memref<128x256xbf16, #tpu.memory_space<vmem>>, %arg30: memref<1x256xf32, #tpu.memory_space<vmem>>, %arg31: memref<128x128xbf16, #tpu.memory_space<vmem>>, %arg32: memref<1x128xf32, #tpu.memory_space<vmem>>, %arg33: memref<128x128xbf16, #tpu.memory_space<vmem>>, %arg34: memref<1x128xf32, #tpu.memory_space<vmem>>, %arg35: memref<128x128xbf16, #tpu.memory_space<vmem>>, %arg36: memref<1x128xf32, #tpu.memory_space<vmem>>, %arg37: memref<16x128xf32, #tpu.memory_space<vmem>>, %arg38: memref<16x256xf32, #tpu.memory_space<vmem>>, %arg39: memref<16x128xf32, #tpu.memory_space<vmem>>, %arg40: memref<16x128xf32, #tpu.memory_space<vmem>>) attributes {dimension_semantics = [#tpu.dimension_semantics<parallel>], iteration_bounds = array<i64: 1>, scalar_prefetch = 0 : i64, scratch_operands = 0 : i64, tpu.core_type = #tpu.core_type<tc>, window_params = [{transform_indices = @transform_0, window_bounds = array<i64: 16, 256>}, {transform_indices = @transform_1, window_bounds = array<i64: 16, 128>}, {pipeline_mode = #tpu.pipeline_mode<synchronous>, transform_indices = @transform_2, window_bounds = array<i64: 1, 256>}, {pipeline_mode = #tpu.pipeline_mode<synchronous>, transform_indices = @transform_3, window_bounds = array<i64: 256, 128>}, {pipeline_mode = #tpu.pipeline_mode<synchronous>, transform_indices = @transform_4, window_bounds = array<i64: 1, 128>}, {pipeline_mode = #tpu.pipeline_mode<synchronous>, transform_indices = @transform_5, window_bounds = array<i64: 128, 128>}, {pipeline_mode = #tpu.pipeline_mode<synchronous>, transform_indices = @transform_6, window_bounds = array<i64: 1, 128>}, {pipeline_mode = #tpu.pipeline_mode<synchronous>, transform_indices = @transform_7, window_bounds = array<i64: 128, 128>}, {pipeline_mode = #tpu.pipeline_mode<synchronous>, transform_indices = @transform_8, window_bounds = array<i64: 1, 128>}, {pipeline_mode = #tpu.pipeline_mode<synchronous>, transform_indices = @transform_9, window_bounds = array<i64: 128, 128>}, {pipeline_mode = #tpu.pipeline_mode<synchronous>, transform_indices = @transform_10, window_bounds = array<i64: 1, 128>}, {pipeline_mode = #tpu.pipeline_mode<synchronous>, transform_indices = @transform_11, window_bounds = array<i64: 128, 128>}, {pipeline_mode = #tpu.pipeline_mode<synchronous>, transform_indices = @transform_12, window_bounds = array<i64: 256, 128>}, {pipeline_mode = #tpu.pipeline_mode<synchronous>, transform_indices = @transform_13, window_bounds = array<i64: 1, 128>}, {pipeline_mode = #tpu.pipeline_mode<synchronous>, transform_indices = @transform_14, window_bounds = array<i64: 128, 128>}, {pipeline_mode = #tpu.pipeline_mode<synchronous>, transform_indices = @transform_15, window_bounds = array<i64: 1, 128>}, {pipeline_mode = #tpu.pipeline_mode<synchronous>, transform_indices = @transform_16, window_bounds = array<i64: 128, 128>}, {pipeline_mode = #tpu.pipeline_mode<synchronous>, transform_indices = @transform_17, window_bounds = array<i64: 1, 128>}, {pipeline_mode = #tpu.pipeline_mode<synchronous>, transform_indices = @transform_18, window_bounds = array<i64: 128, 128>}, {pipeline_mode = #tpu.pipeline_mode<synchronous>, transform_indices = @transform_19, window_bounds = array<i64: 1, 128>}, {pipeline_mode = #tpu.pipeline_mode<synchronous>, transform_indices = @transform_20, window_bounds = array<i64: 128, 128>}, {pipeline_mode = #tpu.pipeline_mode<synchronous>, transform_indices = @transform_21, window_bounds = array<i64: 1, 128>}, {pipeline_mode = #tpu.pipeline_mode<synchronous>, transform_indices = @transform_22, window_bounds = array<i64: 128, 128>}, {pipeline_mode = #tpu.pipeline_mode<synchronous>, transform_indices = @transform_23, window_bounds = array<i64: 1, 128>}, {pipeline_mode = #tpu.pipeline_mode<synchronous>, transform_indices = @transform_24, window_bounds = array<i64: 128, 128>}, {pipeline_mode = #tpu.pipeline_mode<synchronous>, transform_indices = @transform_25, window_bounds = array<i64: 1, 128>}, {pipeline_mode = #tpu.pipeline_mode<synchronous>, transform_indices = @transform_26, window_bounds = array<i64: 128, 128>}, {pipeline_mode = #tpu.pipeline_mode<synchronous>, transform_indices = @transform_27, window_bounds = array<i64: 1, 128>}, {pipeline_mode = #tpu.pipeline_mode<synchronous>, transform_indices = @transform_28, window_bounds = array<i64: 128, 256>}, {pipeline_mode = #tpu.pipeline_mode<synchronous>, transform_indices = @transform_29, window_bounds = array<i64: 1, 256>}, {pipeline_mode = #tpu.pipeline_mode<synchronous>, transform_indices = @transform_30, window_bounds = array<i64: 128, 128>}, {pipeline_mode = #tpu.pipeline_mode<synchronous>, transform_indices = @transform_31, window_bounds = array<i64: 1, 128>}, {pipeline_mode = #tpu.pipeline_mode<synchronous>, transform_indices = @transform_32, window_bounds = array<i64: 128, 128>}, {pipeline_mode = #tpu.pipeline_mode<synchronous>, transform_indices = @transform_33, window_bounds = array<i64: 1, 128>}, {pipeline_mode = #tpu.pipeline_mode<synchronous>, transform_indices = @transform_34, window_bounds = array<i64: 128, 128>}, {pipeline_mode = #tpu.pipeline_mode<synchronous>, transform_indices = @transform_35, window_bounds = array<i64: 1, 128>}, {transform_indices = @transform_36, window_bounds = array<i64: 16, 128>}, {transform_indices = @transform_37, window_bounds = array<i64: 16, 256>}, {transform_indices = @transform_38, window_bounds = array<i64: 16, 128>}, {transform_indices = @transform_39, window_bounds = array<i64: 16, 128>}]} {
    %c0 = arith.constant 0 : index
    %c0_0 = arith.constant 0 : index
    %0 = vector.load %arg1[%c0, %c0_0] : memref<16x256xf32, #tpu.memory_space<vmem>>, vector<16x256xf32>
    %1 = arith.truncf %0 : vector<16x256xf32> to vector<16x256xbf16>
    %2 = arith.truncf %0 : vector<16x256xf32> to vector<16x256xbf16>
    %c0_1 = arith.constant 0 : index
    %c0_2 = arith.constant 0 : index
    %3 = vector.load %arg4[%c0_1, %c0_2] : memref<256x128xbf16, #tpu.memory_space<vmem>>, vector<256x128xbf16>
    %cst = arith.constant dense<0.000000e+00> : vector<16x128xf32>
    %4 = tpu.matmul %2, %3, %cst {dimension_numbers = #tpu.dot_dimension_numbers<[1], [0], [0], [1], [0, 0, 1, 1], [], []>} : vector<16x256xbf16>, vector<256x128xbf16>, vector<16x128xf32> -> vector<16x128xf32>
    %c0_3 = arith.constant 0 : index
    %c0_4 = arith.constant 0 : index
    %5 = vector.load %arg5[%c0_3, %c0_4] : memref<1x128xf32, #tpu.memory_space<vmem>>, vector<1x128xf32>
    %6 = vector.broadcast %5 : vector<1x128xf32> to vector<16x128xf32>
    %7 = arith.addf %4, %6 : vector<16x128xf32>
    %cst_5 = arith.constant 0.000000e+00 : f32
    %8 = vector.broadcast %cst_5 : f32 to vector<16x128xf32>
    %9 = arith.cmpf oge, %7, %8 : vector<16x128xf32>
    %cst_6 = arith.constant 0.00999999977 : f32
    %10 = vector.broadcast %cst_6 : f32 to vector<16x128xf32>
    %11 = arith.mulf %10, %7 : vector<16x128xf32>
    %12 = arith.select %9, %7, %11 : vector<16x128xi1>, vector<16x128xf32>
    %13 = arith.truncf %12 : vector<16x128xf32> to vector<16x128xbf16>
    %c0_7 = arith.constant 0 : index
    %c0_8 = arith.constant 0 : index
    %14 = vector.load %arg6[%c0_7, %c0_8] : memref<128x128xbf16, #tpu.memory_space<vmem>>, vector<128x128xbf16>
    %cst_9 = arith.constant dense<0.000000e+00> : vector<16x128xf32>
    %15 = tpu.matmul %13, %14, %cst_9 {dimension_numbers = #tpu.dot_dimension_numbers<[1], [0], [0], [1], [0, 0, 1, 1], [], []>} : vector<16x128xbf16>, vector<128x128xbf16>, vector<16x128xf32> -> vector<16x128xf32>
    %c0_10 = arith.constant 0 : index
    %c0_11 = arith.constant 0 : index
    %16 = vector.load %arg7[%c0_10, %c0_11] : memref<1x128xf32, #tpu.memory_space<vmem>>, vector<1x128xf32>
    %17 = vector.broadcast %16 : vector<1x128xf32> to vector<16x128xf32>
    %18 = arith.addf %15, %17 : vector<16x128xf32>
    %cst_12 = arith.constant 0.000000e+00 : f32
    %19 = vector.broadcast %cst_12 : f32 to vector<16x128xf32>
    %20 = arith.cmpf oge, %18, %19 : vector<16x128xf32>
    %cst_13 = arith.constant 0.00999999977 : f32
    %21 = vector.broadcast %cst_13 : f32 to vector<16x128xf32>
    %22 = arith.mulf %21, %18 : vector<16x128xf32>
    %23 = arith.select %20, %18, %22 : vector<16x128xi1>, vector<16x128xf32>
    %24 = arith.truncf %23 : vector<16x128xf32> to vector<16x128xbf16>
    %c0_14 = arith.constant 0 : index
    %c0_15 = arith.constant 0 : index
    %25 = vector.load %arg8[%c0_14, %c0_15] : memref<128x128xbf16, #tpu.memory_space<vmem>>, vector<128x128xbf16>
    %cst_16 = arith.constant dense<0.000000e+00> : vector<16x128xf32>
    %26 = tpu.matmul %24, %25, %cst_16 {dimension_numbers = #tpu.dot_dimension_numbers<[1], [0], [0], [1], [0, 0, 1, 1], [], []>} : vector<16x128xbf16>, vector<128x128xbf16>, vector<16x128xf32> -> vector<16x128xf32>
    %c0_17 = arith.constant 0 : index
    %c0_18 = arith.constant 0 : index
    %27 = vector.load %arg9[%c0_17, %c0_18] : memref<1x128xf32, #tpu.memory_space<vmem>>, vector<1x128xf32>
    %28 = vector.broadcast %27 : vector<1x128xf32> to vector<16x128xf32>
    %29 = arith.addf %26, %28 : vector<16x128xf32>
    %c0_19 = arith.constant 0 : index
    %c0_20 = arith.constant 0 : index
    %30 = vector.load %arg10[%c0_19, %c0_20] : memref<128x128xbf16, #tpu.memory_space<vmem>>, vector<128x128xbf16>
    %cst_21 = arith.constant dense<0.000000e+00> : vector<16x128xf32>
    %31 = tpu.matmul %24, %30, %cst_21 {dimension_numbers = #tpu.dot_dimension_numbers<[1], [0], [0], [1], [0, 0, 1, 1], [], []>} : vector<16x128xbf16>, vector<128x128xbf16>, vector<16x128xf32> -> vector<16x128xf32>
    %c0_22 = arith.constant 0 : index
    %c0_23 = arith.constant 0 : index
    %32 = vector.load %arg11[%c0_22, %c0_23] : memref<1x128xf32, #tpu.memory_space<vmem>>, vector<1x128xf32>
    %33 = vector.broadcast %32 : vector<1x128xf32> to vector<16x128xf32>
    %34 = arith.addf %31, %33 : vector<16x128xf32>
    %c0_24 = arith.constant 0 : index
    %c0_25 = arith.constant 0 : index
    %35 = vector.load %arg2[%c0_24, %c0_25] : memref<16x128xf32, #tpu.memory_space<vmem>>, vector<16x128xf32>
    %cst_26 = arith.constant 5.000000e-01 : f32
    %36 = vector.broadcast %cst_26 : f32 to vector<16x128xf32>
    %37 = arith.mulf %36, %34 : vector<16x128xf32>
    %38 = math.exp %37 : vector<16x128xf32>
    %39 = arith.mulf %35, %38 : vector<16x128xf32>
    %40 = arith.addf %29, %39 : vector<16x128xf32>
    %41 = arith.truncf %40 : vector<16x128xf32> to vector<16x128xbf16>
    %c0_27 = arith.constant 0 : index
    %c0_28 = arith.constant 0 : index
    %42 = vector.load %arg12[%c0_27, %c0_28] : memref<128x128xbf16, #tpu.memory_space<vmem>>, vector<128x128xbf16>
    %cst_29 = arith.constant dense<0.000000e+00> : vector<16x128xf32>
    %43 = tpu.matmul %41, %42, %cst_29 {dimension_numbers = #tpu.dot_dimension_numbers<[1], [0], [0], [1], [0, 0, 1, 1], [], []>} : vector<16x128xbf16>, vector<128x128xbf16>, vector<16x128xf32> -> vector<16x128xf32>
    %c0_30 = arith.constant 0 : index
    %c0_31 = arith.constant 0 : index
    %44 = vector.load %arg13[%c0_30, %c0_31] : memref<256x128xbf16, #tpu.memory_space<vmem>>, vector<256x128xbf16>
    %cst_32 = arith.constant dense<0.000000e+00> : vector<16x128xf32>
    %45 = tpu.matmul %1, %44, %cst_32 {dimension_numbers = #tpu.dot_dimension_numbers<[1], [0], [0], [1], [0, 0, 1, 1], [], []>} : vector<16x256xbf16>, vector<256x128xbf16>, vector<16x128xf32> -> vector<16x128xf32>
    %46 = arith.addf %43, %45 : vector<16x128xf32>
    %c0_33 = arith.constant 0 : index
    %c0_34 = arith.constant 0 : index
    %47 = vector.load %arg14[%c0_33, %c0_34] : memref<1x128xf32, #tpu.memory_space<vmem>>, vector<1x128xf32>
    %48 = vector.broadcast %47 : vector<1x128xf32> to vector<16x128xf32>
    %49 = arith.addf %46, %48 : vector<16x128xf32>
    %cst_35 = arith.constant 0.000000e+00 : f32
    %50 = vector.broadcast %cst_35 : f32 to vector<16x128xf32>
    %51 = arith.cmpf oge, %49, %50 : vector<16x128xf32>
    %cst_36 = arith.constant 0.00999999977 : f32
    %52 = vector.broadcast %cst_36 : f32 to vector<16x128xf32>
    %53 = arith.mulf %52, %49 : vector<16x128xf32>
    %54 = arith.select %51, %49, %53 : vector<16x128xi1>, vector<16x128xf32>
    %55 = arith.truncf %54 : vector<16x128xf32> to vector<16x128xbf16>
    %c0_37 = arith.constant 0 : index
    %c0_38 = arith.constant 0 : index
    %56 = vector.load %arg15[%c0_37, %c0_38] : memref<128x128xbf16, #tpu.memory_space<vmem>>, vector<128x128xbf16>
    %cst_39 = arith.constant dense<0.000000e+00> : vector<16x128xf32>
    %57 = tpu.matmul %55, %56, %cst_39 {dimension_numbers = #tpu.dot_dimension_numbers<[1], [0], [0], [1], [0, 0, 1, 1], [], []>} : vector<16x128xbf16>, vector<128x128xbf16>, vector<16x128xf32> -> vector<16x128xf32>
    %c0_40 = arith.constant 0 : index
    %c0_41 = arith.constant 0 : index
    %58 = vector.load %arg16[%c0_40, %c0_41] : memref<1x128xf32, #tpu.memory_space<vmem>>, vector<1x128xf32>
    %59 = vector.broadcast %58 : vector<1x128xf32> to vector<16x128xf32>
    %60 = arith.addf %57, %59 : vector<16x128xf32>
    %cst_42 = arith.constant 0.000000e+00 : f32
    %61 = vector.broadcast %cst_42 : f32 to vector<16x128xf32>
    %62 = arith.cmpf oge, %60, %61 : vector<16x128xf32>
    %cst_43 = arith.constant 0.00999999977 : f32
    %63 = vector.broadcast %cst_43 : f32 to vector<16x128xf32>
    %64 = arith.mulf %63, %60 : vector<16x128xf32>
    %65 = arith.select %62, %60, %64 : vector<16x128xi1>, vector<16x128xf32>
    %66 = arith.truncf %65 : vector<16x128xf32> to vector<16x128xbf16>
    %c0_44 = arith.constant 0 : index
    %c0_45 = arith.constant 0 : index
    %67 = vector.load %arg17[%c0_44, %c0_45] : memref<128x128xbf16, #tpu.memory_space<vmem>>, vector<128x128xbf16>
    %cst_46 = arith.constant dense<0.000000e+00> : vector<16x128xf32>
    %68 = tpu.matmul %66, %67, %cst_46 {dimension_numbers = #tpu.dot_dimension_numbers<[1], [0], [0], [1], [0, 0, 1, 1], [], []>} : vector<16x128xbf16>, vector<128x128xbf16>, vector<16x128xf32> -> vector<16x128xf32>
    %c0_47 = arith.constant 0 : index
    %c0_48 = arith.constant 0 : index
    %69 = vector.load %arg18[%c0_47, %c0_48] : memref<1x128xf32, #tpu.memory_space<vmem>>, vector<1x128xf32>
    %70 = vector.broadcast %69 : vector<1x128xf32> to vector<16x128xf32>
    %71 = arith.addf %68, %70 : vector<16x128xf32>
    %72 = arith.truncf %40 : vector<16x128xf32> to vector<16x128xbf16>
    %c0_49 = arith.constant 0 : index
    %c0_50 = arith.constant 0 : index
    %73 = vector.load %arg19[%c0_49, %c0_50] : memref<128x128xbf16, #tpu.memory_space<vmem>>, vector<128x128xbf16>
    %cst_51 = arith.constant dense<0.000000e+00> : vector<16x128xf32>
    %74 = tpu.matmul %72, %73, %cst_51 {dimension_numbers = #tpu.dot_dimension_numbers<[1], [0], [0], [1], [0, 0, 1, 1], [], []>} : vector<16x128xbf16>, vector<128x128xbf16>, vector<16x128xf32> -> vector<16x128xf32>
    %c0_52 = arith.constant 0 : index
    %c0_53 = arith.constant 0 : index
    %75 = vector.load %arg20[%c0_52, %c0_53] : memref<1x128xf32, #tpu.memory_space<vmem>>, vector<1x128xf32>
    %76 = vector.broadcast %75 : vector<1x128xf32> to vector<16x128xf32>
    %77 = arith.addf %74, %76 : vector<16x128xf32>
    %cst_54 = arith.constant 0.000000e+00 : f32
    %78 = vector.broadcast %cst_54 : f32 to vector<16x128xf32>
    %79 = arith.cmpf oge, %77, %78 : vector<16x128xf32>
    %cst_55 = arith.constant 0.00999999977 : f32
    %80 = vector.broadcast %cst_55 : f32 to vector<16x128xf32>
    %81 = arith.mulf %80, %77 : vector<16x128xf32>
    %82 = arith.select %79, %77, %81 : vector<16x128xi1>, vector<16x128xf32>
    %83 = arith.truncf %82 : vector<16x128xf32> to vector<16x128xbf16>
    %c0_56 = arith.constant 0 : index
    %c0_57 = arith.constant 0 : index
    %84 = vector.load %arg21[%c0_56, %c0_57] : memref<128x128xbf16, #tpu.memory_space<vmem>>, vector<128x128xbf16>
    %cst_58 = arith.constant dense<0.000000e+00> : vector<16x128xf32>
    %85 = tpu.matmul %83, %84, %cst_58 {dimension_numbers = #tpu.dot_dimension_numbers<[1], [0], [0], [1], [0, 0, 1, 1], [], []>} : vector<16x128xbf16>, vector<128x128xbf16>, vector<16x128xf32> -> vector<16x128xf32>
    %c0_59 = arith.constant 0 : index
    %c0_60 = arith.constant 0 : index
    %86 = vector.load %arg22[%c0_59, %c0_60] : memref<1x128xf32, #tpu.memory_space<vmem>>, vector<1x128xf32>
    %87 = vector.broadcast %86 : vector<1x128xf32> to vector<16x128xf32>
    %88 = arith.addf %85, %87 : vector<16x128xf32>
    %cst_61 = arith.constant 0.000000e+00 : f32
    %89 = vector.broadcast %cst_61 : f32 to vector<16x128xf32>
    %90 = arith.cmpf oge, %88, %89 : vector<16x128xf32>
    %cst_62 = arith.constant 0.00999999977 : f32
    %91 = vector.broadcast %cst_62 : f32 to vector<16x128xf32>
    %92 = arith.mulf %91, %88 : vector<16x128xf32>
    %93 = arith.select %90, %88, %92 : vector<16x128xi1>, vector<16x128xf32>
    %94 = arith.truncf %93 : vector<16x128xf32> to vector<16x128xbf16>
    %c0_63 = arith.constant 0 : index
    %c0_64 = arith.constant 0 : index
    %95 = vector.load %arg23[%c0_63, %c0_64] : memref<128x128xbf16, #tpu.memory_space<vmem>>, vector<128x128xbf16>
    %cst_65 = arith.constant dense<0.000000e+00> : vector<16x128xf32>
    %96 = tpu.matmul %94, %95, %cst_65 {dimension_numbers = #tpu.dot_dimension_numbers<[1], [0], [0], [1], [0, 0, 1, 1], [], []>} : vector<16x128xbf16>, vector<128x128xbf16>, vector<16x128xf32> -> vector<16x128xf32>
    %c0_66 = arith.constant 0 : index
    %c0_67 = arith.constant 0 : index
    %97 = vector.load %arg24[%c0_66, %c0_67] : memref<1x128xf32, #tpu.memory_space<vmem>>, vector<1x128xf32>
    %98 = vector.broadcast %97 : vector<1x128xf32> to vector<16x128xf32>
    %99 = arith.addf %96, %98 : vector<16x128xf32>
    %100 = arith.addf %29, %71 : vector<16x128xf32>
    %101 = arith.addf %100, %99 : vector<16x128xf32>
    %c0_68 = arith.constant 0 : index
    %c0_69 = arith.constant 0 : index
    %102 = vector.load %arg37[%c0_68, %c0_69] : memref<16x128xf32, #tpu.memory_space<vmem>>, vector<16x128xf32>
    tpu.vector_store %arg37[%c0_68, %c0_69], %101 {strides = array<i32>} : memref<16x128xf32, #tpu.memory_space<vmem>>, vector<16x128xf32>,
    %103 = arith.truncf %40 : vector<16x128xf32> to vector<16x128xbf16>
    %c0_70 = arith.constant 0 : index
    %c0_71 = arith.constant 0 : index
    %104 = vector.load %arg25[%c0_70, %c0_71] : memref<128x128xbf16, #tpu.memory_space<vmem>>, vector<128x128xbf16>
    %cst_72 = arith.constant dense<0.000000e+00> : vector<16x128xf32>
    %105 = tpu.matmul %103, %104, %cst_72 {dimension_numbers = #tpu.dot_dimension_numbers<[1], [0], [0], [1], [0, 0, 1, 1], [], []>} : vector<16x128xbf16>, vector<128x128xbf16>, vector<16x128xf32> -> vector<16x128xf32>
    %c0_73 = arith.constant 0 : index
    %c0_74 = arith.constant 0 : index
    %106 = vector.load %arg26[%c0_73, %c0_74] : memref<1x128xf32, #tpu.memory_space<vmem>>, vector<1x128xf32>
    %107 = vector.broadcast %106 : vector<1x128xf32> to vector<16x128xf32>
    %108 = arith.addf %105, %107 : vector<16x128xf32>
    %cst_75 = arith.constant 0.000000e+00 : f32
    %109 = vector.broadcast %cst_75 : f32 to vector<16x128xf32>
    %110 = arith.cmpf oge, %108, %109 : vector<16x128xf32>
    %cst_76 = arith.constant 0.00999999977 : f32
    %111 = vector.broadcast %cst_76 : f32 to vector<16x128xf32>
    %112 = arith.mulf %111, %108 : vector<16x128xf32>
    %113 = arith.select %110, %108, %112 : vector<16x128xi1>, vector<16x128xf32>
    %114 = arith.truncf %113 : vector<16x128xf32> to vector<16x128xbf16>
    %c0_77 = arith.constant 0 : index
    %c0_78 = arith.constant 0 : index
    %115 = vector.load %arg27[%c0_77, %c0_78] : memref<128x128xbf16, #tpu.memory_space<vmem>>, vector<128x128xbf16>
    %cst_79 = arith.constant dense<0.000000e+00> : vector<16x128xf32>
    %116 = tpu.matmul %114, %115, %cst_79 {dimension_numbers = #tpu.dot_dimension_numbers<[1], [0], [0], [1], [0, 0, 1, 1], [], []>} : vector<16x128xbf16>, vector<128x128xbf16>, vector<16x128xf32> -> vector<16x128xf32>
    %c0_80 = arith.constant 0 : index
    %c0_81 = arith.constant 0 : index
    %117 = vector.load %arg28[%c0_80, %c0_81] : memref<1x128xf32, #tpu.memory_space<vmem>>, vector<1x128xf32>
    %118 = vector.broadcast %117 : vector<1x128xf32> to vector<16x128xf32>
    %119 = arith.addf %116, %118 : vector<16x128xf32>
    %cst_82 = arith.constant 0.000000e+00 : f32
    %120 = vector.broadcast %cst_82 : f32 to vector<16x128xf32>
    %121 = arith.cmpf oge, %119, %120 : vector<16x128xf32>
    %cst_83 = arith.constant 0.00999999977 : f32
    %122 = vector.broadcast %cst_83 : f32 to vector<16x128xf32>
    %123 = arith.mulf %122, %119 : vector<16x128xf32>
    %124 = arith.select %121, %119, %123 : vector<16x128xi1>, vector<16x128xf32>
    %125 = arith.truncf %124 : vector<16x128xf32> to vector<16x128xbf16>
    %c0_84 = arith.constant 0 : index
    %c0_85 = arith.constant 0 : index
    %126 = vector.load %arg29[%c0_84, %c0_85] : memref<128x256xbf16, #tpu.memory_space<vmem>>, vector<128x256xbf16>
    %cst_86 = arith.constant dense<0.000000e+00> : vector<16x256xf32>
    %127 = tpu.matmul %125, %126, %cst_86 {dimension_numbers = #tpu.dot_dimension_numbers<[1], [0], [0], [1], [0, 0, 1, 1], [], []>} : vector<16x128xbf16>, vector<128x256xbf16>, vector<16x256xf32> -> vector<16x256xf32>
    %c0_87 = arith.constant 0 : index
    %c0_88 = arith.constant 0 : index
    %128 = vector.load %arg30[%c0_87, %c0_88] : memref<1x256xf32, #tpu.memory_space<vmem>>, vector<1x256xf32>
    %129 = vector.broadcast %128 : vector<1x256xf32> to vector<16x256xf32>
    %130 = arith.addf %127, %129 : vector<16x256xf32>
    %c0_89 = arith.constant 0 : index
    %c0_90 = arith.constant 0 : index
    %131 = vector.load %arg38[%c0_89, %c0_90] : memref<16x256xf32, #tpu.memory_space<vmem>>, vector<16x256xf32>
    tpu.vector_store %arg38[%c0_89, %c0_90], %130 {strides = array<i32>} : memref<16x256xf32, #tpu.memory_space<vmem>>, vector<16x256xf32>,
    %c0_91 = arith.constant 0 : index
    %c0_92 = arith.constant 0 : index
    %132 = vector.load %arg3[%c0_91, %c0_92] : memref<1x256xf32, #tpu.memory_space<vmem>>, vector<1x256xf32>
    %cst_93 = arith.constant -8.000000e+00 : f32
    %133 = vector.broadcast %cst_93 : f32 to vector<1x256xf32>
    %134 = arith.subf %133, %132 : vector<1x256xf32>
    %cst_94 = arith.constant 0.000000e+00 : f32
    %135 = vector.broadcast %cst_94 : f32 to vector<1x256xf32>
    %136 = arith.cmpf ogt, %134, %135 : vector<1x256xf32>
    %cst_95 = arith.constant 0.000000e+00 : f32
    %137 = vector.broadcast %cst_95 : f32 to vector<1x256xf32>
    %138 = arith.select %136, %134, %137 : vector<1x256xi1>, vector<1x256xf32>
    %139 = math.absf %134 : vector<1x256xf32>
    %cst_96 = arith.constant 0.000000e+00 : f32
    %140 = vector.broadcast %cst_96 : f32 to vector<1x256xf32>
    %141 = arith.subf %140, %139 : vector<1x256xf32>
    %142 = math.exp %141 : vector<1x256xf32>
    %cst_97 = arith.constant 1.000000e+00 : f32
    %143 = vector.broadcast %cst_97 : f32 to vector<1x256xf32>
    %144 = arith.addf %143, %142 : vector<1x256xf32>
    %145 = math.log %144 : vector<1x256xf32>
    %146 = arith.addf %138, %145 : vector<1x256xf32>
    %147 = arith.addf %132, %146 : vector<1x256xf32>
    %cst_98 = arith.constant 8.000000e+00 : f32
    %148 = vector.broadcast %cst_98 : f32 to vector<1x256xf32>
    %149 = arith.subf %132, %148 : vector<1x256xf32>
    %cst_99 = arith.constant 0.000000e+00 : f32
    %150 = vector.broadcast %cst_99 : f32 to vector<1x256xf32>
    %151 = arith.cmpf ogt, %149, %150 : vector<1x256xf32>
    %cst_100 = arith.constant 0.000000e+00 : f32
    %152 = vector.broadcast %cst_100 : f32 to vector<1x256xf32>
    %153 = arith.select %151, %149, %152 : vector<1x256xi1>, vector<1x256xf32>
    %154 = math.absf %149 : vector<1x256xf32>
    %cst_101 = arith.constant 0.000000e+00 : f32
    %155 = vector.broadcast %cst_101 : f32 to vector<1x256xf32>
    %156 = arith.subf %155, %154 : vector<1x256xf32>
    %157 = math.exp %156 : vector<1x256xf32>
    %cst_102 = arith.constant 1.000000e+00 : f32
    %158 = vector.broadcast %cst_102 : f32 to vector<1x256xf32>
    %159 = arith.addf %158, %157 : vector<1x256xf32>
    %160 = math.log %159 : vector<1x256xf32>
    %161 = arith.addf %153, %160 : vector<1x256xf32>
    %162 = arith.subf %147, %161 : vector<1x256xf32>
    %163 = arith.subf %0, %130 : vector<16x256xf32>
    %cst_103 = arith.constant 5.000000e-01 : f32
    %164 = vector.broadcast %cst_103 : f32 to vector<16x256xf32>
    %165 = arith.mulf %164, %163 : vector<16x256xf32>
    %166 = arith.mulf %165, %163 : vector<16x256xf32>
    %cst_104 = arith.constant -2.000000e+00 : f32
    %167 = vector.broadcast %cst_104 : f32 to vector<1x256xf32>
    %168 = arith.mulf %167, %162 : vector<1x256xf32>
    %169 = math.exp %168 : vector<1x256xf32>
    %170 = vector.broadcast %169 : vector<1x256xf32> to vector<16x256xf32>
    %171 = arith.mulf %166, %170 : vector<16x256xf32>
    %172 = vector.broadcast %162 : vector<1x256xf32> to vector<16x256xf32>
    %173 = arith.addf %171, %172 : vector<16x256xf32>
    %cst_105 = arith.constant 0.918938517 : f32
    %174 = vector.broadcast %cst_105 : f32 to vector<16x256xf32>
    %175 = arith.addf %173, %174 : vector<16x256xf32>
    %176 = vector.extract_strided_slice %175 {offsets = [0, 0], sizes = [16, 128], strides = [1, 1]} : vector<16x256xf32> to vector<16x128xf32>
    %177 = vector.extract_strided_slice %175 {offsets = [0, 128], sizes = [16, 128], strides = [1, 1]} : vector<16x256xf32> to vector<16x128xf32>
    %178 = arith.addf %176, %177 : vector<16x128xf32>
    %c0_106 = arith.constant 0 : index
    %c0_107 = arith.constant 0 : index
    %179 = vector.load %arg40[%c0_106, %c0_107] : memref<16x128xf32, #tpu.memory_space<vmem>>, vector<16x128xf32>
    tpu.vector_store %arg40[%c0_106, %c0_107], %178 {strides = array<i32>} : memref<16x128xf32, #tpu.memory_space<vmem>>, vector<16x128xf32>,
    %180 = arith.truncf %40 : vector<16x128xf32> to vector<16x128xbf16>
    %c0_108 = arith.constant 0 : index
    %c0_109 = arith.constant 0 : index
    %181 = vector.load %arg31[%c0_108, %c0_109] : memref<128x128xbf16, #tpu.memory_space<vmem>>, vector<128x128xbf16>
    %cst_110 = arith.constant dense<0.000000e+00> : vector<16x128xf32>
    %182 = tpu.matmul %180, %181, %cst_110 {dimension_numbers = #tpu.dot_dimension_numbers<[1], [0], [0], [1], [0, 0, 1, 1], [], []>} : vector<16x128xbf16>, vector<128x128xbf16>, vector<16x128xf32> -> vector<16x128xf32>
    %c0_111 = arith.constant 0 : index
    %c0_112 = arith.constant 0 : index
    %183 = vector.load %arg32[%c0_111, %c0_112] : memref<1x128xf32, #tpu.memory_space<vmem>>, vector<1x128xf32>
    %184 = vector.broadcast %183 : vector<1x128xf32> to vector<16x128xf32>
    %185 = arith.addf %182, %184 : vector<16x128xf32>
    %cst_113 = arith.constant 0.000000e+00 : f32
    %186 = vector.broadcast %cst_113 : f32 to vector<16x128xf32>
    %187 = arith.cmpf oge, %185, %186 : vector<16x128xf32>
    %cst_114 = arith.constant 0.00999999977 : f32
    %188 = vector.broadcast %cst_114 : f32 to vector<16x128xf32>
    %189 = arith.mulf %188, %185 : vector<16x128xf32>
    %190 = arith.select %187, %185, %189 : vector<16x128xi1>, vector<16x128xf32>
    %191 = arith.truncf %190 : vector<16x128xf32> to vector<16x128xbf16>
    %c0_115 = arith.constant 0 : index
    %c0_116 = arith.constant 0 : index
    %192 = vector.load %arg33[%c0_115, %c0_116] : memref<128x128xbf16, #tpu.memory_space<vmem>>, vector<128x128xbf16>
    %cst_117 = arith.constant dense<0.000000e+00> : vector<16x128xf32>
    %193 = tpu.matmul %191, %192, %cst_117 {dimension_numbers = #tpu.dot_dimension_numbers<[1], [0], [0], [1], [0, 0, 1, 1], [], []>} : vector<16x128xbf16>, vector<128x128xbf16>, vector<16x128xf32> -> vector<16x128xf32>
    %c0_118 = arith.constant 0 : index
    %c0_119 = arith.constant 0 : index
    %194 = vector.load %arg34[%c0_118, %c0_119] : memref<1x128xf32, #tpu.memory_space<vmem>>, vector<1x128xf32>
    %195 = vector.broadcast %194 : vector<1x128xf32> to vector<16x128xf32>
    %196 = arith.addf %193, %195 : vector<16x128xf32>
    %cst_120 = arith.constant 0.000000e+00 : f32
    %197 = vector.broadcast %cst_120 : f32 to vector<16x128xf32>
    %198 = arith.cmpf oge, %196, %197 : vector<16x128xf32>
    %cst_121 = arith.constant 0.00999999977 : f32
    %199 = vector.broadcast %cst_121 : f32 to vector<16x128xf32>
    %200 = arith.mulf %199, %196 : vector<16x128xf32>
    %201 = arith.select %198, %196, %200 : vector<16x128xi1>, vector<16x128xf32>
    %202 = arith.truncf %201 : vector<16x128xf32> to vector<16x128xbf16>
    %c0_122 = arith.constant 0 : index
    %c0_123 = arith.constant 0 : index
    %203 = vector.load %arg35[%c0_122, %c0_123] : memref<128x128xbf16, #tpu.memory_space<vmem>>, vector<128x128xbf16>
    %cst_124 = arith.constant dense<0.000000e+00> : vector<16x128xf32>
    %204 = tpu.matmul %202, %203, %cst_124 {dimension_numbers = #tpu.dot_dimension_numbers<[1], [0], [0], [1], [0, 0, 1, 1], [], []>} : vector<16x128xbf16>, vector<128x128xbf16>, vector<16x128xf32> -> vector<16x128xf32>
    %c0_125 = arith.constant 0 : index
    %c0_126 = arith.constant 0 : index
    %205 = vector.load %arg36[%c0_125, %c0_126] : memref<1x128xf32, #tpu.memory_space<vmem>>, vector<1x128xf32>
    %206 = vector.broadcast %205 : vector<1x128xf32> to vector<16x128xf32>
    %207 = arith.addf %204, %206 : vector<16x128xf32>
    %c0_127 = arith.constant 0 : index
    %c0_128 = arith.constant 0 : index
    %208 = vector.load %arg39[%c0_127, %c0_128] : memref<16x128xf32, #tpu.memory_space<vmem>>, vector<16x128xf32>
    tpu.vector_store %arg39[%c0_127, %c0_128], %207 {strides = array<i32>} : memref<16x128xf32, #tpu.memory_space<vmem>>, vector<16x128xf32>,
    return
  }
  func.func @transform_0(%arg0: i32) -> (i32, i32) {
    %c0_i32 = arith.constant 0 : i32
    %c0_i32_0 = arith.constant 0 : i32
    return %arg0, %c0_i32 : i32, i32
  }
  func.func @transform_1(%arg0: i32) -> (i32, i32) {
    %c0_i32 = arith.constant 0 : i32
    %c0_i32_0 = arith.constant 0 : i32
    return %arg0, %c0_i32 : i32, i32
  }
  func.func @transform_2(%arg0: i32) -> (i32, i32) {
    %c0_i32 = arith.constant 0 : i32
    %c0_i32_0 = arith.constant 0 : i32
    %c0_i32_1 = arith.constant 0 : i32
    return %c0_i32, %c0_i32_0 : i32, i32
  }
  func.func @transform_3(%arg0: i32) -> (i32, i32) {
    %c0_i32 = arith.constant 0 : i32
    %c0_i32_0 = arith.constant 0 : i32
    %c0_i32_1 = arith.constant 0 : i32
    return %c0_i32, %c0_i32_0 : i32, i32
  }
  func.func @transform_4(%arg0: i32) -> (i32, i32) {
    %c0_i32 = arith.constant 0 : i32
    %c0_i32_0 = arith.constant 0 : i32
    %c0_i32_1 = arith.constant 0 : i32
    return %c0_i32, %c0_i32_0 : i32, i32
  }
  func.func @transform_5(%arg0: i32) -> (i32, i32) {
    %c0_i32 = arith.constant 0 : i32
    %c0_i32_0 = arith.constant 0 : i32
    %c0_i32_1 = arith.constant 0 : i32
    return %c0_i32, %c0_i32_0 : i32, i32
  }
  func.func @transform_6(%arg0: i32) -> (i32, i32) {
    %c0_i32 = arith.constant 0 : i32
    %c0_i32_0 = arith.constant 0 : i32
    %c0_i32_1 = arith.constant 0 : i32
    return %c0_i32, %c0_i32_0 : i32, i32
  }
  func.func @transform_7(%arg0: i32) -> (i32, i32) {
    %c0_i32 = arith.constant 0 : i32
    %c0_i32_0 = arith.constant 0 : i32
    %c0_i32_1 = arith.constant 0 : i32
    return %c0_i32, %c0_i32_0 : i32, i32
  }
  func.func @transform_8(%arg0: i32) -> (i32, i32) {
    %c0_i32 = arith.constant 0 : i32
    %c0_i32_0 = arith.constant 0 : i32
    %c0_i32_1 = arith.constant 0 : i32
    return %c0_i32, %c0_i32_0 : i32, i32
  }
  func.func @transform_9(%arg0: i32) -> (i32, i32) {
    %c0_i32 = arith.constant 0 : i32
    %c0_i32_0 = arith.constant 0 : i32
    %c0_i32_1 = arith.constant 0 : i32
    return %c0_i32, %c0_i32_0 : i32, i32
  }
  func.func @transform_10(%arg0: i32) -> (i32, i32) {
    %c0_i32 = arith.constant 0 : i32
    %c0_i32_0 = arith.constant 0 : i32
    %c0_i32_1 = arith.constant 0 : i32
    return %c0_i32, %c0_i32_0 : i32, i32
  }
  func.func @transform_11(%arg0: i32) -> (i32, i32) {
    %c0_i32 = arith.constant 0 : i32
    %c0_i32_0 = arith.constant 0 : i32
    %c0_i32_1 = arith.constant 0 : i32
    return %c0_i32, %c0_i32_0 : i32, i32
  }
  func.func @transform_12(%arg0: i32) -> (i32, i32) {
    %c0_i32 = arith.constant 0 : i32
    %c0_i32_0 = arith.constant 0 : i32
    %c0_i32_1 = arith.constant 0 : i32
    return %c0_i32, %c0_i32_0 : i32, i32
  }
  func.func @transform_13(%arg0: i32) -> (i32, i32) {
    %c0_i32 = arith.constant 0 : i32
    %c0_i32_0 = arith.constant 0 : i32
    %c0_i32_1 = arith.constant 0 : i32
    return %c0_i32, %c0_i32_0 : i32, i32
  }
  func.func @transform_14(%arg0: i32) -> (i32, i32) {
    %c0_i32 = arith.constant 0 : i32
    %c0_i32_0 = arith.constant 0 : i32
    %c0_i32_1 = arith.constant 0 : i32
    return %c0_i32, %c0_i32_0 : i32, i32
  }
  func.func @transform_15(%arg0: i32) -> (i32, i32) {
    %c0_i32 = arith.constant 0 : i32
    %c0_i32_0 = arith.constant 0 : i32
    %c0_i32_1 = arith.constant 0 : i32
    return %c0_i32, %c0_i32_0 : i32, i32
  }
  func.func @transform_16(%arg0: i32) -> (i32, i32) {
    %c0_i32 = arith.constant 0 : i32
    %c0_i32_0 = arith.constant 0 : i32
    %c0_i32_1 = arith.constant 0 : i32
    return %c0_i32, %c0_i32_0 : i32, i32
  }
  func.func @transform_17(%arg0: i32) -> (i32, i32) {
    %c0_i32 = arith.constant 0 : i32
    %c0_i32_0 = arith.constant 0 : i32
    %c0_i32_1 = arith.constant 0 : i32
    return %c0_i32, %c0_i32_0 : i32, i32
  }
  func.func @transform_18(%arg0: i32) -> (i32, i32) {
    %c0_i32 = arith.constant 0 : i32
    %c0_i32_0 = arith.constant 0 : i32
    %c0_i32_1 = arith.constant 0 : i32
    return %c0_i32, %c0_i32_0 : i32, i32
  }
  func.func @transform_19(%arg0: i32) -> (i32, i32) {
    %c0_i32 = arith.constant 0 : i32
    %c0_i32_0 = arith.constant 0 : i32
    %c0_i32_1 = arith.constant 0 : i32
    return %c0_i32, %c0_i32_0 : i32, i32
  }
  func.func @transform_20(%arg0: i32) -> (i32, i32) {
    %c0_i32 = arith.constant 0 : i32
    %c0_i32_0 = arith.constant 0 : i32
    %c0_i32_1 = arith.constant 0 : i32
    return %c0_i32, %c0_i32_0 : i32, i32
  }
  func.func @transform_21(%arg0: i32) -> (i32, i32) {
    %c0_i32 = arith.constant 0 : i32
    %c0_i32_0 = arith.constant 0 : i32
    %c0_i32_1 = arith.constant 0 : i32
    return %c0_i32, %c0_i32_0 : i32, i32
  }
  func.func @transform_22(%arg0: i32) -> (i32, i32) {
    %c0_i32 = arith.constant 0 : i32
    %c0_i32_0 = arith.constant 0 : i32
    %c0_i32_1 = arith.constant 0 : i32
    return %c0_i32, %c0_i32_0 : i32, i32
  }
  func.func @transform_23(%arg0: i32) -> (i32, i32) {
    %c0_i32 = arith.constant 0 : i32
    %c0_i32_0 = arith.constant 0 : i32
    %c0_i32_1 = arith.constant 0 : i32
    return %c0_i32, %c0_i32_0 : i32, i32
  }
  func.func @transform_24(%arg0: i32) -> (i32, i32) {
    %c0_i32 = arith.constant 0 : i32
    %c0_i32_0 = arith.constant 0 : i32
    %c0_i32_1 = arith.constant 0 : i32
    return %c0_i32, %c0_i32_0 : i32, i32
  }
  func.func @transform_25(%arg0: i32) -> (i32, i32) {
    %c0_i32 = arith.constant 0 : i32
    %c0_i32_0 = arith.constant 0 : i32
    %c0_i32_1 = arith.constant 0 : i32
    return %c0_i32, %c0_i32_0 : i32, i32
  }
  func.func @transform_26(%arg0: i32) -> (i32, i32) {
    %c0_i32 = arith.constant 0 : i32
    %c0_i32_0 = arith.constant 0 : i32
    %c0_i32_1 = arith.constant 0 : i32
    return %c0_i32, %c0_i32_0 : i32, i32
  }
  func.func @transform_27(%arg0: i32) -> (i32, i32) {
    %c0_i32 = arith.constant 0 : i32
    %c0_i32_0 = arith.constant 0 : i32
    %c0_i32_1 = arith.constant 0 : i32
    return %c0_i32, %c0_i32_0 : i32, i32
  }
  func.func @transform_28(%arg0: i32) -> (i32, i32) {
    %c0_i32 = arith.constant 0 : i32
    %c0_i32_0 = arith.constant 0 : i32
    %c0_i32_1 = arith.constant 0 : i32
    return %c0_i32, %c0_i32_0 : i32, i32
  }
  func.func @transform_29(%arg0: i32) -> (i32, i32) {
    %c0_i32 = arith.constant 0 : i32
    %c0_i32_0 = arith.constant 0 : i32
    %c0_i32_1 = arith.constant 0 : i32
    return %c0_i32, %c0_i32_0 : i32, i32
  }
  func.func @transform_30(%arg0: i32) -> (i32, i32) {
    %c0_i32 = arith.constant 0 : i32
    %c0_i32_0 = arith.constant 0 : i32
    %c0_i32_1 = arith.constant 0 : i32
    return %c0_i32, %c0_i32_0 : i32, i32
  }
  func.func @transform_31(%arg0: i32) -> (i32, i32) {
    %c0_i32 = arith.constant 0 : i32
    %c0_i32_0 = arith.constant 0 : i32
    %c0_i32_1 = arith.constant 0 : i32
    return %c0_i32, %c0_i32_0 : i32, i32
  }
  func.func @transform_32(%arg0: i32) -> (i32, i32) {
    %c0_i32 = arith.constant 0 : i32
    %c0_i32_0 = arith.constant 0 : i32
    %c0_i32_1 = arith.constant 0 : i32
    return %c0_i32, %c0_i32_0 : i32, i32
  }
  func.func @transform_33(%arg0: i32) -> (i32, i32) {
    %c0_i32 = arith.constant 0 : i32
    %c0_i32_0 = arith.constant 0 : i32
    %c0_i32_1 = arith.constant 0 : i32
    return %c0_i32, %c0_i32_0 : i32, i32
  }
  func.func @transform_34(%arg0: i32) -> (i32, i32) {
    %c0_i32 = arith.constant 0 : i32
    %c0_i32_0 = arith.constant 0 : i32
    %c0_i32_1 = arith.constant 0 : i32
    return %c0_i32, %c0_i32_0 : i32, i32
  }
  func.func @transform_35(%arg0: i32) -> (i32, i32) {
    %c0_i32 = arith.constant 0 : i32
    %c0_i32_0 = arith.constant 0 : i32
    %c0_i32_1 = arith.constant 0 : i32
    return %c0_i32, %c0_i32_0 : i32, i32
  }
  func.func @transform_36(%arg0: i32) -> (i32, i32) {
    %c0_i32 = arith.constant 0 : i32
    %c0_i32_0 = arith.constant 0 : i32
    return %arg0, %c0_i32 : i32, i32
  }
  func.func @transform_37(%arg0: i32) -> (i32, i32) {
    %c0_i32 = arith.constant 0 : i32
    %c0_i32_0 = arith.constant 0 : i32
    return %arg0, %c0_i32 : i32, i32
  }
  func.func @transform_38(%arg0: i32) -> (i32, i32) {
    %c0_i32 = arith.constant 0 : i32
    %c0_i32_0 = arith.constant 0 : i32
    return %arg0, %c0_i32 : i32, i32
  }
  func.func @transform_39(%arg0: i32) -> (i32, i32) {
    %c0_i32 = arith.constant 0 : i32
    %c0_i32_0 = arith.constant 0 : i32
    return %arg0, %c0_i32 : i32, i32
  }
}

</mosaic_0001>

<bundles_post_ra>
// kernel: _lambda_.1
= control target key start
LH: loop header
LB: loop body
LE: loop exit
PB: predicated region body
PF: predicated region fallthrough
CT: control target
= control target key end

     0   :  { %s4438_s6 = smov 1   ;;  %s4439_s10 = smov 2   ;;  %s5098_s0 = inlined_call_operand.smem [shape: u32[40], index: -1, kind: input, shape index: {}] }
   0x1   :  { %s4520_s5 = sld [smem:[%s5098_s0]]   ;;  %s4440_s14 = smov 3  }
   0x2   :  { %s4525_s9 = sld [smem:[%s5098_s0 + %s4438_s6]]   ;;  %s4441_s18 = smov 4  }
   0x3   :  { %s4530_s13 = sld [smem:[%s5098_s0 + %s4439_s10]]   ;;  %s4442_s22 = smov 5  }
   0x4   :  { %s4535_s17 = sld [smem:[%s5098_s0 + %s4440_s14]]   ;;  %s4443_s26 = smov 6  }
   0x5   :  { %s4540_s21 = sld [smem:[%s5098_s0 + %s4441_s18]]   ;;  %s4444_s30 = smov 7  }
   0x6   :  { %s4545_s25 = sld [smem:[%s5098_s0 + %s4442_s22]]   ;;  %s4445_s4 = smov 8  }
   0x7   :  { %5119 = sst [smem:[#allocation64_spill]] %s4520_s5  ;;  %s4446_s10 = smov 9  }
   0x8   :  { %5120 = sst [smem:[#allocation65_spill]] %s4525_s9  ;;  %s4447_s15 = smov 10  }
   0x9   :  { %5121 = sst [smem:[#allocation66_spill]] %s4530_s13  ;;  %s4448_s20 = smov 11  }
   0xa   :  { %5122 = sst [smem:[#allocation67_spill]] %s4535_s17  ;;  %s4450_s1 = smov 13  }
   0xb   :  { %5123 = sst [smem:[#allocation68_spill]] %s4540_s21  ;;  %s4451_s7 = smov 14  }
   0xc   :  { %s4550_s29 = sld [smem:[%s5098_s0 + %s4443_s26]]   ;;  %s4449_s26 = smov 12  }
   0xd   :  { %s4555_s3 = sld [smem:[%s5098_s0 + %s4444_s30]]   ;;  %s4453_s22 = smov 16  }
   0xe   :  { %s4560_s8 = sld [smem:[%s5098_s0 + %s4445_s4]]   ;;  %s4454_s28 = smov 17  }
   0xf   :  { %s4565_s14 = sld [smem:[%s5098_s0 + %s4446_s10]]  }
  0x10   :  { %s4570_s19 = sld [smem:[%s5098_s0 + %s4447_s15]]   ;;  %s4452_s15 = smov 15  }
  0x11   :  { %s4575_s24 = sld [smem:[%s5098_s0 + %s4448_s20]]  }
  0x12   :  { %5124 = sst [smem:[#allocation69_spill]] %s4550_s29 }
  0x13   :  { %s4580_s30 = sld [smem:[%s5098_s0 + %s4449_s26]]  }
  0x14   :  { %5125 = sst [smem:[#allocation70_spill]] %s4560_s8 }
  0x15   :  { %s4585_s6 = sld [smem:[%s5098_s0 + %s4450_s1]]  }
  0x16   :  { %5126 = sst [smem:[#allocation71_spill]] %s4570_s19 }
  0x17   :  { %s4590_s12 = sld [smem:[%s5098_s0 + %s4451_s7]]   ;;  %s4455_s7 = smov 18  }
  0x18   :  { %s4595_s20 = sld [smem:[%s5098_s0 + %s4452_s15]]   ;;  %s4456_s15 = smov 19  }
  0x19   :  { %5127 = sst [smem:[#allocation72_spill]] %s4580_s30 }
  0x1a   :  { %s4600_s27 = sld [smem:[%s5098_s0 + %s4453_s22]]   ;;  %s4457_s22 = smov 20  }
  0x1b   :  { %s4605_s4 = sld [smem:[%s5098_s0 + %s4454_s28]]   ;;  %s4458_s28 = smov 21  }
  0x1c   :  { %s4610_s13 = sld [smem:[%s5098_s0 + %s4455_s7]]   ;;  %s4459_s7 = smov 22  }
  0x1d   :  { %5128 = sst [smem:[#allocation73_spill]] %s4590_s12 }
  0x1e   :  { %s4615_s9 = sld [smem:[%s5098_s0 + %s4456_s15]]   ;;  %s4460_s15 = smov 23  }
  0x1f   :  { %s4620_s5 = sld [smem:[%s5098_s0 + %s4457_s22]]   ;;  %s4461_s22 = smov 24  }
  0x20   :  { %5129 = sst [smem:[#allocation74_spill]] %s4600_s27 }
  0x21   :  { %s4625_s17 = sld [smem:[%s5098_s0 + %s4458_s28]]   ;;  %s4462_s28 = smov 25  }
  0x22   :  { %5130 = sst [smem:[#allocation75_spill]] %s4610_s13 }
  0x23   :  { %s4630_s13 = sld [smem:[%s5098_s0 + %s4459_s7]]   ;;  %s4463_s7 = smov 26  }
  0x24   :  { %s4635_s27 = sld [smem:[%s5098_s0 + %s4460_s15]]   ;;  %s4464_s15 = smov 27  }
  0x25   :  { %5131 = sst [smem:[#allocation76_spill]] %s4620_s5 }
  0x26   :  { %s4640_s5 = sld [smem:[%s5098_s0 + %s4461_s22]]   ;;  %s4465_s22 = smov 28  }
  0x27   :  { %s4645_s12 = sld [smem:[%s5098_s0 + %s4462_s28]]   ;;  %s4466_s28 = smov 29  }
  0x28   :  { %s4655_s30 = sld [smem:[%s5098_s0 + %s4464_s15]]   ;;  %s4468_s15 = smov 31  }
  0x29   :  { %5132 = sst [smem:[#allocation77_spill]] %s4630_s13 }
  0x2a   :  { %s4650_s13 = sld [smem:[%s5098_s0 + %s4463_s7]]   ;;  %s4467_s7 = smov 30  }
  0x2b   :  { %s4670_s19 = sld [smem:[%s5098_s0 + %s4467_s7]]   ;;  %s4471_s7 = smov 34  }
  0x2c   :  { %5133 = sst [smem:[#allocation78_spill]] %s4640_s5 }
  0x2d   :  { %5134 = sst [smem:[#allocation79_spill]] %s4645_s12 }
  0x2e   :  { %5135 = sst [smem:[#allocation80_spill]] %s4655_s30 }
  0x2f   :  { %s4660_s5 = sld [smem:[%s5098_s0 + %s4465_s22]]   ;;  %s4469_s22 = smov 32  }
  0x30   :  { %s4665_s12 = sld [smem:[%s5098_s0 + %s4466_s28]]   ;;  %s4470_s28 = smov 33  }
  0x31   :  { %5137 = sst [smem:[#allocation82_spill]] %s4670_s19 }
  0x32   :  { %s4675_s30 = sld [smem:[%s5098_s0 + %s4468_s15]]   ;;  %s4472_s15 = smov 35  }
  0x33   :  { %s4685_s8 = sld [smem:[%s5098_s0 + %s4470_s28]]   ;;  %s4474_s28 = smov 37  }
  0x34   :  { %s4690_s19 = sld [smem:[%s5098_s0 + %s4471_s7]]   ;;  %s4475_s7 = smov 38  }
  0x35   :  { %5136 = sst [smem:[#allocation81_spill]] %s4660_s5 }
  0x36   :  { %s4680_s5 = sld [smem:[%s5098_s0 + %s4469_s22]]   ;;  %s4473_s22 = smov 36  }
  0x37   :  { %s4695_s29 = sld [smem:[%s5098_s0 + %s4472_s15]]   ;;  %s4476_s15 = smov 39  }
  0x38   :  { %s4705_s21 = sld [smem:[%s5098_s0 + %s4474_s28]]  }
  0x3a   :  { %5139 = sst [smem:[#allocation84_spill]] %s4690_s19 }
  0x3b   :  { %s4710_s19 = sld [smem:[%s5098_s0 + %s4475_s7]]  }
  0x3c   :  { %5138 = sst [smem:[#allocation83_spill]] %s4680_s5 }
  0x3d   :  { %5140 = sst [smem:[#allocation85_spill]] %s4695_s29 }
  0x3e   :  { %s4700_s5 = sld [smem:[%s5098_s0 + %s4473_s22]]  }
  0x3f   :  { %s4715_s29 = sld [smem:[%s5098_s0 + %s4476_s15]]  }
  0x40   :  { %85 = vsyncpa [#allocation3], 0 }
  0x41   :  { %86 = vsyncpa [#allocation5], 0 }
  0x42   :  { %87 = vsyncpa [#allocation8], 0 }
  0x43   :  { %88 = vsyncpa [#allocation11], 0 }
  0x44   :  { %89 = vsyncpa [#allocation14], 0 }
  0x45   :  { %90 = vsyncpa [#allocation17], 0 }
  0x46   :  { %91 = vsyncpa [#allocation20], 0 }
  0x47   :  { %92 = vsyncpa [#allocation23], 0 }
  0x48   :  { %93 = vsyncpa [#allocation26], 0 }
  0x49   :  { %94 = vsyncpa [#allocation29], 0 }
  0x4a   :  { %95 = vsyncpa [#allocation32], 0 }
  0x4b   :  { %96 = vsyncpa [#allocation35], 0 }
  0x4c   :  { %97 = vsyncpa [#allocation38], 0 }
  0x4d   :  { %98 = vsyncpa [#allocation41], 0 }
  0x4e   :  { %99 = vsyncpa [#allocation44], 0 }
  0x4f   :  { %100 = vsyncpa [#allocation47], 0  ;;  %s4477_s0 = smov [#allocation4]   ;;  %s3746_s23 = scalar_lea.hbm %s4545_s25, 1024 }
  0x50   :  { %s124_s22 = sshll.u32 %s4477_s0, 4  ;;  %p3747_p0 = scmp.ne.s32.totalorder %s4545_s25, %s3746_s23  ;;  %s125_s22 = int_to_ptr.vmem [resolvable:$true] %s124_s22 }
  0x51   :  { %p3750_p1 = scmp.lt.u32.totalorder %s3746_s23, %s4545_s25 }
  0x53   :  { %p3752_p2 = pnand %p3750_p1, %p3747_p0 }
  0x55   :  { %3755 = shalt.err (!%p3752_p2)
}
  0x56   :  { %s3756_s26 = scalar_lea.vmem %s125_s22, 1024  ;;  %p3761_p4 = scmp.lt.s32.totalorder %s125_s22, %s125_s22 }
  0x57   :  { %p3757_p3 = scmp.ne.s32.totalorder %s125_s22, %s3756_s26  ;;  %p3762_p5 = scmp.lt.s32.totalorder %s3756_s26, %s3756_s26 }
  0x59   :  { %p3763_p6 = por %p3762_p5, %p3761_p4 }
  0x5b   :  { %p3764_p7 = pnand %p3763_p6, %p3757_p3 }
  0x5d   :  { %3767 = shalt.err (!%p3764_p7)
}
  0x5e   :  { %s4478_s28 = smov 64   ;;  %s4479_s1 = smov 4  }
  0x5f   :  { %130 = dma.hbm_to_vmem [thread:$0]  %s4545_s25, 1024, %s125_s22, [#allocation5], %s4478_s28, %s4478_s28, %s4479_s1  }
  0x60   :  { %s4480_s2 = smov [#allocation7]   ;;  %s4481_s10 = smov [#allocation10]  }
  0x61   :  { %s146_s7 = sshll.u32 %s4480_s2, 4  ;;  %s168_s11 = sshll.u32 %s4481_s10, 4  ;;  %s147_s7 = int_to_ptr.vmem [resolvable:$true] %s146_s7  ;;  %s169_s11 = int_to_ptr.vmem [resolvable:$true] %s168_s11 }
  0x62   :  { %s3768_s15 = scalar_lea.hbm %s4555_s3, 1024 }
  0x63   :  { %p3769_p8 = scmp.ne.s32.totalorder %s4555_s3, %s3768_s15  ;;  %p3772_p9 = scmp.lt.u32.totalorder %s3768_s15, %s4555_s3 }
  0x65   :  { %p3774_p10 = pnand %p3772_p9, %p3769_p8 }
  0x67   :  { %3777 = shalt.err (!%p3774_p10)
}
  0x68   :  { %s3778_s16 = scalar_lea.vmem %s147_s7, 1024  ;;  %p3783_p12 = scmp.lt.s32.totalorder %s147_s7, %s147_s7 }
  0x69   :  { %p3779_p11 = scmp.ne.s32.totalorder %s147_s7, %s3778_s16  ;;  %p3784_p13 = scmp.lt.s32.totalorder %s3778_s16, %s3778_s16 }
  0x6b   :  { %p3785_p0 = por %p3784_p13, %p3783_p12 }
  0x6d   :  { %p3786_p1 = pnand %p3785_p0, %p3779_p11 }
  0x6f   :  { %3789 = shalt.err (!%p3786_p1)
}
  0x70   :  { %152 = dma.hbm_to_vmem [thread:$0]  %s4555_s3, 1024, %s147_s7, [#allocation8], %s4478_s28, %s4478_s28, %s4479_s1  }
  0x71   :  { %s3790_s25 = scalar_lea.hbm %s4565_s14, 1024 }
  0x72   :  { %p3791_p2 = scmp.ne.s32.totalorder %s4565_s14, %s3790_s25  ;;  %p3794_p3 = scmp.lt.u32.totalorder %s3790_s25, %s4565_s14 }
  0x74   :  { %p3796_p4 = pnand %p3794_p3, %p3791_p2 }
  0x76   :  { %3799 = shalt.err (!%p3796_p4)
}
  0x77   :  { %s3800_s18 = scalar_lea.vmem %s169_s11, 1024  ;;  %p3805_p6 = scmp.lt.s32.totalorder %s169_s11, %s169_s11 }
  0x78   :  { %p3801_p5 = scmp.ne.s32.totalorder %s169_s11, %s3800_s18  ;;  %p3806_p7 = scmp.lt.s32.totalorder %s3800_s18, %s3800_s18 }
  0x7a   :  { %p3807_p8 = por %p3806_p7, %p3805_p6 }
  0x7c   :  { %p3808_p9 = pnand %p3807_p8, %p3801_p5 }
  0x7e   :  { %3811 = shalt.err (!%p3808_p9)
}
  0x7f   :  { %174 = dma.hbm_to_vmem [thread:$0]  %s4565_s14, 1024, %s169_s11, [#allocation11], %s4478_s28, %s4478_s28, %s4479_s1  }
  0x80   :  { %s4482_s3 = smov [#allocation13]   ;;  %s4483_s22 = smov [#allocation16]  }
  0x81   :  { %s190_s0 = sshll.u32 %s4482_s3, 4  ;;  %s215_s23 = sshll.u32 %s4483_s22, 4  ;;  %s191_s0 = int_to_ptr.vmem [resolvable:$true] %s190_s0  ;;  %s216_s23 = int_to_ptr.vmem [resolvable:$true] %s215_s23 }
  0x82   :  { %s3812_s26 = scalar_lea.hbm %s4575_s24, 1024 }
  0x83   :  { %p3813_p10 = scmp.ne.s32.totalorder %s4575_s24, %s3812_s26  ;;  %p3816_p11 = scmp.lt.u32.totalorder %s3812_s26, %s4575_s24 }
  0x85   :  { %p3818_p12 = pnand %p3816_p11, %p3813_p10 }
  0x87   :  { %3821 = shalt.err (!%p3818_p12)
}
  0x88   :  { %s3822_s2 = scalar_lea.vmem %s191_s0, 1024  ;;  %p3827_p0 = scmp.lt.s32.totalorder %s191_s0, %s191_s0 }
  0x89   :  { %p3823_p13 = scmp.ne.s32.totalorder %s191_s0, %s3822_s2  ;;  %p3828_p1 = scmp.lt.s32.totalorder %s3822_s2, %s3822_s2 }
  0x8b   :  { %p3829_p2 = por %p3828_p1, %p3827_p0 }
  0x8d   :  { %p3830_p3 = pnand %p3829_p2, %p3823_p13 }
  0x8f   :  { %3833 = shalt.err (!%p3830_p3)
}
  0x90   :  { %196 = dma.hbm_to_vmem [thread:$0]  %s4575_s24, 1024, %s191_s0, [#allocation14], %s4478_s28, %s4478_s28, %s4479_s1  }
  0x91   :  { %s3834_s14 = scalar_lea.hbm %s4585_s6, 16 }
  0x92   :  { %p3835_p4 = scmp.ne.s32.totalorder %s4585_s6, %s3834_s14  ;;  %p3838_p5 = scmp.lt.u32.totalorder %s3834_s14, %s4585_s6 }
  0x94   :  { %p3840_p6 = pnand %p3838_p5, %p3835_p4 }
  0x96   :  { %3843 = shalt.err (!%p3840_p6)
}
  0x97   :  { %s3844_s7 = scalar_lea.vmem %s216_s23, 16  ;;  %s3848_s10 = scalar_lea.vmem %s216_s23, 32 }
  0x98   :  { %p3845_p7 = scmp.ne.s32.totalorder %s216_s23, %s3844_s7  ;;  %p3849_p8 = scmp.lt.s32.totalorder %s216_s23, %s216_s23 }
  0x99   :  { %p3850_p9 = scmp.lt.s32.totalorder %s3848_s10, %s3844_s7 }
  0x9b   :  { %p3851_p10 = por %p3850_p9, %p3849_p8 }
  0x9d   :  { %p3852_p11 = pnand %p3851_p10, %p3845_p7 }
  0x9f   :  { %3855 = shalt.err (!%p3852_p11)
}
  0xa0   :  { %218 = dma.hbm_to_vmem [thread:$0]  %s4585_s6, 16, %s216_s23, [#allocation17]  }
  0xa1   :  { %s4484_s24 = smov [#allocation19]   ;;  %s4485_s15 = smov [#allocation22]  }
  0xa2   :  { %s237_s11 = sshll.u32 %s4484_s24, 4  ;;  %s259_s16 = sshll.u32 %s4485_s15, 4  ;;  %s238_s11 = int_to_ptr.vmem [resolvable:$true] %s237_s11  ;;  %s260_s16 = int_to_ptr.vmem [resolvable:$true] %s259_s16 }
  0xa3   :  { %s3856_s25 = scalar_lea.hbm %s4595_s20, 16 }
  0xa4   :  { %p3857_p12 = scmp.ne.s32.totalorder %s4595_s20, %s3856_s25  ;;  %p3860_p13 = scmp.lt.u32.totalorder %s3856_s25, %s4595_s20 }
  0xa6   :  { %p3862_p0 = pnand %p3860_p13, %p3857_p12 }
  0xa8   :  { %3865 = shalt.err (!%p3862_p0)
}
  0xa9   :  { %s3866_s18 = scalar_lea.vmem %s238_s11, 16  ;;  %s3870_s3 = scalar_lea.vmem %s238_s11, 32 }
  0xaa   :  { %p3867_p1 = scmp.ne.s32.totalorder %s238_s11, %s3866_s18  ;;  %p3871_p2 = scmp.lt.s32.totalorder %s238_s11, %s238_s11 }
  0xab   :  { %p3872_p3 = scmp.lt.s32.totalorder %s3870_s3, %s3866_s18 }
  0xad   :  { %p3873_p4 = por %p3872_p3, %p3871_p2 }
  0xaf   :  { %p3874_p5 = pnand %p3873_p4, %p3867_p1 }
  0xb1   :  { %3877 = shalt.err (!%p3874_p5)
}
  0xb2   :  { %240 = dma.hbm_to_vmem [thread:$0]  %s4595_s20, 16, %s238_s11, [#allocation20]  }
  0xb3   :  { %s3878_s6 = scalar_lea.hbm %s4605_s4, 16 }
  0xb4   :  { %p3879_p6 = scmp.ne.s32.totalorder %s4605_s4, %s3878_s6  ;;  %p3882_p7 = scmp.lt.u32.totalorder %s3878_s6, %s4605_s4 }
  0xb6   :  { %p3884_p8 = pnand %p3882_p7, %p3879_p6 }
  0xb8   :  { %3887 = shalt.err (!%p3884_p8)
}
  0xb9   :  { %s3888_s0 = scalar_lea.vmem %s260_s16, 16  ;;  %s3892_s22 = scalar_lea.vmem %s260_s16, 32 }
  0xba   :  { %p3889_p9 = scmp.ne.s32.totalorder %s260_s16, %s3888_s0  ;;  %p3893_p10 = scmp.lt.s32.totalorder %s260_s16, %s260_s16 }
  0xbb   :  { %p3894_p11 = scmp.lt.s32.totalorder %s3892_s22, %s3888_s0 }
  0xbd   :  { %p3895_p12 = por %p3894_p11, %p3893_p10 }
  0xbf   :  { %p3896_p13 = pnand %p3895_p12, %p3889_p9 }
  0xc1   :  { %3899 = shalt.err (!%p3896_p13)
}
  0xc2   :  { %262 = dma.hbm_to_vmem [thread:$0]  %s4605_s4, 16, %s260_s16, [#allocation23]  }
  0xc3   :  { %s4486_s20 = smov [#allocation25]   ;;  %s4487_s26 = smov [#allocation28]  }
  0xc4   :  { %s281_s23 = sshll.u32 %s4486_s20, 4  ;;  %s303_s2 = sshll.u32 %s4487_s26, 4  ;;  %s282_s23 = int_to_ptr.vmem [resolvable:$true] %s281_s23  ;;  %s304_s2 = int_to_ptr.vmem [resolvable:$true] %s303_s2 }
  0xc5   :  { %s3900_s14 = scalar_lea.hbm %s4615_s9, 16 }
  0xc6   :  { %p3901_p0 = scmp.ne.s32.totalorder %s4615_s9, %s3900_s14  ;;  %p3904_p1 = scmp.lt.u32.totalorder %s3900_s14, %s4615_s9 }
  0xc8   :  { %p3906_p2 = pnand %p3904_p1, %p3901_p0 }
  0xca   :  { %3909 = shalt.err (!%p3906_p2)
}
  0xcb   :  { %s3910_s7 = scalar_lea.vmem %s282_s23, 16  ;;  %s3914_s10 = scalar_lea.vmem %s282_s23, 32 }
  0xcc   :  { %p3911_p3 = scmp.ne.s32.totalorder %s282_s23, %s3910_s7  ;;  %p3915_p4 = scmp.lt.s32.totalorder %s282_s23, %s282_s23 }
  0xcd   :  { %p3916_p5 = scmp.lt.s32.totalorder %s3914_s10, %s3910_s7 }
  0xcf   :  { %p3917_p6 = por %p3916_p5, %p3915_p4 }
  0xd1   :  { %p3918_p7 = pnand %p3917_p6, %p3911_p3 }
  0xd3   :  { %3921 = shalt.err (!%p3918_p7)
}
  0xd4   :  { %284 = dma.hbm_to_vmem [thread:$0]  %s4615_s9, 16, %s282_s23, [#allocation26]  }
  0xd5   :  { %s3922_s4 = scalar_lea.hbm %s4625_s17, 16 }
  0xd6   :  { %p3923_p8 = scmp.ne.s32.totalorder %s4625_s17, %s3922_s4  ;;  %p3926_p9 = scmp.lt.u32.totalorder %s3922_s4, %s4625_s17 }
  0xd8   :  { %p3928_p10 = pnand %p3926_p9, %p3923_p8 }
  0xda   :  { %3931 = shalt.err (!%p3928_p10)
}
  0xdb   :  { %s3932_s24 = scalar_lea.vmem %s304_s2, 16  ;;  %s3936_s11 = scalar_lea.vmem %s304_s2, 32 }
  0xdc   :  { %p3933_p11 = scmp.ne.s32.totalorder %s304_s2, %s3932_s24  ;;  %p3937_p12 = scmp.lt.s32.totalorder %s304_s2, %s304_s2 }
  0xdd   :  { %p3938_p13 = scmp.lt.s32.totalorder %s3936_s11, %s3932_s24 }
  0xdf   :  { %p3939_p0 = por %p3938_p13, %p3937_p12 }
  0xe1   :  { %p3940_p1 = pnand %p3939_p0, %p3933_p11 }
  0xe3   :  { %3943 = shalt.err (!%p3940_p1)
}
  0xe4   :  { %306 = dma.hbm_to_vmem [thread:$0]  %s4625_s17, 16, %s304_s2, [#allocation29]  }
  0xe5   :  { %s4488_s9 = smov [#allocation31]   ;;  %s4489_s16 = smov [#allocation34]  }
  0xe6   :  { %s325_s15 = sshll.u32 %s4488_s9, 4  ;;  %s348_s25 = sshll.u32 %s4489_s16, 4  ;;  %s326_s15 = int_to_ptr.vmem [resolvable:$true] %s325_s15  ;;  %s349_s25 = int_to_ptr.vmem [resolvable:$true] %s348_s25 }
  0xe7   :  { %s3944_s18 = scalar_lea.hbm %s4635_s27, 16 }
  0xe8   :  { %p3945_p2 = scmp.ne.s32.totalorder %s4635_s27, %s3944_s18  ;;  %p3948_p3 = scmp.lt.u32.totalorder %s3944_s18, %s4635_s27 }
  0xea   :  { %p3950_p4 = pnand %p3948_p3, %p3945_p2 }
  0xec   :  { %3953 = shalt.err (!%p3950_p4)
}
  0xed   :  { %s3954_s3 = scalar_lea.vmem %s326_s15, 16  ;;  %s3958_s6 = scalar_lea.vmem %s326_s15, 32 }
  0xee   :  { %p3955_p5 = scmp.ne.s32.totalorder %s326_s15, %s3954_s3  ;;  %p3959_p6 = scmp.lt.s32.totalorder %s326_s15, %s326_s15 }
  0xef   :  { %p3960_p7 = scmp.lt.s32.totalorder %s3958_s6, %s3954_s3 }
  0xf1   :  { %p3961_p8 = por %p3960_p7, %p3959_p6 }
  0xf3   :  { %p3962_p9 = pnand %p3961_p8, %p3955_p5 }
  0xf5   :  { %3965 = shalt.err (!%p3962_p9)
}
  0xf6   :  { %328 = dma.hbm_to_vmem [thread:$0]  %s4635_s27, 16, %s326_s15, [#allocation32]  }
  0xf7   :  { %s3966_s17 = scalar_lea.hbm %s4650_s13, 1024 }
  0xf8   :  { %p3967_p10 = scmp.ne.s32.totalorder %s4650_s13, %s3966_s17  ;;  %p3970_p11 = scmp.lt.u32.totalorder %s3966_s17, %s4650_s13 }
  0xfa   :  { %p3972_p12 = pnand %p3970_p11, %p3967_p10 }
  0xfc   :  { %3975 = shalt.err (!%p3972_p12)
}
  0xfd   :  { %s3976_s0 = scalar_lea.vmem %s349_s25, 1024  ;;  %p3981_p0 = scmp.lt.s32.totalorder %s349_s25, %s349_s25 }
  0xfe   :  { %p3977_p13 = scmp.ne.s32.totalorder %s349_s25, %s3976_s0  ;;  %p3982_p1 = scmp.lt.s32.totalorder %s3976_s0, %s3976_s0 }
 0x100   :  { %p3983_p2 = por %p3982_p1, %p3981_p0 }
 0x102   :  { %p3984_p3 = pnand %p3983_p2, %p3977_p13 }
 0x104   :  { %3987 = shalt.err (!%p3984_p3)
}
 0x105   :  { %354 = dma.hbm_to_vmem [thread:$0]  %s4650_s13, 1024, %s349_s25, [#allocation35], %s4478_s28, %s4478_s28, %s4479_s1  }
 0x106   :  { %s4490_s27 = smov [#allocation37]   ;;  %s4491_s20 = smov [#allocation40]  }
 0x107   :  { %s373_s22 = sshll.u32 %s4490_s27, 4  ;;  %s395_s23 = sshll.u32 %s4491_s20, 4  ;;  %s374_s22 = int_to_ptr.vmem [resolvable:$true] %s373_s22  ;;  %s396_s23 = int_to_ptr.vmem [resolvable:$true] %s395_s23 }
 0x108   :  { %s3988_s26 = scalar_lea.hbm %s4665_s12, 32 }
 0x109   :  { %p3989_p4 = scmp.ne.s32.totalorder %s4665_s12, %s3988_s26  ;;  %p3992_p5 = scmp.lt.u32.totalorder %s3988_s26, %s4665_s12 }
 0x10b   :  { %p3994_p6 = pnand %p3992_p5, %p3989_p4 }
 0x10d   :  { %3997 = shalt.err (!%p3994_p6)
}
 0x10e   :  { %s3998_s2 = scalar_lea.vmem %s374_s22, 32  ;;  %p4003_p8 = scmp.lt.s32.totalorder %s374_s22, %s374_s22 }
 0x10f   :  { %p3999_p7 = scmp.ne.s32.totalorder %s374_s22, %s3998_s2  ;;  %p4004_p9 = scmp.lt.s32.totalorder %s3998_s2, %s3998_s2 }
 0x111   :  { %p4005_p10 = por %p4004_p9, %p4003_p8 }
 0x113   :  { %p4006_p11 = pnand %p4005_p10, %p3999_p7 }
 0x115   :  { %4009 = shalt.err (!%p4006_p11)
}
 0x116   :  { %376 = dma.hbm_to_vmem [thread:$0]  %s4665_s12, 32, %s374_s22, [#allocation38]  }
 0x117   :  { %s4010_s13 = scalar_lea.hbm %s4675_s30, 16 }
 0x118   :  { %p4011_p12 = scmp.ne.s32.totalorder %s4675_s30, %s4010_s13  ;;  %p4014_p13 = scmp.lt.u32.totalorder %s4010_s13, %s4675_s30 }
 0x11a   :  { %p4016_p0 = pnand %p4014_p13, %p4011_p12 }
 0x11c   :  { %4019 = shalt.err (!%p4016_p0)
}
 0x11d   :  { %s4020_s14 = scalar_lea.vmem %s396_s23, 16  ;;  %s4024_s7 = scalar_lea.vmem %s396_s23, 32 }
 0x11e   :  { %p4021_p1 = scmp.ne.s32.totalorder %s396_s23, %s4020_s14  ;;  %p4025_p2 = scmp.lt.s32.totalorder %s396_s23, %s396_s23 }
 0x11f   :  { %p4026_p3 = scmp.lt.s32.totalorder %s4024_s7, %s4020_s14 }
 0x121   :  { %p4027_p4 = por %p4026_p3, %p4025_p2 }
 0x123   :  { %p4028_p5 = pnand %p4027_p4, %p4021_p1 }
 0x125   :  { %4031 = shalt.err (!%p4028_p5)
}
 0x126   :  { %398 = dma.hbm_to_vmem [thread:$0]  %s4675_s30, 16, %s396_s23, [#allocation41]  }
 0x127   :  { %s4492_s12 = smov [#allocation43]   ;;  %s4493_s4 = smov [#allocation2]  }
 0x128   :  { %s417_s10 = sshll.u32 %s4492_s12, 4  ;;  %s115_s24 = sshll.u32 %s4493_s4, 4  ;;  %s418_s10 = int_to_ptr.vmem [resolvable:$true] %s417_s10  ;;  %s116_s24 = int_to_ptr.vmem [resolvable:$true] %s115_s24 }
 0x129   :  { %s4032_s11 = scalar_lea.hbm %s4685_s8, 16 }
 0x12a   :  { %p4033_p6 = scmp.ne.s32.totalorder %s4685_s8, %s4032_s11  ;;  %p4036_p7 = scmp.lt.u32.totalorder %s4032_s11, %s4685_s8 }
 0x12c   :  { %p4038_p8 = pnand %p4036_p7, %p4033_p6 }
 0x12e   :  { %4041 = shalt.err (!%p4038_p8)
}
 0x12f   :  { %s4042_s9 = scalar_lea.vmem %s418_s10, 16  ;;  %s4046_s15 = scalar_lea.vmem %s418_s10, 32 }
 0x130   :  { %p4043_p9 = scmp.ne.s32.totalorder %s418_s10, %s4042_s9  ;;  %p4047_p10 = scmp.lt.s32.totalorder %s418_s10, %s418_s10 }
 0x131   :  { %p4048_p11 = scmp.lt.s32.totalorder %s4046_s15, %s4042_s9 }
 0x133   :  { %p4049_p12 = por %p4048_p11, %p4047_p10 }
 0x135   :  { %p4050_p13 = pnand %p4049_p12, %p4043_p9 }
 0x137   :  { %4053 = shalt.err (!%p4050_p13)
}
 0x138   :  { %s5141_s30 = sld [smem:[#allocation68_spill]] }
 0x139   :  { %420 = dma.hbm_to_vmem [thread:$0]  %s4685_s8, 16, %s418_s10, [#allocation44]  }
 0x13e   :  { %s4054_s16 = scalar_lea.hbm %s5141_s30, 16 }
 0x13f   :  { %p4055_p0 = scmp.ne.s32.totalorder %s5141_s30, %s4054_s16  ;;  %p4058_p1 = scmp.lt.u32.totalorder %s4054_s16, %s5141_s30 }
 0x141   :  { %p4060_p2 = pnand %p4058_p1, %p4055_p0 }
 0x143   :  { %4063 = shalt.err (!%p4060_p2)
}
 0x144   :  { %s4064_s25 = scalar_lea.vmem %s116_s24, 16  ;;  %s4068_s18 = scalar_lea.vmem %s116_s24, 32 }
 0x145   :  { %p4065_p3 = scmp.ne.s32.totalorder %s116_s24, %s4064_s25  ;;  %p4069_p4 = scmp.lt.s32.totalorder %s116_s24, %s116_s24 }
 0x146   :  { %p4070_p5 = scmp.lt.s32.totalorder %s4068_s18, %s4064_s25 }
 0x148   :  { %p4071_p6 = por %p4070_p5, %p4069_p4 }
 0x14a   :  { %p4072_p7 = pnand %p4071_p6, %p4065_p3 }
 0x14c   :  { %4075 = shalt.err (!%p4072_p7)
}
 0x14d   :  { %s5142_s3 = sld [smem:[#allocation69_spill]]  ;;  %s4494_s8 = smov [#allocation6]  }
 0x14e   :  { %118 = dma.hbm_to_vmem [thread:$0]  %s5141_s30, 16, %s116_s24, [#allocation3]  }
 0x14f   :  { %s137_s6 = sshll.u32 %s4494_s8, 4  ;;  %s4495_s17 = smov [#allocation9]   ;;  %s138_s6 = int_to_ptr.vmem [resolvable:$true] %s137_s6 }
 0x150   :  { %s159_s0 = sshll.u32 %s4495_s17, 4  ;;  %s160_s0 = int_to_ptr.vmem [resolvable:$true] %s159_s0 }
 0x153   :  { %s4076_s27 = scalar_lea.hbm %s5142_s3, 16 }
 0x154   :  { %p4077_p8 = scmp.ne.s32.totalorder %s5142_s3, %s4076_s27  ;;  %p4080_p9 = scmp.lt.u32.totalorder %s4076_s27, %s5142_s3 }
 0x156   :  { %p4082_p10 = pnand %p4080_p9, %p4077_p8 }
 0x158   :  { %4085 = shalt.err (!%p4082_p10)
}
 0x159   :  { %s4086_s22 = scalar_lea.vmem %s138_s6, 16  ;;  %s4090_s20 = scalar_lea.vmem %s138_s6, 32 }
 0x15a   :  { %p4087_p11 = scmp.ne.s32.totalorder %s138_s6, %s4086_s22  ;;  %p4091_p12 = scmp.lt.s32.totalorder %s138_s6, %s138_s6 }
 0x15b   :  { %p4092_p13 = scmp.lt.s32.totalorder %s4090_s20, %s4086_s22 }
 0x15d   :  { %p4093_p0 = por %p4092_p13, %p4091_p12 }
 0x15f   :  { %p4094_p1 = pnand %p4093_p0, %p4087_p11 }
 0x161   :  { %4097 = shalt.err (!%p4094_p1)
}
 0x162   :  { %s5143_s23 = sld [smem:[#allocation70_spill]] }
 0x163   :  { %140 = dma.hbm_to_vmem [thread:$0]  %s5142_s3, 16, %s138_s6, [#allocation5]  }
 0x168   :  { %s4098_s26 = scalar_lea.hbm %s5143_s23, 16 }
 0x169   :  { %p4099_p2 = scmp.ne.s32.totalorder %s5143_s23, %s4098_s26  ;;  %p4102_p3 = scmp.lt.u32.totalorder %s4098_s26, %s5143_s23 }
 0x16b   :  { %p4104_p4 = pnand %p4102_p3, %p4099_p2 }
 0x16d   :  { %4107 = shalt.err (!%p4104_p4)
}
 0x16e   :  { %s4108_s2 = scalar_lea.vmem %s160_s0, 16  ;;  %s4112_s13 = scalar_lea.vmem %s160_s0, 32 }
 0x16f   :  { %p4109_p5 = scmp.ne.s32.totalorder %s160_s0, %s4108_s2  ;;  %p4113_p6 = scmp.lt.s32.totalorder %s160_s0, %s160_s0 }
 0x170   :  { %p4114_p7 = scmp.lt.s32.totalorder %s4112_s13, %s4108_s2 }
 0x172   :  { %p4115_p8 = por %p4114_p7, %p4113_p6 }
 0x174   :  { %p4116_p9 = pnand %p4115_p8, %p4109_p5 }
 0x176   :  { %4119 = shalt.err (!%p4116_p9)
}
 0x177   :  { %s5144_s14 = sld [smem:[#allocation71_spill]]  ;;  %s4496_s7 = smov [#allocation12]  }
 0x178   :  { %162 = dma.hbm_to_vmem [thread:$0]  %s5143_s23, 16, %s160_s0, [#allocation8]  }
 0x179   :  { %s181_s12 = sshll.u32 %s4496_s7, 4  ;;  %s4497_s10 = smov [#allocation15]   ;;  %s182_s12 = int_to_ptr.vmem [resolvable:$true] %s181_s12 }
 0x17a   :  { %s202_s4 = sshll.u32 %s4497_s10, 4  ;;  %s203_s4 = int_to_ptr.vmem [resolvable:$true] %s202_s4 }
 0x17d   :  { %s4120_s24 = scalar_lea.hbm %s5144_s14, 16 }
 0x17e   :  { %p4121_p10 = scmp.ne.s32.totalorder %s5144_s14, %s4120_s24  ;;  %p4124_p11 = scmp.lt.u32.totalorder %s4120_s24, %s5144_s14 }
 0x180   :  { %p4126_p12 = pnand %p4124_p11, %p4121_p10 }
 0x182   :  { %4129 = shalt.err (!%p4126_p12)
}
 0x183   :  { %s4130_s11 = scalar_lea.vmem %s182_s12, 16  ;;  %s4134_s9 = scalar_lea.vmem %s182_s12, 32 }
 0x184   :  { %p4131_p13 = scmp.ne.s32.totalorder %s182_s12, %s4130_s11  ;;  %p4135_p0 = scmp.lt.s32.totalorder %s182_s12, %s182_s12 }
 0x185   :  { %p4136_p1 = scmp.lt.s32.totalorder %s4134_s9, %s4130_s11 }
 0x187   :  { %p4137_p2 = por %p4136_p1, %p4135_p0 }
 0x189   :  { %p4138_p3 = pnand %p4137_p2, %p4131_p13 }
 0x18b   :  { %4141 = shalt.err (!%p4138_p3)
}
 0x18c   :  { %s5145_s15 = sld [smem:[#allocation72_spill]] }
 0x18d   :  { %184 = dma.hbm_to_vmem [thread:$0]  %s5144_s14, 16, %s182_s12, [#allocation11]  }
 0x192   :  { %s4142_s30 = scalar_lea.hbm %s5145_s15, 2048 }
 0x193   :  { %p4143_p4 = scmp.ne.s32.totalorder %s5145_s15, %s4142_s30  ;;  %p4146_p5 = scmp.lt.u32.totalorder %s4142_s30, %s5145_s15 }
 0x195   :  { %p4148_p6 = pnand %p4146_p5, %p4143_p4 }
 0x197   :  { %4151 = shalt.err (!%p4148_p6)
}
 0x198   :  { %s4152_s16 = scalar_lea.vmem %s203_s4, 2048  ;;  %p4157_p8 = scmp.lt.s32.totalorder %s203_s4, %s203_s4 }
 0x199   :  { %p4153_p7 = scmp.ne.s32.totalorder %s203_s4, %s4152_s16  ;;  %p4158_p9 = scmp.lt.s32.totalorder %s4152_s16, %s4152_s16 }
 0x19b   :  { %p4159_p10 = por %p4158_p9, %p4157_p8 }
 0x19d   :  { %p4160_p11 = pnand %p4159_p10, %p4153_p7 }
 0x19f   :  { %4163 = shalt.err (!%p4160_p11)
}
 0x1a0   :  { %s5146_s25 = sld [smem:[#allocation73_spill]]  ;;  %s4498_s18 = smov [#allocation18]  }
 0x1a1   :  { %208 = dma.hbm_to_vmem [thread:$0]  %s5145_s15, 2048, %s203_s4, [#allocation14], %s4478_s28, %s4478_s28, %s4479_s1  }
 0x1a2   :  { %s224_s3 = sshll.u32 %s4498_s18, 4  ;;  %s4499_s8 = smov [#allocation21]   ;;  %s225_s3 = int_to_ptr.vmem [resolvable:$true] %s224_s3 }
 0x1a3   :  { %s246_s6 = sshll.u32 %s4499_s8, 4  ;;  %s247_s6 = int_to_ptr.vmem [resolvable:$true] %s246_s6 }
 0x1a6   :  { %s4164_s17 = scalar_lea.hbm %s5146_s25, 1024 }
 0x1a7   :  { %p4165_p12 = scmp.ne.s32.totalorder %s5146_s25, %s4164_s17  ;;  %p4168_p13 = scmp.lt.u32.totalorder %s4164_s17, %s5146_s25 }
 0x1a9   :  { %p4170_p0 = pnand %p4168_p13, %p4165_p12 }
 0x1ab   :  { %4173 = shalt.err (!%p4170_p0)
}
 0x1ac   :  { %s4174_s0 = scalar_lea.vmem %s225_s3, 1024  ;;  %p4179_p2 = scmp.lt.s32.totalorder %s225_s3, %s225_s3 }
 0x1ad   :  { %p4175_p1 = scmp.ne.s32.totalorder %s225_s3, %s4174_s0  ;;  %p4180_p3 = scmp.lt.s32.totalorder %s4174_s0, %s4174_s0 }
 0x1af   :  { %p4181_p4 = por %p4180_p3, %p4179_p2 }
 0x1b1   :  { %p4182_p5 = pnand %p4181_p4, %p4175_p1 }
 0x1b3   :  { %4185 = shalt.err (!%p4182_p5)
}
 0x1b4   :  { %s5147_s27 = sld [smem:[#allocation74_spill]] }
 0x1b5   :  { %230 = dma.hbm_to_vmem [thread:$0]  %s5146_s25, 1024, %s225_s3, [#allocation17], %s4478_s28, %s4478_s28, %s4479_s1  }
 0x1ba   :  { %s4186_s22 = scalar_lea.hbm %s5147_s27, 1024 }
 0x1bb   :  { %p4187_p6 = scmp.ne.s32.totalorder %s5147_s27, %s4186_s22  ;;  %p4190_p7 = scmp.lt.u32.totalorder %s4186_s22, %s5147_s27 }
 0x1bd   :  { %p4192_p8 = pnand %p4190_p7, %p4187_p6 }
 0x1bf   :  { %4195 = shalt.err (!%p4192_p8)
}
 0x1c0   :  { %s4196_s20 = scalar_lea.vmem %s247_s6, 1024  ;;  %p4201_p10 = scmp.lt.s32.totalorder %s247_s6, %s247_s6 }
 0x1c1   :  { %p4197_p9 = scmp.ne.s32.totalorder %s247_s6, %s4196_s20  ;;  %p4202_p11 = scmp.lt.s32.totalorder %s4196_s20, %s4196_s20 }
 0x1c3   :  { %p4203_p12 = por %p4202_p11, %p4201_p10 }
 0x1c5   :  { %p4204_p13 = pnand %p4203_p12, %p4197_p9 }
 0x1c7   :  { %4207 = shalt.err (!%p4204_p13)
}
 0x1c8   :  { %s5148_s23 = sld [smem:[#allocation75_spill]]  ;;  %s4500_s26 = smov [#allocation24]  }
 0x1c9   :  { %252 = dma.hbm_to_vmem [thread:$0]  %s5147_s27, 1024, %s247_s6, [#allocation20], %s4478_s28, %s4478_s28, %s4479_s1  }
 0x1ca   :  { %s268_s2 = sshll.u32 %s4500_s26, 4  ;;  %s4501_s13 = smov [#allocation27]   ;;  %s269_s2 = int_to_ptr.vmem [resolvable:$true] %s268_s2 }
 0x1cb   :  { %s290_s14 = sshll.u32 %s4501_s13, 4  ;;  %s291_s14 = int_to_ptr.vmem [resolvable:$true] %s290_s14 }
 0x1ce   :  { %s4208_s7 = scalar_lea.hbm %s5148_s23, 1024 }
 0x1cf   :  { %p4209_p0 = scmp.ne.s32.totalorder %s5148_s23, %s4208_s7  ;;  %p4212_p1 = scmp.lt.u32.totalorder %s4208_s7, %s5148_s23 }
 0x1d1   :  { %p4214_p2 = pnand %p4212_p1, %p4209_p0 }
 0x1d3   :  { %4217 = shalt.err (!%p4214_p2)
}
 0x1d4   :  { %s4218_s12 = scalar_lea.vmem %s269_s2, 1024  ;;  %p4223_p4 = scmp.lt.s32.totalorder %s269_s2, %s269_s2 }
 0x1d5   :  { %p4219_p3 = scmp.ne.s32.totalorder %s269_s2, %s4218_s12  ;;  %p4224_p5 = scmp.lt.s32.totalorder %s4218_s12, %s4218_s12 }
 0x1d7   :  { %p4225_p6 = por %p4224_p5, %p4223_p4 }
 0x1d9   :  { %p4226_p7 = pnand %p4225_p6, %p4219_p3 }
 0x1db   :  { %4229 = shalt.err (!%p4226_p7)
}
 0x1dc   :  { %s5149_s10 = sld [smem:[#allocation76_spill]] }
 0x1dd   :  { %274 = dma.hbm_to_vmem [thread:$0]  %s5148_s23, 1024, %s269_s2, [#allocation23], %s4478_s28, %s4478_s28, %s4479_s1  }
 0x1e2   :  { %s4230_s4 = scalar_lea.hbm %s5149_s10, 1024 }
 0x1e3   :  { %p4231_p8 = scmp.ne.s32.totalorder %s5149_s10, %s4230_s4  ;;  %p4234_p9 = scmp.lt.u32.totalorder %s4230_s4, %s5149_s10 }
 0x1e5   :  { %p4236_p10 = pnand %p4234_p9, %p4231_p8 }
 0x1e7   :  { %4239 = shalt.err (!%p4236_p10)
}
 0x1e8   :  { %s4240_s24 = scalar_lea.vmem %s291_s14, 1024  ;;  %p4245_p12 = scmp.lt.s32.totalorder %s291_s14, %s291_s14 }
 0x1e9   :  { %p4241_p11 = scmp.ne.s32.totalorder %s291_s14, %s4240_s24  ;;  %p4246_p13 = scmp.lt.s32.totalorder %s4240_s24, %s4240_s24 }
 0x1eb   :  { %p4247_p0 = por %p4246_p13, %p4245_p12 }
 0x1ed   :  { %p4248_p1 = pnand %p4247_p0, %p4241_p11 }
 0x1ef   :  { %4251 = shalt.err (!%p4248_p1)
}
 0x1f0   :  { %s5150_s11 = sld [smem:[#allocation77_spill]]  ;;  %s4502_s9 = smov [#allocation30]  }
 0x1f1   :  { %296 = dma.hbm_to_vmem [thread:$0]  %s5149_s10, 1024, %s291_s14, [#allocation26], %s4478_s28, %s4478_s28, %s4479_s1  }
 0x1f2   :  { %s312_s15 = sshll.u32 %s4502_s9, 4  ;;  %s4503_s30 = smov [#allocation33]   ;;  %s313_s15 = int_to_ptr.vmem [resolvable:$true] %s312_s15 }
 0x1f3   :  { %s334_s16 = sshll.u32 %s4503_s30, 4  ;;  %s335_s16 = int_to_ptr.vmem [resolvable:$true] %s334_s16 }
 0x1f6   :  { %s4252_s25 = scalar_lea.hbm %s5150_s11, 1024 }
 0x1f7   :  { %p4253_p2 = scmp.ne.s32.totalorder %s5150_s11, %s4252_s25  ;;  %p4256_p3 = scmp.lt.u32.totalorder %s4252_s25, %s5150_s11 }
 0x1f9   :  { %p4258_p4 = pnand %p4256_p3, %p4253_p2 }
 0x1fb   :  { %4261 = shalt.err (!%p4258_p4)
}
 0x1fc   :  { %s4262_s18 = scalar_lea.vmem %s313_s15, 1024  ;;  %p4267_p6 = scmp.lt.s32.totalorder %s313_s15, %s313_s15 }
 0x1fd   :  { %p4263_p5 = scmp.ne.s32.totalorder %s313_s15, %s4262_s18  ;;  %p4268_p7 = scmp.lt.s32.totalorder %s4262_s18, %s4262_s18 }
 0x1ff   :  { %p4269_p8 = por %p4268_p7, %p4267_p6 }
 0x201   :  { %p4270_p9 = pnand %p4269_p8, %p4263_p5 }
 0x203   :  { %4273 = shalt.err (!%p4270_p9)
}
 0x204   :  { %s5151_s3 = sld [smem:[#allocation78_spill]] }
 0x205   :  { %318 = dma.hbm_to_vmem [thread:$0]  %s5150_s11, 1024, %s313_s15, [#allocation29], %s4478_s28, %s4478_s28, %s4479_s1  }
 0x20a   :  { %s4274_s8 = scalar_lea.hbm %s5151_s3, 1024 }
 0x20b   :  { %p4275_p10 = scmp.ne.s32.totalorder %s5151_s3, %s4274_s8  ;;  %p4278_p11 = scmp.lt.u32.totalorder %s4274_s8, %s5151_s3 }
 0x20d   :  { %p4280_p12 = pnand %p4278_p11, %p4275_p10 }
 0x20f   :  { %4283 = shalt.err (!%p4280_p12)
}
 0x210   :  { %s4284_s6 = scalar_lea.vmem %s335_s16, 1024  ;;  %p4289_p0 = scmp.lt.s32.totalorder %s335_s16, %s335_s16 }
 0x211   :  { %p4285_p13 = scmp.ne.s32.totalorder %s335_s16, %s4284_s6  ;;  %p4290_p1 = scmp.lt.s32.totalorder %s4284_s6, %s4284_s6 }
 0x213   :  { %p4291_p2 = por %p4290_p1, %p4289_p0 }
 0x215   :  { %p4292_p3 = pnand %p4291_p2, %p4285_p13 }
 0x217   :  { %4295 = shalt.err (!%p4292_p3)
}
 0x218   :  { %s5152_s17 = sld [smem:[#allocation80_spill]]  ;;  %s4504_s0 = smov [#allocation36]  }
 0x219   :  { %340 = dma.hbm_to_vmem [thread:$0]  %s5151_s3, 1024, %s335_s16, [#allocation32], %s4478_s28, %s4478_s28, %s4479_s1  }
 0x21a   :  { %s361_s27 = sshll.u32 %s4504_s0, 4  ;;  %s4505_s22 = smov [#allocation39]   ;;  %s362_s27 = int_to_ptr.vmem [resolvable:$true] %s361_s27 }
 0x21b   :  { %s382_s20 = sshll.u32 %s4505_s22, 4  ;;  %s383_s20 = int_to_ptr.vmem [resolvable:$true] %s382_s20 }
 0x21e   :  { %s4296_s23 = scalar_lea.hbm %s5152_s17, 16 }
 0x21f   :  { %p4297_p4 = scmp.ne.s32.totalorder %s5152_s17, %s4296_s23  ;;  %p4300_p5 = scmp.lt.u32.totalorder %s4296_s23, %s5152_s17 }
 0x221   :  { %p4302_p6 = pnand %p4300_p5, %p4297_p4 }
 0x223   :  { %4305 = shalt.err (!%p4302_p6)
}
 0x224   :  { %s4306_s26 = scalar_lea.vmem %s362_s27, 16  ;;  %s4310_s2 = scalar_lea.vmem %s362_s27, 32 }
 0x225   :  { %p4307_p7 = scmp.ne.s32.totalorder %s362_s27, %s4306_s26  ;;  %p4311_p8 = scmp.lt.s32.totalorder %s362_s27, %s362_s27 }
 0x226   :  { %p4312_p9 = scmp.lt.s32.totalorder %s4310_s2, %s4306_s26 }
 0x228   :  { %p4313_p10 = por %p4312_p9, %p4311_p8 }
 0x22a   :  { %p4314_p11 = pnand %p4313_p10, %p4307_p7 }
 0x22c   :  { %4317 = shalt.err (!%p4314_p11)
}
 0x22d   :  { %s5153_s13 = sld [smem:[#allocation82_spill]] }
 0x22e   :  { %364 = dma.hbm_to_vmem [thread:$0]  %s5152_s17, 16, %s362_s27, [#allocation35]  }
 0x233   :  { %s4318_s14 = scalar_lea.hbm %s5153_s13, 1024 }
 0x234   :  { %p4319_p12 = scmp.ne.s32.totalorder %s5153_s13, %s4318_s14  ;;  %p4322_p13 = scmp.lt.u32.totalorder %s4318_s14, %s5153_s13 }
 0x236   :  { %p4324_p0 = pnand %p4322_p13, %p4319_p12 }
 0x238   :  { %4327 = shalt.err (!%p4324_p0)
}
 0x239   :  { %s4328_s7 = scalar_lea.vmem %s383_s20, 1024  ;;  %p4333_p2 = scmp.lt.s32.totalorder %s383_s20, %s383_s20 }
 0x23a   :  { %p4329_p1 = scmp.ne.s32.totalorder %s383_s20, %s4328_s7  ;;  %p4334_p3 = scmp.lt.s32.totalorder %s4328_s7, %s4328_s7 }
 0x23c   :  { %p4335_p4 = por %p4334_p3, %p4333_p2 }
 0x23e   :  { %p4336_p5 = pnand %p4335_p4, %p4329_p1 }
 0x240   :  { %4339 = shalt.err (!%p4336_p5)
}
 0x241   :  { %s5154_s12 = sld [smem:[#allocation83_spill]]  ;;  %s4506_s10 = smov [#allocation42]  }
 0x242   :  { %388 = dma.hbm_to_vmem [thread:$0]  %s5153_s13, 1024, %s383_s20, [#allocation38], %s4478_s28, %s4478_s28, %s4479_s1  }
 0x243   :  { %s404_s4 = sshll.u32 %s4506_s10, 4  ;;  %s4507_s24 = smov [#allocation45]   ;;  %s405_s4 = int_to_ptr.vmem [resolvable:$true] %s404_s4 }
 0x244   :  { %s426_s11 = sshll.u32 %s4507_s24, 4  ;;  %s427_s11 = int_to_ptr.vmem [resolvable:$true] %s426_s11 }
 0x247   :  { %s4340_s9 = scalar_lea.hbm %s5154_s12, 1024 }
 0x248   :  { %p4341_p6 = scmp.ne.s32.totalorder %s5154_s12, %s4340_s9  ;;  %p4344_p7 = scmp.lt.u32.totalorder %s4340_s9, %s5154_s12 }
 0x24a   :  { %p4346_p8 = pnand %p4344_p7, %p4341_p6 }
 0x24c   :  { %4349 = shalt.err (!%p4346_p8)
}
 0x24d   :  { %s4350_s15 = scalar_lea.vmem %s405_s4, 1024  ;;  %p4355_p10 = scmp.lt.s32.totalorder %s405_s4, %s405_s4 }
 0x24e   :  { %p4351_p9 = scmp.ne.s32.totalorder %s405_s4, %s4350_s15  ;;  %p4356_p11 = scmp.lt.s32.totalorder %s4350_s15, %s4350_s15 }
 0x250   :  { %p4357_p12 = por %p4356_p11, %p4355_p10 }
 0x252   :  { %p4358_p13 = pnand %p4357_p12, %p4351_p9 }
 0x254   :  { %4361 = shalt.err (!%p4358_p13)
}
 0x255   :  { %s5155_s30 = sld [smem:[#allocation84_spill]] }
 0x256   :  { %410 = dma.hbm_to_vmem [thread:$0]  %s5154_s12, 1024, %s405_s4, [#allocation41], %s4478_s28, %s4478_s28, %s4479_s1  }
 0x25b   :  { %s4362_s16 = scalar_lea.hbm %s5155_s30, 1024 }
 0x25c   :  { %p4363_p0 = scmp.ne.s32.totalorder %s5155_s30, %s4362_s16  ;;  %p4366_p1 = scmp.lt.u32.totalorder %s4362_s16, %s5155_s30 }
 0x25e   :  { %p4368_p2 = pnand %p4366_p1, %p4363_p0 }
 0x260   :  { %4371 = shalt.err (!%p4368_p2)
}
 0x261   :  { %s4372_s25 = scalar_lea.vmem %s427_s11, 1024  ;;  %p4377_p4 = scmp.lt.s32.totalorder %s427_s11, %s427_s11 }
 0x262   :  { %p4373_p3 = scmp.ne.s32.totalorder %s427_s11, %s4372_s25  ;;  %p4378_p5 = scmp.lt.s32.totalorder %s4372_s25, %s4372_s25 }
 0x264   :  { %p4379_p6 = por %p4378_p5, %p4377_p4 }
 0x266   :  { %p4380_p7 = pnand %p4379_p6, %p4373_p3 }
 0x268   :  { %4383 = shalt.err (!%p4380_p7)
}
 0x269   :  { %s5156_s18 = sld [smem:[#allocation85_spill]]  ;;  %s4508_s3 = smov [#allocation46]  }
 0x26a   :  { %432 = dma.hbm_to_vmem [thread:$0]  %s5155_s30, 1024, %s427_s11, [#allocation44], %s4478_s28, %s4478_s28, %s4479_s1  }
 0x26b   :  { %s439_s8 = sshll.u32 %s4508_s3, 4  ;;  %s440_s8 = int_to_ptr.vmem [resolvable:$true] %s439_s8 }
 0x26f   :  { %s4384_s6 = scalar_lea.hbm %s5156_s18, 16 }
 0x270   :  { %p4385_p8 = scmp.ne.s32.totalorder %s5156_s18, %s4384_s6  ;;  %p4388_p9 = scmp.lt.u32.totalorder %s4384_s6, %s5156_s18 }
 0x272   :  { %p4390_p10 = pnand %p4388_p9, %p4385_p8 }
 0x274   :  { %4393 = shalt.err (!%p4390_p10)
}
 0x275   :  { %s4394_s17 = scalar_lea.vmem %s440_s8, 16  ;;  %s4398_s0 = scalar_lea.vmem %s440_s8, 32 }
 0x276   :  { %p4395_p11 = scmp.ne.s32.totalorder %s440_s8, %s4394_s17  ;;  %p4399_p12 = scmp.lt.s32.totalorder %s440_s8, %s440_s8 }
 0x277   :  { %p4400_p13 = scmp.lt.s32.totalorder %s4398_s0, %s4394_s17 }
 0x279   :  { %p4401_p0 = por %p4400_p13, %p4399_p12 }
 0x27b   :  { %p4402_p1 = pnand %p4401_p0, %p4395_p11 }
 0x27d   :  { %4405 = shalt.err (!%p4402_p1)
}
 0x27e   :  { %442 = dma.hbm_to_vmem [thread:$0]  %s5156_s18, 16, %s440_s8, [#allocation47]  }
 0x27f   :  { %4406 = dma.done.wait [#allocation3], 16  }
 0x280   :  { %4407 = vsyncadd [#allocation3], 4294967280 }
 0x281   :  { %4408 = dma.done.wait [#allocation5], 1040  }
 0x282   :  { %4409 = vsyncadd [#allocation5], 4294966256 }
 0x283   :  { %4410 = dma.done.wait [#allocation8], 1040  }
 0x284   :  { %4411 = vsyncadd [#allocation8], 4294966256 }
 0x285   :  { %4412 = dma.done.wait [#allocation11], 1040  }
 0x286   :  { %4413 = vsyncadd [#allocation11], 4294966256 }
 0x287   :  { %4414 = dma.done.wait [#allocation14], 3072  }
 0x288   :  { %4415 = vsyncadd [#allocation14], 4294964224 }
 0x289   :  { %4416 = dma.done.wait [#allocation17], 1040  }
 0x28a   :  { %4417 = vsyncadd [#allocation17], 4294966256 }
 0x28b   :  { %4418 = dma.done.wait [#allocation20], 1040  }
 0x28c   :  { %4419 = vsyncadd [#allocation20], 4294966256 }
 0x28d   :  { %4420 = dma.done.wait [#allocation23], 1040  }
 0x28e   :  { %4421 = vsyncadd [#allocation23], 4294966256 }
 0x28f   :  { %4422 = dma.done.wait [#allocation26], 1040  }
 0x290   :  { %4423 = vsyncadd [#allocation26], 4294966256 }
 0x291   :  { %4424 = dma.done.wait [#allocation29], 1040  }
 0x292   :  { %4425 = vsyncadd [#allocation29], 4294966256 }
 0x293   :  { %4426 = dma.done.wait [#allocation32], 1040  }
 0x294   :  { %4427 = vsyncadd [#allocation32], 4294966256 }
 0x295   :  { %4428 = dma.done.wait [#allocation35], 1040  }
 0x296   :  { %4429 = vsyncadd [#allocation35], 4294966256 }
 0x297   :  { %4430 = dma.done.wait [#allocation38], 1056  }
 0x298   :  { %4431 = vsyncadd [#allocation38], 4294966240 }
 0x299   :  { %4432 = dma.done.wait [#allocation41], 1040  }
 0x29a   :  { %4433 = vsyncadd [#allocation41], 4294966256 }
 0x29b   :  { %4434 = dma.done.wait [#allocation44], 1040  }
 0x29c   :  { %4435 = vsyncadd [#allocation44], 4294966256 }
 0x29d   :  { %4436 = dma.done.wait [#allocation47], 16  }
 0x29e   :  { %4437 = vsyncadd [#allocation47], 4294967280  ;;  %s5157_s28 = sld [smem:[#allocation67_spill]]  ;;  %v4509_v0 = vmov 0.0   ;;  %s5158_s1 = sld [smem:[#allocation64_spill]]  ;;  %v3576_v16 = vld [vmem:[#allocation4] sm:$0xff]  }
 0x29f   :  { %3196 = vmatprep.subr.bf16.mxu1 %v4509_v0  ;;  %v3577_v18 = vld [vmem:[#allocation4 + $0x8] sm:$0xff]   ;;  %v3578_v21 = vld [vmem:[#allocation4 + $0x10] sm:$0xff]   ;;  %v3579_v25 = vld [vmem:[#allocation4 + $0x18] sm:$0xff]   ;;  %vm4510_vm0 = vmmov 0   ;;  %s5159_s27 = sld [smem:[#allocation65_spill]]  ;;  %s5160_s22 = sld [smem:[#allocation79_spill]] }
 0x2a0   :  { %3197 = vmatpush3.bf16.msra.mxu1 %v3576_v16  ;;  %v3580_v27 = vld [vmem:[#allocation4 + $0x20] sm:$0xff]   ;;  %v3581_v28 = vld [vmem:[#allocation4 + $0x28] sm:$0xff]   ;;  %v3582_v29 = vld [vmem:[#allocation4 + $0x30] sm:$0xff]   ;;  %3212 = vmatprep.mubr.msk.bf16.mxu1 %vm4510_vm0, %v4509_v0  ;;  %s5161_s20 = sld [smem:[#allocation81_spill]]  ;;  %s5162_s23 = sld [smem:[#allocation66_spill]] }
 0x2a1   :  { %3198 = vmatprep.subr.bf16.mxu1 %v4509_v0  ;;  %v3583_v30 = vld [vmem:[#allocation4 + $0x38] sm:$0xff]   ;;  %v3584_v31 = vld [vmem:[#allocation7] sm:$0xff]   ;;  %v3586_v32 = vld [vmem:[#allocation7 + $0x8] sm:$0xff]  }
 0x2a2   :  { %v3588_v33 = vld [vmem:[#allocation7 + $0x10] sm:$0xff]   ;;  %v3590_v34 = vld [vmem:[#allocation7 + $0x18] sm:$0xff]   ;;  %v3592_v35 = vld [vmem:[#allocation7 + $0x20] sm:$0xff]  }
 0x2a3   :  { %v3594_v36 = vld [vmem:[#allocation7 + $0x28] sm:$0xff]   ;;  %v2850_v38 = vld [vmem:[#allocation2] ss:$0 sm:$0xff]  ;;  %v3589_v53 = vld [vmem:[#allocation10 + $0x10] sm:$0xff]  }
 0x2a4   :  { %v3560_v1 = vld [vmem:[%s5157_s28 + $0x40] sm:$0xff]   ;;  %v3562_v3 = vld [vmem:[%s5157_s28 + $0x48] sm:$0xff]   ;;  %v3564_v5 = vld [vmem:[%s5157_s28 + $0x50] sm:$0xff]   ;;  %3199 = vmatpush3.bf16.msra.mxu1 %v3577_v18 }
 0x2a5   :  { %v3561_v2 = vld [vmem:[%s5157_s28] sm:$0xff]   ;;  %3026 = vmatprep.subr.bf16.mxu0 %v3560_v1  ;;  %v3563_v4 = vld [vmem:[%s5157_s28 + $0x8] sm:$0xff]   ;;  %v3565_v6 = vld [vmem:[%s5157_s28 + $0x10] sm:$0xff]   ;;  %3200 = vmatprep.subr.bf16.mxu1 %v4509_v0 }
 0x2a6   :  { %3027 = vmatpush3.bf16.msra.mxu0 %v3561_v2  ;;  %v3566_v7 = vld [vmem:[%s5157_s28 + $0x58] sm:$0xff]   ;;  %v3568_v9 = vld [vmem:[%s5157_s28 + $0x60] sm:$0xff]   ;;  %v3570_v11 = vld [vmem:[%s5157_s28 + $0x68] sm:$0xff]  }
 0x2a7   :  { %3028 = vmatprep.subr.bf16.mxu0 %v3562_v3  ;;  %v3567_v8 = vld [vmem:[%s5157_s28 + $0x18] sm:$0xff]   ;;  %v3569_v10 = vld [vmem:[%s5157_s28 + $0x20] sm:$0xff]   ;;  %v535_v12 = vld [vmem:[%s5158_s1 + $0x8] sm:$0xff] }
 0x2a8   :  { %v537_v13 = vld [vmem:[%s5158_s1 + $0x18] sm:$0xff]  ;;  %v3571_v14 = vld [vmem:[%s5157_s28 + $0x28] sm:$0xff]   ;;  %v3572_v17 = vld [vmem:[%s5157_s28 + $0x70] sm:$0xff]   ;;  %3201 = vmatpush3.bf16.msra.mxu1 %v3578_v21 }
 0x2a9   :  { %v4897_v15 = vpack.c.bf16 %v537_v13, %v535_v12  ;;  %v3573_v19 = vld [vmem:[%s5157_s28 + $0x30] sm:$0xff]   ;;  %v3574_v20 = vld [vmem:[%s5157_s28 + $0x78] sm:$0xff]   ;;  %v534_v23 = vld [vmem:[%s5158_s1] sm:$0xff]  ;;  %3202 = vmatprep.subr.bf16.mxu1 %v4509_v0 }
 0x2aa   :  { %3029 = vmatpush3.bf16.msra.mxu0 %v3563_v4  ;;  %v3575_v22 = vld [vmem:[%s5157_s28 + $0x38] sm:$0xff]   ;;  %v536_v24 = vld [vmem:[%s5158_s1 + $0x10] sm:$0xff]  ;;  %v3585_v50 = vld [vmem:[#allocation10] sm:$0xff]  }
 0x2ab   :  { %3030 = vmatprep.subr.bf16.mxu0 %v3564_v5  ;;  %707 = vmatprep.mubr.bf16.mxu0 %v4897_v15  ;;  %v4909_v26 = vpack.c.bf16 %v536_v24, %v534_v23  ;;  %v3587_v52 = vld [vmem:[#allocation10 + $0x8] sm:$0xff]   ;;  %v3591_v54 = vld [vmem:[#allocation10 + $0x18] sm:$0xff]   ;;  %v3593_v55 = vld [vmem:[#allocation10 + $0x20] sm:$0xff]  }
 0x2ac   :  { %3203 = vmatpush3.bf16.msra.mxu1 %v3579_v25  ;;  %v3595_v56 = vld [vmem:[#allocation10 + $0x28] sm:$0xff]   ;;  %v3597_v58 = vld [vmem:[#allocation10 + $0x30] sm:$0xff]   ;;  %v3599_v60 = vld [vmem:[#allocation10 + $0x38] sm:$0xff]  }
 0x2ad   :  { %3204 = vmatprep.subr.bf16.mxu1 %v4509_v0  ;;  %v3596_v57 = vld [vmem:[#allocation7 + $0x30] sm:$0xff]   ;;  %v3598_v59 = vld [vmem:[#allocation7 + $0x38] sm:$0xff]   ;;  %v3600_v61 = vld [vmem:[#allocation15 + $0x40] sm:$0xff]  }
 0x2ae   :  { %3031 = vmatpush3.bf16.msra.mxu0 %v3565_v6  ;;  %v2867_v62 = vld [vmem:[#allocation6] ss:$0 sm:$0xff]  ;;  %v3602_v13 = vld [vmem:[#allocation15 + $0x48] sm:$0xff]   ;;  %v3606_v18 = vld [vmem:[#allocation15 + $0x10] sm:$0xff]  }
 0x2af   :  { %3032 = vmatprep.subr.bf16.mxu0 %v3566_v7  ;;  %v3607_v16 = vld [vmem:[#allocation13 + $0x8] sm:$0xff]   ;;  %v3610_v21 = vld [vmem:[#allocation13 + $0x10] sm:$0xff]   ;;  %v3612_v23 = vld [vmem:[#allocation15 + $0x20] sm:$0xff]  }
 0x2b0   :  { %3205 = vmatpush3.bf16.msra.mxu1 %v3580_v27  ;;  %v3614_v24 = vld [vmem:[#allocation15 + $0x68] sm:$0xff]   ;;  %v3616_v27 = vld [vmem:[#allocation13 + $0x20] sm:$0xff]  }
 0x2b1   :  { %3206 = vmatprep.subr.bf16.mxu1 %v4509_v0  ;;  %v3615_v25 = vld [vmem:[#allocation15 + $0x28] sm:$0xff]  }
 0x2b2   :  { %3033 = vmatpush3.bf16.msra.mxu0 %v3567_v8 }
 0x2b3   :  { %3034 = vmatprep.subr.bf16.mxu0 %v3568_v9 }
 0x2b4   :  { %3207 = vmatpush3.bf16.msra.mxu1 %v3581_v28  ;;  %v3617_v28 = vld [vmem:[#allocation15 + $0x70] sm:$0xff]  }
 0x2b5   :  { %3208 = vmatprep.subr.bf16.mxu1 %v4509_v0 }
 0x2b6   :  { %3035 = vmatpush3.bf16.msra.mxu0 %v3569_v10  ;;  %v3601_v10 = vld [vmem:[#allocation15] sm:$0xff]  }
 0x2b7   :  { %3036 = vmatprep.subr.bf16.mxu0 %v3570_v11  ;;  %v3604_v11 = vld [vmem:[#allocation13] sm:$0xff]  }
 0x2b8   :  { %3209 = vmatpush3.bf16.msra.mxu1 %v3582_v29  ;;  %v3618_v29 = vld [vmem:[#allocation15 + $0x30] sm:$0xff]  }
 0x2b9   :  { %3210 = vmatprep.subr.bf16.mxu1 %v4509_v0 }
 0x2ba   :  { %3037 = vmatpush3.bf16.msra.mxu0 %v3571_v14  ;;  %v3603_v14 = vld [vmem:[#allocation15 + $0x8] sm:$0xff]  }
 0x2bb   :  { %3038 = vmatprep.subr.bf16.mxu0 %v3572_v17  ;;  %v3605_v17 = vld [vmem:[#allocation15 + $0x50] sm:$0xff]  }
 0x2bc   :  { %3211 = vmatpush3.bf16.msra.mxu1 %v3583_v30  ;;  %v3620_v30 = vld [vmem:[#allocation15 + $0x78] sm:$0xff]  }
 0x2bd   :  { %3236 = vmatprep.subr.bf16.mxu1 %v4509_v0 }
 0x2be   :  { %3039 = vmatpush3.bf16.msra.mxu0 %v3573_v19  ;;  %v3608_v19 = vld [vmem:[#allocation15 + $0x58] sm:$0xff]  }
 0x2bf   :  { %3040 = vmatprep.subr.bf16.mxu0 %v3574_v20  ;;  %v3609_v20 = vld [vmem:[#allocation15 + $0x18] sm:$0xff]  }
 0x2c2   :  { %3041 = vmatpush3.bf16.msra.mxu0 %v3575_v22  ;;  %v3611_v22 = vld [vmem:[#allocation15 + $0x60] sm:$0xff]  }
 0x2c3   :  { %3216 = vmatprep.subr.bf16.mxu0 %v4509_v0 }
 0x2c5   :  { %708 = vmatmul.mubr.bf16.vlgmr.msra.gmra.mrb[0].mxu0 %v4909_v26 }
 0x2c6   :  { %3232 = vmatprep.mubr.msk.bf16.mxu0 %vm4510_vm0, %v4509_v0  ;;  %3217 = vmatpush3.bf16.msra.mxu0 %v3584_v31  ;;  %v3619_v31 = vld [vmem:[#allocation13 + $0x28] sm:$0xff]  }
 0x2c7   :  { %3218 = vmatprep.subr.bf16.mxu0 %v4509_v0 }
 0x2ca   :  { %3219 = vmatpush3.bf16.msra.mxu0 %v3586_v32  ;;  %v3621_v32 = vld [vmem:[#allocation15 + $0x38] sm:$0xff]  }
 0x2cb   :  { %3220 = vmatprep.subr.bf16.mxu0 %v4509_v0 }
 0x2ce   :  { %3221 = vmatpush3.bf16.msra.mxu0 %v3588_v33  ;;  %v3622_v33 = vld [vmem:[#allocation13 + $0x30] sm:$0xff]  }
 0x2cf   :  { %3222 = vmatprep.subr.bf16.mxu0 %v4509_v0 }
 0x2d2   :  { %3223 = vmatpush3.bf16.msra.mxu0 %v3590_v34  ;;  %v3623_v34 = vld [vmem:[#allocation13 + $0x38] sm:$0xff]  }
 0x2d3   :  { %3224 = vmatprep.subr.bf16.mxu0 %v4509_v0 }
 0x2d6   :  { %3225 = vmatpush3.bf16.msra.mxu0 %v3592_v35  ;;  %v3624_v35 = vld [vmem:[#allocation18] sm:$0xff]  }
 0x2d7   :  { %3226 = vmatprep.subr.bf16.mxu0 %v4509_v0 }
 0x2da   :  { %3227 = vmatpush3.bf16.msra.mxu0 %v3594_v36  ;;  %v3625_v36 = vld [vmem:[#allocation18 + $0x8] sm:$0xff]  }
 0x2db   :  { %3228 = vmatprep.subr.bf16.mxu0 %v4509_v0 }
 0x2de   :  { %3229 = vmatpush3.bf16.msra.mxu0 %v3596_v57  ;;  %v1067_v57 = vld [vmem:[%s5159_s27 + $0x8] sm:$0xff] }
 0x2df   :  { %3230 = vmatprep.subr.bf16.mxu0 %v4509_v0 }
 0x2e2   :  { %3231 = vmatpush3.bf16.msra.mxu0 %v3598_v59 }
 0x2e3   :  { %3075 = vmatprep.subr.bf16.mxu0 %v3600_v61 }
 0x398   :  { %v3042_v37 = vpop.f32.mrb[0].mxu0 }
 0x399   :  { %v3043_v39 = vpop.f32.mrb[1].mxu0 }
 0x39a   :  { %v3044_v40 = vadd.f32 %v3043_v39, %v3042_v37  ;;  %v3045_v41 = vpop.f32.mrb[2].mxu0  ;;  %v3626_v37 = vld [vmem:[#allocation18 + $0x10] sm:$0xff]   ;;  %v2885_v39 = vld [vmem:[#allocation12] ss:$0 sm:$0xff] }
 0x39b   :  { %v3046_v42 = vpop.f32.mrb[3].mxu0 }
 0x39c   :  { %v710_v43 = vadd.f32 %v3044_v40, %v2850_v38  ;;  %v3047_v44 = vadd.f32 %v3046_v42, %v3045_v41 }
 0x39e   :  { %v718_v45 = vmul.f32 0.01, %v710_v43  ;;  %v713_v46 = vadd.f32 %v3047_v44, %v2850_v38  ;;  %vm716_vm1 = vcmp.ge.f32.partialorder %v710_v43, 0.0  ;;  %v3627_v38 = vld [vmem:[#allocation18 + $0x18] sm:$0xff]  }
 0x3a0   :  { %vm717_vm2 = vcmp.ge.f32.partialorder %v713_v46, 0.0  ;;  %v719_v47 = vmul.f32 0.01, %v713_v46  ;;  %v720_v48 = vsel %vm716_vm1, %v710_v43, %v718_v45 }
 0x3a2   :  { %v721_v49 = vsel %vm717_vm2, %v713_v46, %v719_v47 }
 0x3a3   :  { %v722_v51 = vpack.c.bf16 %v721_v49, %v720_v48 }
 0x3a5   :  { %3213 = vmatmul.mubr.bf16.vlgmr.msra.gmra.mrb[0].mxu1 %v722_v51 }
 0x3a6   :  { %3237 = vmatpush3.bf16.msra.mxu1 %v3585_v50  ;;  %3252 = vmatprep.mubr.msk.bf16.mxu1 %vm4510_vm0, %v4509_v0 }
 0x3a7   :  { %3238 = vmatprep.subr.bf16.mxu1 %v4509_v0 }
 0x3aa   :  { %3239 = vmatpush3.bf16.msra.mxu1 %v3587_v52 }
 0x3ab   :  { %3240 = vmatprep.subr.bf16.mxu1 %v4509_v0 }
 0x3ae   :  { %3241 = vmatpush3.bf16.msra.mxu1 %v3589_v53 }
 0x3af   :  { %3242 = vmatprep.subr.bf16.mxu1 %v4509_v0 }
 0x3b2   :  { %3243 = vmatpush3.bf16.msra.mxu1 %v3591_v54  ;;  %v2876_v54 = vld [vmem:[#allocation9] ss:$0 sm:$0xff] }
 0x3b3   :  { %3244 = vmatprep.subr.bf16.mxu1 %v4509_v0 }
 0x3b6   :  { %3245 = vmatpush3.bf16.msra.mxu1 %v3593_v55  ;;  %v1066_v55 = vld [vmem:[%s5159_s27] sm:$0xff] }
 0x3b7   :  { %3246 = vmatprep.subr.bf16.mxu1 %v4509_v0 }
 0x3ba   :  { %3247 = vmatpush3.bf16.msra.mxu1 %v3595_v56 }
 0x3bb   :  { %3248 = vmatprep.subr.bf16.mxu1 %v4509_v0 }
 0x3be   :  { %3249 = vmatpush3.bf16.msra.mxu1 %v3597_v58 }
 0x3bf   :  { %3250 = vmatprep.subr.bf16.mxu1 %v4509_v0 }
 0x3c2   :  { %3251 = vmatpush3.bf16.msra.mxu1 %v3599_v60 }
 0x3c3   :  { %3256 = vmatprep.subr.bf16.mxu1 %v4509_v0 }
 0x478   :  { %v828_v63 = vpop.f32.mrb[0].mxu1 }
 0x479   :  { %v829_v1 = vadd.f32 %v2867_v62, %v828_v63  ;;  %v3214_v2 = vpop.f32.mrb[1].mxu1 }
 0x47a   :  { %v831_v3 = vpop.f32.mrb[2].mxu1 }
 0x47b   :  { %v837_v4 = vmul.f32 0.01, %v829_v1  ;;  %v832_v5 = vadd.f32 %v2867_v62, %v831_v3  ;;  %v3215_v6 = vpop.f32.mrb[3].mxu1  ;;  %vm835_vm3 = vcmp.ge.f32.partialorder %v829_v1, 0.0 }
 0x47d   :  { %vm836_vm4 = vcmp.ge.f32.partialorder %v832_v5, 0.0  ;;  %v838_v7 = vmul.f32 0.01, %v832_v5  ;;  %v839_v8 = vsel %vm835_vm3, %v829_v1, %v837_v4 }
 0x47f   :  { %v840_v9 = vsel %vm836_vm4, %v832_v5, %v838_v7 }
 0x480   :  { %v841_v12 = vpack.c.bf16 %v840_v9, %v839_v8  ;;  %v3629_v9 = vld [vmem:[#allocation18 + $0x28] sm:$0xff]  }
 0x482   :  { %3233 = vmatmul.mubr.bf16.vlgmr.msra.gmra.mrb[4].mxu0 %v841_v12  ;;  %3253 = vmatmul.mubr.bf16.vlgmr.msra.gmra.mrb[4].mxu1 %v841_v12  ;;  %v3648_v12 = vld [vmem:[#allocation21] sm:$0xff]  }
 0x483   :  { %3076 = vmatpush3.bf16.msra.mxu0 %v3601_v10  ;;  %3257 = vmatpush3.bf16.msra.mxu1 %v3604_v11  ;;  %v3630_v10 = vld [vmem:[#allocation18 + $0x30] sm:$0xff]   ;;  %v3631_v11 = vld [vmem:[#allocation18 + $0x38] sm:$0xff]  }
 0x484   :  { %3077 = vmatprep.subr.bf16.mxu0 %v3602_v13  ;;  %3258 = vmatprep.subr.bf16.mxu1 %v4509_v0  ;;  %v3649_v13 = vld [vmem:[#allocation21 + $0x8] sm:$0xff]  }
 0x485   :  { %1255 = vmatprep.mubr.bf16.mxu0 %v4897_v15  ;;  %3272 = vmatprep.mubr.msk.bf16.mxu1 %vm4510_vm0, %v4509_v0  ;;  %v3613_v15 = vld [vmem:[#allocation13 + $0x18] sm:$0xff]  }
 0x487   :  { %3078 = vmatpush3.bf16.msra.mxu0 %v3603_v14  ;;  %3259 = vmatpush3.bf16.msra.mxu1 %v3607_v16  ;;  %v3650_v14 = vld [vmem:[#allocation21 + $0x10] sm:$0xff]   ;;  %v3651_v16 = vld [vmem:[#allocation21 + $0x18] sm:$0xff]  }
 0x488   :  { %3079 = vmatprep.subr.bf16.mxu0 %v3605_v17  ;;  %3260 = vmatprep.subr.bf16.mxu1 %v4509_v0  ;;  %v3652_v17 = vld [vmem:[#allocation21 + $0x20] sm:$0xff]  }
 0x48b   :  { %3080 = vmatpush3.bf16.msra.mxu0 %v3606_v18  ;;  %3261 = vmatpush3.bf16.msra.mxu1 %v3610_v21  ;;  %v3653_v18 = vld [vmem:[#allocation21 + $0x28] sm:$0xff]  }
 0x48c   :  { %3081 = vmatprep.subr.bf16.mxu0 %v3608_v19  ;;  %3262 = vmatprep.subr.bf16.mxu1 %v4509_v0 }
 0x48f   :  { %3082 = vmatpush3.bf16.msra.mxu0 %v3609_v20  ;;  %3263 = vmatpush3.bf16.msra.mxu1 %v3613_v15  ;;  %v2918_v20 = vld [vmem:[#allocation16] ss:$0 sm:$0xff] }
 0x490   :  { %3083 = vmatprep.subr.bf16.mxu0 %v3611_v22  ;;  %3264 = vmatprep.subr.bf16.mxu1 %v4509_v0 }
 0x493   :  { %3084 = vmatpush3.bf16.msra.mxu0 %v3612_v23  ;;  %3265 = vmatpush3.bf16.msra.mxu1 %v3616_v27 }
 0x494   :  { %3085 = vmatprep.subr.bf16.mxu0 %v3614_v24  ;;  %3266 = vmatprep.subr.bf16.mxu1 %v4509_v0 }
 0x497   :  { %3086 = vmatpush3.bf16.msra.mxu0 %v3615_v25  ;;  %3267 = vmatpush3.bf16.msra.mxu1 %v3619_v31 }
 0x498   :  { %3087 = vmatprep.subr.bf16.mxu0 %v3617_v28  ;;  %3268 = vmatprep.subr.bf16.mxu1 %v4509_v0 }
 0x49b   :  { %3088 = vmatpush3.bf16.msra.mxu0 %v3618_v29  ;;  %3269 = vmatpush3.bf16.msra.mxu1 %v3622_v33 }
 0x49c   :  { %3089 = vmatprep.subr.bf16.mxu0 %v3620_v30  ;;  %3270 = vmatprep.subr.bf16.mxu1 %v4509_v0 }
 0x49f   :  { %3090 = vmatpush3.bf16.msra.mxu0 %v3621_v32  ;;  %3271 = vmatpush3.bf16.msra.mxu1 %v3623_v34  ;;  %v3632_v32 = vld [vmem:[#allocation24] sm:$0xff]   ;;  %v3633_v34 = vld [vmem:[#allocation24 + $0x8] sm:$0xff]  }
 0x4a0   :  { %3276 = vmatprep.subr.bf16.mxu0 %v4509_v0  ;;  %3296 = vmatprep.subr.bf16.mxu1 %v4509_v0 }
 0x4a2   :  { %1256 = vmatmul.mubr.bf16.vlgmr.msra.gmra.mrb[8].mxu0 %v4909_v26  ;;  %v3628_v26 = vld [vmem:[#allocation18 + $0x20] sm:$0xff]  }
 0x4a3   :  { %3292 = vmatprep.mubr.msk.bf16.mxu0 %vm4510_vm0, %v4509_v0  ;;  %3277 = vmatpush3.bf16.msra.mxu0 %v3624_v35  ;;  %v3634_v35 = vld [vmem:[#allocation24 + $0x10] sm:$0xff]  }
 0x4a4   :  { %3278 = vmatprep.subr.bf16.mxu0 %v4509_v0 }
 0x4a7   :  { %3279 = vmatpush3.bf16.msra.mxu0 %v3625_v36  ;;  %v3635_v36 = vld [vmem:[#allocation24 + $0x18] sm:$0xff]  }
 0x4a8   :  { %3280 = vmatprep.subr.bf16.mxu0 %v4509_v0 }
 0x4ab   :  { %3281 = vmatpush3.bf16.msra.mxu0 %v3626_v37  ;;  %v3636_v37 = vld [vmem:[#allocation24 + $0x20] sm:$0xff]  }
 0x4ac   :  { %3282 = vmatprep.subr.bf16.mxu0 %v4509_v0 }
 0x4af   :  { %3283 = vmatpush3.bf16.msra.mxu0 %v3627_v38  ;;  %v3637_v38 = vld [vmem:[#allocation24 + $0x28] sm:$0xff]  }
 0x4b0   :  { %3284 = vmatprep.subr.bf16.mxu0 %v4509_v0 }
 0x4b3   :  { %3285 = vmatpush3.bf16.msra.mxu0 %v3628_v26  ;;  %v3638_v26 = vld [vmem:[#allocation24 + $0x30] sm:$0xff]  }
 0x4b4   :  { %3286 = vmatprep.subr.bf16.mxu0 %v4509_v0 }
 0x4b7   :  { %3287 = vmatpush3.bf16.msra.mxu0 %v3629_v9  ;;  %v3656_v9 = vld [vmem:[#allocation27] sm:$0xff]  }
 0x4b8   :  { %3288 = vmatprep.subr.bf16.mxu0 %v4509_v0 }
 0x4bb   :  { %3289 = vmatpush3.bf16.msra.mxu0 %v3630_v10 }
 0x4bc   :  { %3290 = vmatprep.subr.bf16.mxu0 %v4509_v0 }
 0x4bf   :  { %3291 = vmatpush3.bf16.msra.mxu0 %v3631_v11  ;;  %v3657_v11 = vld [vmem:[#allocation27 + $0x8] sm:$0xff]  }
 0x4c0   :  { %3316 = vmatprep.subr.bf16.mxu0 %v4509_v0 }
 0x555   :  { %v947_v40 = vpop.f32.mrb[4].mxu0  ;;  %v1059_v41 = vpop.f32.mrb[4].mxu1 }
 0x556   :  { %v1060_v42 = vadd.f32 %v2885_v39, %v1059_v41  ;;  %v3234_v43 = vpop.f32.mrb[5].mxu0  ;;  %v3254_v44 = vpop.f32.mrb[5].mxu1  ;;  %v4961_v58 = vadd.f32 %v2876_v54, %v947_v40  ;;  %v3640_v40 = vld [vmem:[#allocation33] sm:$0xff]   ;;  %v3641_v41 = vld [vmem:[#allocation33 + $0x8] sm:$0xff]  }
 0x557   :  { %v950_v45 = vpop.f32.mrb[6].mxu0  ;;  %v1062_v46 = vpop.f32.mrb[6].mxu1  ;;  %v3643_v43 = vld [vmem:[#allocation33 + $0x18] sm:$0xff]   ;;  %v3644_v44 = vld [vmem:[#allocation33 + $0x20] sm:$0xff]  }
 0x558   :  { %v1068_v47 = vmul.f32 0.5, %v1060_v42  ;;  %v1063_v48 = vadd.f32 %v2885_v39, %v1062_v46  ;;  %v3235_v49 = vpop.f32.mrb[7].mxu0  ;;  %v3255_v50 = vpop.f32.mrb[7].mxu1  ;;  %v4963_v61 = vadd.f32 %v2876_v54, %v950_v45  ;;  %v3639_v39 = vld [vmem:[#allocation24 + $0x38] sm:$0xff]   ;;  %v3645_v45 = vld [vmem:[#allocation33 + $0x28] sm:$0xff]   ;;  %v3668_v54 = vld [vmem:[#allocation34 + $0x20] sm:$0xff]  }
 0x559   :  { %v3642_v42 = vld [vmem:[#allocation33 + $0x10] sm:$0xff]   ;;  %v3664_v50 = vld [vmem:[#allocation34] sm:$0xff]  }
 0x55a   :  { %v1070_v51 = vmul.f32 1.442695, %v1068_v47  ;;  %v1069_v52 = vmul.f32 0.5, %v1063_v48  ;;  %v3646_v46 = vld [vmem:[#allocation33 + $0x30] sm:$0xff]   ;;  %v3647_v47 = vld [vmem:[#allocation33 + $0x38] sm:$0xff]   ;;  %v3654_v48 = vld [vmem:[#allocation21 + $0x30] sm:$0xff]  }
 0x55b   :  { %v3655_v49 = vld [vmem:[#allocation21 + $0x38] sm:$0xff]  }
 0x55c   :  { %3728 = vpow2.f32 %v1070_v51  ;;  %v1072_v53 = vmul.f32 1.442695, %v1069_v52  ;;  %v3665_v51 = vld [vmem:[#allocation34 + $0x8] sm:$0xff]   ;;  %v3666_v52 = vld [vmem:[#allocation34 + $0x10] sm:$0xff]  }
 0x55e   :  { %3730 = vpow2.f32 %v1072_v53  ;;  %v3667_v53 = vld [vmem:[#allocation34 + $0x18] sm:$0xff]  }
 0x566   :  { %v3729_v56 = vpop.eup %3728 }
 0x567   :  { %v1074_v59 = vmul.f32 %v3729_v56, %v1066_v55  ;;  %v3669_v55 = vld [vmem:[#allocation34 + $0x28] sm:$0xff]   ;;  %v3670_v56 = vld [vmem:[#allocation34 + $0x30] sm:$0xff]  }
 0x568   :  { %v3731_v60 = vpop.eup %3730 }
 0x569   :  { %v1075_v62 = vmul.f32 %v3731_v60, %v1067_v57  ;;  %v1076_v63 = vadd.f32 %v1074_v59, %v4961_v58  ;;  %v3671_v57 = vld [vmem:[#allocation34 + $0x38] sm:$0xff]   ;;  %v2919_v59 = vld [vmem:[#allocation19] ss:$0 sm:$0xff] }
 0x56b   :  { %v1077_v1 = vadd.f32 %v1075_v62, %v4963_v61 }
 0x56d   :  { %v4967_v2 = vpack.c.bf16 %v1077_v1, %v1076_v63 }
 0x56f   :  { %3273 = vmatmul.mubr.bf16.vlgmr.msra.gmra.mrb[8].mxu1 %v4967_v2 }
 0x570   :  { %3312 = vmatprep.mubr.msk.bf16.mxu1 %vm4510_vm0, %v4509_v0  ;;  %3297 = vmatpush3.bf16.msra.mxu1 %v3648_v12  ;;  %v3658_v12 = vld [vmem:[#allocation27 + $0x10] sm:$0xff]  }
 0x571   :  { %3298 = vmatprep.subr.bf16.mxu1 %v4509_v0 }
 0x574   :  { %3299 = vmatpush3.bf16.msra.mxu1 %v3649_v13  ;;  %v3659_v13 = vld [vmem:[#allocation27 + $0x18] sm:$0xff]  }
 0x575   :  { %v3091_v3 = vpop.f32.mrb[8].mxu0  ;;  %3300 = vmatprep.subr.bf16.mxu1 %v4509_v0 }
 0x576   :  { %v3092_v4 = vpop.f32.mrb[9].mxu0 }
 0x577   :  { %v3093_v5 = vadd.f32 %v3092_v4, %v3091_v3  ;;  %v3094_v6 = vpop.f32.mrb[10].mxu0 }
 0x578   :  { %v3095_v7 = vpop.f32.mrb[11].mxu0  ;;  %3301 = vmatpush3.bf16.msra.mxu1 %v3650_v14  ;;  %v3660_v14 = vld [vmem:[#allocation27 + $0x20] sm:$0xff]  }
 0x579   :  { %v3096_v8 = vadd.f32 %v3095_v7, %v3094_v6  ;;  %3302 = vmatprep.subr.bf16.mxu1 %v4509_v0 }
 0x57c   :  { %3303 = vmatpush3.bf16.msra.mxu1 %v3651_v16  ;;  %v3661_v16 = vld [vmem:[#allocation27 + $0x28] sm:$0xff]  }
 0x57d   :  { %3304 = vmatprep.subr.bf16.mxu1 %v4509_v0 }
 0x580   :  { %3305 = vmatpush3.bf16.msra.mxu1 %v3652_v17  ;;  %v2937_v17 = vld [vmem:[#allocation25] ss:$0 sm:$0xff] }
 0x581   :  { %3306 = vmatprep.subr.bf16.mxu1 %v4509_v0 }
 0x584   :  { %3307 = vmatpush3.bf16.msra.mxu1 %v3653_v18  ;;  %v3662_v18 = vld [vmem:[#allocation27 + $0x30] sm:$0xff]  }
 0x585   :  { %3308 = vmatprep.subr.bf16.mxu1 %v4509_v0 }
 0x588   :  { %3309 = vmatpush3.bf16.msra.mxu1 %v3654_v48 }
 0x589   :  { %3310 = vmatprep.subr.bf16.mxu1 %v4509_v0 }
 0x58c   :  { %3311 = vmatpush3.bf16.msra.mxu1 %v3655_v49  ;;  %v3673_v49 = vld [vmem:[#allocation39 + $0x8] sm:$0xff]  }
 0x58d   :  { %3336 = vmatprep.subr.bf16.mxu1 %v4509_v0 }
 0x642   :  { %v1346_v19 = vpop.f32.mrb[8].mxu1 }
 0x643   :  { %v1347_v21 = vadd.f32 %v3093_v5, %v1346_v19  ;;  %v3274_v22 = vpop.f32.mrb[9].mxu1 }
 0x644   :  { %v1349_v23 = vpop.f32.mrb[10].mxu1 }
 0x645   :  { %v1360_v15 = vadd.f32 %v2918_v20, %v1347_v21  ;;  %v1350_v24 = vadd.f32 %v3096_v8, %v1349_v23  ;;  %v3275_v25 = vpop.f32.mrb[11].mxu1 }
 0x646   :  { %v3663_v25 = vld [vmem:[#allocation27 + $0x38] sm:$0xff]  }
 0x647   :  { %v1364_v27 = vmul.f32 0.01, %v1360_v15  ;;  %v1361_v28 = vadd.f32 %v2918_v20, %v1350_v24  ;;  %vm1362_vm5 = vcmp.ge.f32.partialorder %v1360_v15, 0.0 }
 0x649   :  { %vm1363_vm6 = vcmp.ge.f32.partialorder %v1361_v28, 0.0  ;;  %v1365_v29 = vmul.f32 0.01, %v1361_v28  ;;  %v1366_v30 = vsel %vm1362_vm5, %v1360_v15, %v1364_v27 }
 0x64b   :  { %v1367_v31 = vsel %vm1363_vm6, %v1361_v28, %v1365_v29 }
 0x64c   :  { %v1368_v33 = vpack.c.bf16 %v1367_v31, %v1366_v30  ;;  %v3680_v30 = vld [vmem:[#allocation30] sm:$0xff]  }
 0x64e   :  { %3293 = vmatmul.mubr.bf16.vlgmr.msra.gmra.mrb[12].mxu0 %v1368_v33  ;;  %v3682_v33 = vld [vmem:[#allocation30 + $0x10] sm:$0xff]  }
 0x64f   :  { %3317 = vmatpush3.bf16.msra.mxu0 %v3632_v32  ;;  %3332 = vmatprep.mubr.msk.bf16.mxu0 %vm4510_vm0, %v4509_v0  ;;  %v3681_v32 = vld [vmem:[#allocation30 + $0x8] sm:$0xff]  }
 0x650   :  { %3318 = vmatprep.subr.bf16.mxu0 %v4509_v0 }
 0x653   :  { %3319 = vmatpush3.bf16.msra.mxu0 %v3633_v34  ;;  %v3683_v34 = vld [vmem:[#allocation30 + $0x18] sm:$0xff]  }
 0x654   :  { %3320 = vmatprep.subr.bf16.mxu0 %v4509_v0 }
 0x657   :  { %3321 = vmatpush3.bf16.msra.mxu0 %v3634_v35  ;;  %v3684_v35 = vld [vmem:[#allocation30 + $0x20] sm:$0xff]  }
 0x658   :  { %3322 = vmatprep.subr.bf16.mxu0 %v4509_v0 }
 0x65b   :  { %3323 = vmatpush3.bf16.msra.mxu0 %v3635_v36  ;;  %v3685_v36 = vld [vmem:[#allocation30 + $0x28] sm:$0xff]  }
 0x65c   :  { %3324 = vmatprep.subr.bf16.mxu0 %v4509_v0 }
 0x65f   :  { %3325 = vmatpush3.bf16.msra.mxu0 %v3636_v37  ;;  %v2964_v37 = vld [vmem:[%s5160_s22] ss:$0 sm:$0xff] }
 0x660   :  { %3326 = vmatprep.subr.bf16.mxu0 %v4509_v0 }
 0x663   :  { %3327 = vmatpush3.bf16.msra.mxu0 %v3637_v38 }
 0x664   :  { %3328 = vmatprep.subr.bf16.mxu0 %v4509_v0 }
 0x667   :  { %3329 = vmatpush3.bf16.msra.mxu0 %v3638_v26 }
 0x668   :  { %3330 = vmatprep.subr.bf16.mxu0 %v4509_v0 }
 0x66b   :  { %3331 = vmatpush3.bf16.msra.mxu0 %v3639_v39 }
 0x66c   :  { %3376 = vmatprep.subr.bf16.mxu0 %v4509_v0 }
 0x66e   :  { %3333 = vmatmul.mubr.bf16.vlgmr.msra.gmra.mrb[16].mxu0 %v4967_v2 }
 0x66f   :  { %3377 = vmatpush3.bf16.msra.mxu0 %v3640_v40  ;;  %3392 = vmatprep.mubr.msk.bf16.mxu0 %vm4510_vm0, %v4509_v0 }
 0x670   :  { %3378 = vmatprep.subr.bf16.mxu0 %v4509_v0 }
 0x673   :  { %3379 = vmatpush3.bf16.msra.mxu0 %v3641_v41 }
 0x674   :  { %3380 = vmatprep.subr.bf16.mxu0 %v4509_v0 }
 0x677   :  { %3381 = vmatpush3.bf16.msra.mxu0 %v3642_v42 }
 0x678   :  { %3382 = vmatprep.subr.bf16.mxu0 %v4509_v0 }
 0x67b   :  { %3383 = vmatpush3.bf16.msra.mxu0 %v3643_v43 }
 0x67c   :  { %3384 = vmatprep.subr.bf16.mxu0 %v4509_v0 }
 0x67f   :  { %3385 = vmatpush3.bf16.msra.mxu0 %v3644_v44 }
 0x680   :  { %3386 = vmatprep.subr.bf16.mxu0 %v4509_v0 }
 0x683   :  { %3387 = vmatpush3.bf16.msra.mxu0 %v3645_v45 }
 0x684   :  { %3388 = vmatprep.subr.bf16.mxu0 %v4509_v0 }
 0x687   :  { %3389 = vmatpush3.bf16.msra.mxu0 %v3646_v46 }
 0x688   :  { %3390 = vmatprep.subr.bf16.mxu0 %v4509_v0 }
 0x68b   :  { %3391 = vmatpush3.bf16.msra.mxu0 %v3647_v47  ;;  %v3672_v47 = vld [vmem:[#allocation39] sm:$0xff]  }
 0x68c   :  { %3396 = vmatprep.subr.bf16.mxu0 %v4509_v0 }
 0x68e   :  { %3393 = vmatmul.mubr.bf16.vlgmr.msra.gmra.mrb[20].mxu0 %v4967_v2 }
 0x68f   :  { %3412 = vmatprep.mubr.msk.bf16.mxu0 %vm4510_vm0, %v4509_v0  ;;  %3397 = vmatpush3.bf16.msra.mxu0 %v3664_v50  ;;  %v3674_v50 = vld [vmem:[#allocation39 + $0x10] sm:$0xff]  }
 0x690   :  { %3398 = vmatprep.subr.bf16.mxu0 %v4509_v0 }
 0x693   :  { %3399 = vmatpush3.bf16.msra.mxu0 %v3665_v51  ;;  %v3675_v51 = vld [vmem:[#allocation39 + $0x18] sm:$0xff]  }
 0x694   :  { %3400 = vmatprep.subr.bf16.mxu0 %v4509_v0 }
 0x697   :  { %3401 = vmatpush3.bf16.msra.mxu0 %v3666_v52  ;;  %v3676_v52 = vld [vmem:[#allocation39 + $0x20] sm:$0xff]  }
 0x698   :  { %3402 = vmatprep.subr.bf16.mxu0 %v4509_v0 }
 0x69b   :  { %3403 = vmatpush3.bf16.msra.mxu0 %v3667_v53  ;;  %v3677_v53 = vld [vmem:[#allocation39 + $0x28] sm:$0xff]  }
 0x69c   :  { %3404 = vmatprep.subr.bf16.mxu0 %v4509_v0 }
 0x69f   :  { %3405 = vmatpush3.bf16.msra.mxu0 %v3668_v54  ;;  %v3678_v54 = vld [vmem:[#allocation39 + $0x30] sm:$0xff]  }
 0x6a0   :  { %3406 = vmatprep.subr.bf16.mxu0 %v4509_v0 }
 0x6a3   :  { %3407 = vmatpush3.bf16.msra.mxu0 %v3669_v55  ;;  %v3679_v55 = vld [vmem:[#allocation39 + $0x38] sm:$0xff]  }
 0x6a4   :  { %3408 = vmatprep.subr.bf16.mxu0 %v4509_v0 }
 0x6a7   :  { %3409 = vmatpush3.bf16.msra.mxu0 %v3670_v56  ;;  %v3686_v56 = vld [vmem:[#allocation30 + $0x30] sm:$0xff]  }
 0x6a8   :  { %3410 = vmatprep.subr.bf16.mxu0 %v4509_v0 }
 0x6ab   :  { %3411 = vmatpush3.bf16.msra.mxu0 %v3671_v57  ;;  %v3687_v57 = vld [vmem:[#allocation30 + $0x38] sm:$0xff]  }
 0x6ac   :  { %3416 = vmatprep.subr.bf16.mxu0 %v4509_v0 }
 0x721   :  { %v1474_v60 = vpop.f32.mrb[12].mxu0 }
 0x722   :  { %v1475_v62 = vadd.f32 %v2919_v59, %v1474_v60  ;;  %v3294_v63 = vpop.f32.mrb[13].mxu0  ;;  %v2946_v60 = vld [vmem:[#allocation28] ss:$0 sm:$0xff] }
 0x723   :  { %v1477_v1 = vpop.f32.mrb[14].mxu0 }
 0x724   :  { %v1483_v3 = vmul.f32 0.01, %v1475_v62  ;;  %v1478_v4 = vadd.f32 %v2919_v59, %v1477_v1  ;;  %v3295_v5 = vpop.f32.mrb[15].mxu0  ;;  %vm1481_vm7 = vcmp.ge.f32.partialorder %v1475_v62, 0.0  ;;  %v3690_v59 = vld [vmem:[%s5161_s20 + $0x4] ss:$8 sps:$4 sm:$0xff]  }
 0x726   :  { %vm1482_vm8 = vcmp.ge.f32.partialorder %v1478_v4, 0.0  ;;  %v1484_v6 = vmul.f32 0.01, %v1478_v4  ;;  %v1485_v7 = vsel %vm1481_vm7, %v1475_v62, %v1483_v3 }
 0x728   :  { %v1486_v8 = vsel %vm1482_vm8, %v1478_v4, %v1484_v6 }
 0x729   :  { %v1487_v10 = vpack.c.bf16 %v1486_v8, %v1485_v7 }
 0x72b   :  { %3313 = vmatmul.mubr.bf16.vlgmr.msra.gmra.mrb[12].mxu1 %v1487_v10 }
 0x72c   :  { %3337 = vmatpush3.bf16.msra.mxu1 %v3656_v9  ;;  %3352 = vmatprep.mubr.msk.bf16.mxu1 %vm4510_vm0, %v4509_v0  ;;  %v3688_v9 = vld [vmem:[%s5161_s20] ss:$8 sps:$4 sm:$0xff]  }
 0x72d   :  { %3338 = vmatprep.subr.bf16.mxu1 %v4509_v0 }
 0x730   :  { %3339 = vmatpush3.bf16.msra.mxu1 %v3657_v11  ;;  %v3693_v11 = vld [vmem:[%s5161_s20 + $0x14] ss:$8 sps:$4 sm:$0xff]  }
 0x731   :  { %3340 = vmatprep.subr.bf16.mxu1 %v4509_v0 }
 0x734   :  { %3341 = vmatpush3.bf16.msra.mxu1 %v3658_v12  ;;  %v3691_v12 = vld [vmem:[%s5161_s20 + $0x10] ss:$8 sps:$4 sm:$0xff]  }
 0x735   :  { %3342 = vmatprep.subr.bf16.mxu1 %v4509_v0 }
 0x738   :  { %3343 = vmatpush3.bf16.msra.mxu1 %v3659_v13  ;;  %v4511_v13 = vmov 0  }
 0x739   :  { %3344 = vmatprep.subr.bf16.mxu1 %v4509_v0 }
 0x73c   :  { %3345 = vmatpush3.bf16.msra.mxu1 %v3660_v14  ;;  %v3696_v14 = vld [vmem:[%s5161_s20 + $0x24] ss:$8 sps:$4 sm:$0xff]  }
 0x73d   :  { %3346 = vmatprep.subr.bf16.mxu1 %v4509_v0 }
 0x740   :  { %3347 = vmatpush3.bf16.msra.mxu1 %v3661_v16  ;;  %v3694_v16 = vld [vmem:[%s5161_s20 + $0x20] ss:$8 sps:$4 sm:$0xff]  }
 0x741   :  { %v1705_v19 = vpop.f32.mrb[16].mxu0  ;;  %3348 = vmatprep.subr.bf16.mxu1 %v4509_v0 }
 0x742   :  { %v1706_v20 = vadd.f32 %v2937_v17, %v1705_v19  ;;  %v3334_v21 = vpop.f32.mrb[17].mxu0  ;;  %v3702_v19 = vld [vmem:[%s5161_s20 + $0x44] ss:$8 sps:$4 sm:$0xff]  }
 0x743   :  { %v1708_v22 = vpop.f32.mrb[18].mxu0  ;;  %v3705_v21 = vld [vmem:[%s5161_s20 + $0x54] ss:$8 sps:$4 sm:$0xff]  }
 0x744   :  { %v1714_v23 = vmul.f32 0.01, %v1706_v20  ;;  %v1709_v15 = vadd.f32 %v2937_v17, %v1708_v22  ;;  %v3335_v24 = vpop.f32.mrb[19].mxu0  ;;  %3349 = vmatpush3.bf16.msra.mxu1 %v3662_v18  ;;  %vm1712_vm9 = vcmp.ge.f32.partialorder %v1706_v20, 0.0  ;;  %v3699_v17 = vld [vmem:[%s5161_s20 + $0x34] ss:$8 sps:$4 sm:$0xff]  }
 0x745   :  { %3350 = vmatprep.subr.bf16.mxu1 %v4509_v0  ;;  %v3697_v18 = vld [vmem:[%s5161_s20 + $0x30] ss:$8 sps:$4 sm:$0xff]   ;;  %v3706_v24 = vld [vmem:[%s5161_s20 + $0x60] ss:$8 sps:$4 sm:$0xff]  }
 0x746   :  { %vm1713_vm10 = vcmp.ge.f32.partialorder %v1709_v15, 0.0  ;;  %v1715_v27 = vmul.f32 0.01, %v1709_v15  ;;  %v1716_v28 = vsel %vm1712_vm9, %v1706_v20, %v1714_v23  ;;  %v3700_v20 = vld [vmem:[%s5161_s20 + $0x40] ss:$8 sps:$4 sm:$0xff]  }
 0x747   :  { %v3703_v22 = vld [vmem:[%s5161_s20 + $0x50] ss:$8 sps:$4 sm:$0xff]   ;;  %v3708_v23 = vld [vmem:[%s5161_s20 + $0x64] ss:$8 sps:$4 sm:$0xff]  }
 0x748   :  { %v1717_v29 = vsel %vm1713_vm10, %v1709_v15, %v1715_v27  ;;  %3351 = vmatpush3.bf16.msra.mxu1 %v3663_v25  ;;  %v2973_v15 = vld [vmem:[#allocation36] ss:$0 sm:$0xff] }
 0x749   :  { %v1718_v31 = vpack.c.bf16 %v1717_v29, %v1716_v28  ;;  %3356 = vmatprep.subr.bf16.mxu1 %v4509_v0  ;;  %v3711_v27 = vld [vmem:[%s5161_s20 + $0x74] ss:$8 sps:$4 sm:$0xff]  }
 0x74b   :  { %3353 = vmatmul.mubr.bf16.vlgmr.msra.gmra.mrb[16].mxu1 %v1718_v31 }
 0x74c   :  { %3357 = vmatpush3.bf16.msra.mxu1 %v3680_v30  ;;  %3372 = vmatprep.mubr.msk.bf16.mxu1 %vm4510_vm0, %v4509_v0 }
 0x74d   :  { %3358 = vmatprep.subr.bf16.mxu1 %v4509_v0 }
 0x750   :  { %3359 = vmatpush3.bf16.msra.mxu1 %v3681_v32 }
 0x751   :  { %3360 = vmatprep.subr.bf16.mxu1 %v4509_v0 }
 0x754   :  { %3361 = vmatpush3.bf16.msra.mxu1 %v3682_v33 }
 0x755   :  { %3362 = vmatprep.subr.bf16.mxu1 %v4509_v0 }
 0x758   :  { %3363 = vmatpush3.bf16.msra.mxu1 %v3683_v34  ;;  %v3709_v34 = vld [vmem:[%s5161_s20 + $0x70] ss:$8 sps:$4 sm:$0xff]  }
 0x759   :  { %3364 = vmatprep.subr.bf16.mxu1 %v4509_v0 }
 0x75c   :  { %3365 = vmatpush3.bf16.msra.mxu1 %v3684_v35 }
 0x75d   :  { %3366 = vmatprep.subr.bf16.mxu1 %v4509_v0 }
 0x760   :  { %3367 = vmatpush3.bf16.msra.mxu1 %v3685_v36 }
 0x761   :  { %v2061_v38 = vpop.f32.mrb[20].mxu0  ;;  %3368 = vmatprep.subr.bf16.mxu1 %v4509_v0 }
 0x762   :  { %v2062_v26 = vadd.f32 %v2964_v37, %v2061_v38  ;;  %v3394_v39 = vpop.f32.mrb[21].mxu0  ;;  %v3712_v38 = vld [vmem:[#allocation42] sm:$0xff]  }
 0x763   :  { %v2064_v40 = vpop.f32.mrb[22].mxu0  ;;  %v3713_v39 = vld [vmem:[#allocation42 + $0x8] sm:$0xff]  }
 0x764   :  { %v2070_v41 = vmul.f32 0.01, %v2062_v26  ;;  %v2065_v42 = vadd.f32 %v2964_v37, %v2064_v40  ;;  %v3395_v43 = vpop.f32.mrb[23].mxu0  ;;  %vm2068_vm11 = vcmp.ge.f32.partialorder %v2062_v26, 0.0  ;;  %3369 = vmatpush3.bf16.msra.mxu1 %v3686_v56  ;;  %v3714_v40 = vld [vmem:[#allocation42 + $0x10] sm:$0xff]  }
 0x765   :  { %3370 = vmatprep.subr.bf16.mxu1 %v4509_v0  ;;  %v3717_v43 = vld [vmem:[#allocation42 + $0x28] sm:$0xff]  }
 0x766   :  { %vm2069_vm12 = vcmp.ge.f32.partialorder %v2065_v42, 0.0  ;;  %v2071_v44 = vmul.f32 0.01, %v2065_v42  ;;  %v2072_v45 = vsel %vm2068_vm11, %v2062_v26, %v2070_v41  ;;  %v3715_v41 = vld [vmem:[#allocation42 + $0x18] sm:$0xff]  }
 0x768   :  { %v2073_v46 = vsel %vm2069_vm12, %v2065_v42, %v2071_v44  ;;  %3371 = vmatpush3.bf16.msra.mxu1 %v3687_v57  ;;  %v3716_v42 = vld [vmem:[#allocation42 + $0x20] sm:$0xff]   ;;  %v2999_v44 = vld [vmem:[#allocation40] ss:$0 sm:$0xff] }
 0x769   :  { %v2074_v48 = vpack.c.bf16 %v2073_v46, %v2072_v45  ;;  %2302 = vmatprep.subr.bf16.mxu1 %v3690_v59  ;;  %v3718_v45 = vld [vmem:[#allocation42 + $0x30] sm:$0xff]   ;;  %v3720_v59 = vld [vmem:[#allocation45] sm:$0xff]  }
 0x76b   :  { %3413 = vmatmul.mubr.bf16.vlgmr.msra.gmra.mrb[24].mxu0 %v2074_v48 }
 0x76c   :  { %3417 = vmatpush3.bf16.msra.mxu0 %v3672_v47  ;;  %3432 = vmatprep.mubr.msk.bf16.mxu0 %vm4510_vm0, %v4509_v0 }
 0x76d   :  { %3418 = vmatprep.subr.bf16.mxu0 %v4509_v0 }
 0x770   :  { %3419 = vmatpush3.bf16.msra.mxu0 %v3673_v49 }
 0x771   :  { %3420 = vmatprep.subr.bf16.mxu0 %v4509_v0 }
 0x774   :  { %3421 = vmatpush3.bf16.msra.mxu0 %v3674_v50 }
 0x775   :  { %3422 = vmatprep.subr.bf16.mxu0 %v4509_v0 }
 0x778   :  { %3423 = vmatpush3.bf16.msra.mxu0 %v3675_v51 }
 0x779   :  { %3424 = vmatprep.subr.bf16.mxu0 %v4509_v0 }
 0x77c   :  { %3425 = vmatpush3.bf16.msra.mxu0 %v3676_v52 }
 0x77d   :  { %3426 = vmatprep.subr.bf16.mxu0 %v4509_v0 }
 0x780   :  { %3427 = vmatpush3.bf16.msra.mxu0 %v3677_v53  ;;  %v3719_v53 = vld [vmem:[#allocation42 + $0x38] sm:$0xff]  }
 0x781   :  { %3428 = vmatprep.subr.bf16.mxu0 %v4509_v0 }
 0x784   :  { %3429 = vmatpush3.bf16.msra.mxu0 %v3678_v54 }
 0x785   :  { %3430 = vmatprep.subr.bf16.mxu0 %v4509_v0 }
 0x788   :  { %3431 = vmatpush3.bf16.msra.mxu0 %v3679_v55 }
 0x789   :  { %3456 = vmatprep.subr.bf16.mxu0 %v4509_v0 }
 0x78b   :  { %3433 = vmatmul.mubr.bf16.vlgmr.msra.gmra.mrb[28].mxu0 %v4967_v2 }
 0x78c   :  { %3472 = vmatprep.mubr.msk.bf16.mxu0 %vm4510_vm0, %v4509_v0  ;;  %3457 = vmatpush3.bf16.msra.mxu0 %v3720_v59 }
 0x78d   :  { %3458 = vmatprep.subr.bf16.mxu0 %v4509_v0 }
 0x81e   :  { %v1824_v62 = vpop.f32.mrb[16].mxu1 }
 0x81f   :  { %v1825_v63 = vadd.f32 %v2946_v60, %v1824_v62  ;;  %v3354_v1 = vpop.f32.mrb[17].mxu1  ;;  %v3722_v62 = vld [vmem:[#allocation45 + $0x10] sm:$0xff]  }
 0x820   :  { %v1827_v3 = vpop.f32.mrb[18].mxu1  ;;  %v3724_v1 = vld [vmem:[#allocation45 + $0x20] sm:$0xff]  }
 0x821   :  { %v1833_v2 = vmul.f32 0.01, %v1825_v63  ;;  %v1828_v4 = vadd.f32 %v2946_v60, %v1827_v3  ;;  %v3355_v5 = vpop.f32.mrb[19].mxu1  ;;  %vm1831_vm13 = vcmp.ge.f32.partialorder %v1825_v63, 0.0  ;;  %v3721_v60 = vld [vmem:[#allocation45 + $0x8] sm:$0xff]  }
 0x822   :  { %3459 = vmatpush3.bf16.msra.mxu0 %v3721_v60  ;;  %v3725_v3 = vld [vmem:[#allocation45 + $0x28] sm:$0xff]   ;;  %v2349_v5 = vld [vmem:[%s5162_s23] sm:$0x3] }
 0x823   :  { %vm1832_vm14 = vcmp.ge.f32.partialorder %v1828_v4, 0.0  ;;  %v1834_v6 = vmul.f32 0.01, %v1828_v4  ;;  %v1835_v7 = vsel %vm1831_vm13, %v1825_v63, %v1833_v2  ;;  %3460 = vmatprep.subr.bf16.mxu0 %v4509_v0  ;;  %v3723_v63 = vld [vmem:[#allocation45 + $0x18] sm:$0xff]   ;;  %v3726_v2 = vld [vmem:[#allocation45 + $0x30] sm:$0xff]  }
 0x825   :  { %v1836_v8 = vsel %vm1832_vm14, %v1828_v4, %v1834_v6  ;;  %v3727_v4 = vld [vmem:[#allocation45 + $0x38] sm:$0xff]   ;;  %v2350_v6 = vsub.f32 -8.0, %v2349_v5 }
 0x826   :  { %v1837_v10 = vpack.c.bf16 %v1836_v8, %v1835_v7  ;;  %3461 = vmatpush3.bf16.msra.mxu0 %v3722_v62  ;;  %v2998_v8 = vadd.f32 -8.0, %v2349_v5 }
 0x827   :  { %3462 = vmatprep.subr.bf16.mxu0 %v4509_v0  ;;  %v2353_v7 = vand.u32 2147483647, %v2350_v6  ;;  %vm2351_vm3 = vcmp.gt.f32.partialorder %v2350_v6, 0.0 }
 0x828   :  { %3373 = vmatmul.mubr.bf16.vlgmr.msra.gmra.mrb[12].mxu1 %v1837_v10  ;;  %v2365_v10 = vand.u32 2147483647, %v2998_v8  ;;  %vm2363_vm4 = vcmp.gt.f32.partialorder %v2998_v8, 0.0 }
 0x829   :  { %2303 = vmatpush1.bf16.msra.mxu1 %v3688_v9  ;;  %2334 = vmatprep.mubr.bf16.mxu1 %v4511_v13  ;;  %v2354_v9 = vsub.f32 0.0, %v2353_v7 }
 0x82a   :  { %2304 = vmatprep.subr.bf16.mxu1 %v3693_v11  ;;  %3463 = vmatpush3.bf16.msra.mxu0 %v3723_v63  ;;  %v3744_v63 = vld [vmem:[%s5158_s1 + $0x10] sm:$0xff] }
 0x82b   :  { %3464 = vmatprep.subr.bf16.mxu0 %v4509_v0  ;;  %v2355_v11 = vmul.f32 1.442695, %v2354_v9 }
 0x82d   :  { %2305 = vmatpush1.bf16.msra.mxu1 %v3691_v12  ;;  %v2366_v12 = vsub.f32 0.0, %v2365_v10  ;;  %3732 = vpow2.f32 %v2355_v11 }
 0x82e   :  { %2306 = vmatprep.subr.bf16.mxu1 %v3696_v14  ;;  %3465 = vmatpush3.bf16.msra.mxu0 %v3724_v1 }
 0x82f   :  { %3466 = vmatprep.subr.bf16.mxu0 %v4509_v0  ;;  %v2367_v13 = vmul.f32 1.442695, %v2366_v12 }
 0x831   :  { %2307 = vmatpush1.bf16.msra.mxu1 %v3694_v16  ;;  %3734 = vpow2.f32 %v2367_v13 }
 0x832   :  { %2308 = vmatprep.subr.bf16.mxu1 %v3699_v17  ;;  %3467 = vmatpush3.bf16.msra.mxu0 %v3725_v3 }
 0x833   :  { %3468 = vmatprep.subr.bf16.mxu0 %v4509_v0 }
 0x835   :  { %2309 = vmatpush1.bf16.msra.mxu1 %v3697_v18 }
 0x836   :  { %2310 = vmatprep.subr.bf16.mxu1 %v3702_v19  ;;  %3469 = vmatpush3.bf16.msra.mxu0 %v3726_v2 }
 0x837   :  { %3470 = vmatprep.subr.bf16.mxu0 %v4509_v0  ;;  %v3733_v14 = vpop.eup %3732 }
 0x838   :  { %v2357_v16 = vadd.f32 1.0, %v3733_v14 }
 0x839   :  { %2311 = vmatpush1.bf16.msra.mxu1 %v3700_v20  ;;  %v2955_v20 = vld [vmem:[#allocation31] ss:$0 sm:$0xff] }
 0x83a   :  { %2312 = vmatprep.subr.bf16.mxu1 %v3705_v21  ;;  %3471 = vmatpush3.bf16.msra.mxu0 %v3727_v4  ;;  %3736 = vlog2.f32 %v2357_v16  ;;  %v3745_v4 = vld [vmem:[%s5158_s1 + $0x18] sm:$0xff] }
 0x83b   :  { %v3735_v17 = vpop.eup %3734 }
 0x83c   :  { %v2369_v18 = vadd.f32 1.0, %v3735_v17 }
 0x83d   :  { %2313 = vmatpush1.bf16.msra.mxu1 %v3703_v22 }
 0x83e   :  { %v2180_v25 = vpop.f32.mrb[24].mxu0  ;;  %2314 = vmatprep.subr.bf16.mxu1 %v3708_v23  ;;  %3738 = vlog2.f32 %v2369_v18 }
 0x83f   :  { %v2181_v28 = vadd.f32 %v2973_v15, %v2180_v25  ;;  %v3414_v29 = vpop.f32.mrb[25].mxu0 }
 0x840   :  { %v2183_v30 = vpop.f32.mrb[26].mxu0 }
 0x841   :  { %v2189_v31 = vmul.f32 0.01, %v2181_v28  ;;  %v2184_v32 = vadd.f32 %v2973_v15, %v2183_v30  ;;  %2315 = vmatpush1.bf16.msra.mxu1 %v3706_v24  ;;  %v3415_v33 = vpop.f32.mrb[27].mxu0  ;;  %vm2187_vm15 = vcmp.ge.f32.partialorder %v2181_v28, 0.0  ;;  %v2352_v30 = vsel %vm2351_vm3, %v2350_v6, 0.0 }
 0x842   :  { %2316 = vmatprep.subr.bf16.mxu1 %v3711_v27 }
 0x843   :  { %vm2188_vm1 = vcmp.ge.f32.partialorder %v2184_v32, 0.0  ;;  %v2190_v35 = vmul.f32 0.01, %v2184_v32  ;;  %v2191_v36 = vsel %vm2187_vm15, %v2181_v28, %v2189_v31 }
 0x844   :  { %v3737_v21 = vpop.eup %3736 }
 0x845   :  { %v2192_v37 = vsel %vm2188_vm1, %v2184_v32, %v2190_v35  ;;  %2317 = vmatpush1.bf16.msra.mxu1 %v3709_v34  ;;  %v2359_v24 = vmul.f32 0.6931472, %v3737_v21  ;;  %v2364_v35 = vsel %vm2363_vm4, %v2998_v8, 0.0 }
 0x846   :  { %v2193_v26 = vpack.c.bf16 %v2192_v37, %v2191_v36  ;;  %3436 = vmatprep.subr.bf16.mxu1 %v4509_v0 }
 0x848   :  { %2335 = vmatmul.mubr.bf16.vlgmr.msra.gmra.mrb[20].mxu1 %v2193_v26  ;;  %v3739_v25 = vpop.eup %3738  ;;  %v2212_v26 = vlaneseq }
 0x849   :  { %3437 = vmatpush3.bf16.msra.mxu1 %v3712_v38  ;;  %3452 = vmatprep.mubr.msk.bf16.mxu1 %vm4510_vm0, %v4509_v0  ;;  %v2371_v34 = vmul.f32 0.6931472, %v3739_v25 }
 0x84a   :  { %3438 = vmatprep.subr.bf16.mxu1 %v4509_v0 }
 0x84b   :  { %v2372_v36 = vadd.f32 %v2371_v34, %v2364_v35 }
 0x84d   :  { %3439 = vmatpush3.bf16.msra.mxu1 %v3713_v39 }
 0x84e   :  { %3440 = vmatprep.subr.bf16.mxu1 %v4509_v0 }
 0x851   :  { %3441 = vmatpush3.bf16.msra.mxu1 %v3714_v40  ;;  %v2213_v40 = vshrl.u32 %v2212_v26, 7 }
 0x852   :  { %3442 = vmatprep.subr.bf16.mxu1 %v4509_v0 }
 0x855   :  { %3443 = vmatpush3.bf16.msra.mxu1 %v3715_v41  ;;  %v2214_v41 = vsub.s32 0, %v2213_v40 }
 0x856   :  { %3444 = vmatprep.subr.bf16.mxu1 %v4509_v0 }
 0x859   :  { %3445 = vmatpush3.bf16.msra.mxu1 %v3716_v42  ;;  %v2210_v42 = vld [vmem:[#allocation37] sm:$0x3] }
 0x85a   :  { %3446 = vmatprep.subr.bf16.mxu1 %v4509_v0 }
 0x85d   :  { %3447 = vmatpush3.bf16.msra.mxu1 %v3717_v43  ;;  %v2218_v43 = vsub.s32 1, %v2213_v40 }
 0x85e   :  { %v2532_v46 = vpop.f32.mrb[28].mxu0  ;;  %3448 = vmatprep.subr.bf16.mxu1 %v4509_v0 }
 0x85f   :  { %v2533_v47 = vadd.f32 %v2999_v44, %v2532_v46  ;;  %v3434_v48 = vpop.f32.mrb[29].mxu0 }
 0x860   :  { %v2535_v49 = vpop.f32.mrb[30].mxu0 }
 0x861   :  { %v2541_v50 = vmul.f32 0.01, %v2533_v47  ;;  %v2536_v51 = vadd.f32 %v2999_v44, %v2535_v49  ;;  %v3435_v52 = vpop.f32.mrb[31].mxu0  ;;  %3449 = vmatpush3.bf16.msra.mxu1 %v3718_v45  ;;  %vm2539_vm0 = vcmp.ge.f32.partialorder %v2533_v47, 0.0  ;;  %v2215_v44 = vrot.slane %v2210_v42, %v2214_v41 }
 0x862   :  { %3450 = vmatprep.subr.bf16.mxu1 %v4509_v0  ;;  %v2928_v0 = vld [vmem:[#allocation22] ss:$0 sm:$0xff]  ;;  %v2219_v45 = vrot.slane %v2210_v42, %v2218_v43  ;;  %v3742_v52 = vld [vmem:[%s5158_s1] sm:$0xff] }
 0x863   :  { %vm2540_vm2 = vcmp.ge.f32.partialorder %v2536_v51, 0.0  ;;  %v2542_v54 = vmul.f32 0.01, %v2536_v51  ;;  %v2543_v55 = vsel %vm2539_vm0, %v2533_v47, %v2541_v50  ;;  %v3476_v19 = vadd.f32 %v2928_v0, %v4961_v58 }
 0x864   :  { %v3479_v22 = vadd.f32 %v2928_v0, %v4963_v61  ;;  %v2360_v58 = vadd.f32 %v2359_v24, %v2352_v30 }
 0x865   :  { %v2544_v56 = vsel %vm2540_vm2, %v2536_v51, %v2542_v54  ;;  %3451 = vmatpush3.bf16.msra.mxu1 %v3719_v53  ;;  %v3477_v23 = vadd.f32 %v3476_v19, %v2955_v20 }
 0x866   :  { %v2545_v57 = vpack.c.bf16 %v2544_v56, %v2543_v55  ;;  %v3480_v29 = vadd.f32 %v3479_v22, %v2955_v20  ;;  %v2361_v61 = vadd.f32 %v2360_v58, %v2349_v5  ;;  %v3743_v56 = vld [vmem:[%s5158_s1 + $0x8] sm:$0xff] }
 0x868   :  { %3453 = vmatmul.mubr.bf16.vlgmr.msra.gmra.mrb[24].mxu1 %v2545_v57  ;;  %v2373_v37 = vsub.f32 %v2361_v61, %v2372_v36 }
 0x86a   :  { %v2386_v38 = vmul.f32 -2.0, %v2373_v37  ;;  %v2408_v7 = vrot.slane %v2373_v37, %v2214_v41  ;;  %v2412_v10 = vrot.slane %v2373_v37, %v2218_v43 }
 0x86c   :  { %v2387_v39 = vmul.f32 1.442695, %v2386_v38  ;;  %v3017_v38 = vld [vmem:[#allocation46] ss:$0 sm:$0xff] }
 0x86e   :  { %3740 = vpow2.f32 %v2387_v39 }
 0x878   :  { %v3741_v49 = vpop.eup %3740 }
 0x879   :  { %v2393_v62 = vrot.slane %v3741_v49, %v2214_v41  ;;  %v2397_v2 = vrot.slane %v3741_v49, %v2218_v43 }
 0x8fb   :  { %v1943_v15 = vpop.f32.mrb[12].mxu1 }
 0x8fc   :  { %v3478_v27 = vadd.f32 %v3477_v23, %v1943_v15  ;;  %v3374_v28 = vpop.f32.mrb[13].mxu1 }
 0x8fd   :  { %v1946_v31 = vpop.f32.mrb[14].mxu1  ;;  %v3008_v28 = vld [vmem:[#allocation43] ss:$0 sm:$0xff] }
 0x8fe   :  { %1954 = vst [vmem:[%s4700_s5] sm:$0xff] %v3478_v27  ;;  %v3481_v32 = vadd.f32 %v3480_v29, %v1946_v31  ;;  %v3375_v33 = vpop.f32.mrb[15].mxu1 }
 0x900   :  { %1955 = vst [vmem:[%s4700_s5 + $0x8] sm:$0xff] %v3481_v32 }
 0x91b   :  { %v2336_v46 = vpop.f32.mrb[20].mxu1 }
 0x91c   :  { %v2337_v47 = vadd.f32 %v2336_v46, %v2215_v44  ;;  %v2338_v48 = vpop.f32.mrb[21].mxu1 }
 0x91d   :  { %v2339_v50 = vadd.f32 %v2338_v48, %v2219_v45  ;;  %v2340_v51 = vpop.f32.mrb[22].mxu1 }
 0x91e   :  { %2345 = vst [vmem:[%s4705_s21] sm:$0xff] %v2337_v47  ;;  %v2374_v53 = vsub.f32 %v3742_v52, %v2337_v47  ;;  %v2341_v54 = vadd.f32 %v2340_v51, %v2215_v44  ;;  %v2342_v55 = vpop.f32.mrb[23].mxu1 }
 0x91f   :  { %2346 = vst [vmem:[%s4705_s21 + $0x8] sm:$0xff] %v2339_v50  ;;  %v2375_v57 = vsub.f32 %v3743_v56, %v2339_v50  ;;  %v2343_v59 = vadd.f32 %v2342_v55, %v2219_v45 }
 0x920   :  { %v2378_v60 = vmul.f32 0.5, %v2374_v53  ;;  %2347 = vst [vmem:[%s4705_s21 + $0x10] sm:$0xff] %v2341_v54  ;;  %v2376_v1 = vsub.f32 %v3744_v63, %v2341_v54 }
 0x921   :  { %v2379_v3 = vmul.f32 0.5, %v2375_v57  ;;  %2348 = vst [vmem:[%s4705_s21 + $0x18] sm:$0xff] %v2343_v59  ;;  %v2377_v5 = vsub.f32 %v3745_v4, %v2343_v59 }
 0x922   :  { %v2382_v6 = vmul.f32 %v2378_v60, %v2374_v53  ;;  %v2380_v8 = vmul.f32 0.5, %v2376_v1 }
 0x923   :  { %v2383_v9 = vmul.f32 %v2379_v3, %v2375_v57  ;;  %v2381_v11 = vmul.f32 0.5, %v2377_v5 }
 0x924   :  { %v2400_v12 = vmul.f32 %v2393_v62, %v2382_v6  ;;  %v2384_v13 = vmul.f32 %v2380_v8, %v2376_v1 }
 0x925   :  { %v2401_v14 = vmul.f32 %v2397_v2, %v2383_v9  ;;  %v2385_v16 = vmul.f32 %v2381_v11, %v2377_v5 }
 0x926   :  { %v2415_v17 = vadd.f32 %v2408_v7, %v2400_v12  ;;  %v2402_v18 = vmul.f32 %v2393_v62, %v2384_v13 }
 0x927   :  { %v2416_v0 = vadd.f32 %v2412_v10, %v2401_v14  ;;  %v2403_v19 = vmul.f32 %v2397_v2, %v2385_v16 }
 0x928   :  { %v2419_v20 = vadd.f32 0.9189385, %v2415_v17  ;;  %v2417_v21 = vadd.f32 %v2408_v7, %v2402_v18 }
 0x929   :  { %v2420_v22 = vadd.f32 0.9189385, %v2416_v0  ;;  %v2418_v23 = vadd.f32 %v2412_v10, %v2403_v19 }
 0x92a   :  { %v2421_v15 = vadd.f32 0.9189385, %v2417_v21 }
 0x92b   :  { %v2423_v24 = vadd.f32 %v2420_v22, %v2419_v20  ;;  %v2422_v25 = vadd.f32 0.9189385, %v2418_v23 }
 0x92d   :  { %2425 = vst [vmem:[%s4715_s29] sm:$0xff] %v2423_v24  ;;  %v2424_v27 = vadd.f32 %v2422_v25, %v2421_v15 }
 0x92f   :  { %2426 = vst [vmem:[%s4715_s29 + $0x8] sm:$0xff] %v2424_v27 }
 0x93b   :  { %v2651_v29 = vpop.f32.mrb[24].mxu1 }
 0x93c   :  { %v2652_v30 = vadd.f32 %v3008_v28, %v2651_v29  ;;  %v3454_v31 = vpop.f32.mrb[25].mxu1 }
 0x93d   :  { %v2654_v32 = vpop.f32.mrb[26].mxu1 }
 0x93e   :  { %v2660_v33 = vmul.f32 0.01, %v2652_v30  ;;  %v2655_v58 = vadd.f32 %v3008_v28, %v2654_v32  ;;  %v3455_v34 = vpop.f32.mrb[27].mxu1  ;;  %vm2658_vm5 = vcmp.ge.f32.partialorder %v2652_v30, 0.0 }
 0x940   :  { %vm2659_vm6 = vcmp.ge.f32.partialorder %v2655_v58, 0.0  ;;  %v2661_v35 = vmul.f32 0.01, %v2655_v58  ;;  %v2662_v61 = vsel %vm2658_vm5, %v2652_v30, %v2660_v33 }
 0x942   :  { %v2663_v36 = vsel %vm2659_vm6, %v2655_v58, %v2661_v35 }
 0x943   :  { %v2664_v37 = vpack.c.bf16 %v2663_v36, %v2662_v61 }
 0x945   :  { %3473 = vmatmul.mubr.bf16.vlgmr.msra.gmra.mrb[32].mxu0 %v2664_v37 }
 0xa18   :  { %v2770_v26 = vpop.f32.mrb[32].mxu0 }
 0xa19   :  { %v2771_v39 = vadd.f32 %v3017_v38, %v2770_v26  ;;  %v3474_v40 = vpop.f32.mrb[33].mxu0 }
 0xa1a   :  { %v2773_v41 = vpop.f32.mrb[34].mxu0 }
 0xa1b   :  { %2777 = vst [vmem:[%s4710_s19] sm:$0xff] %v2771_v39  ;;  %v2774_v42 = vadd.f32 %v3017_v38, %v2773_v41  ;;  %v3475_v43 = vpop.f32.mrb[35].mxu0 }
 0xa1d   :  { %2778 = vst [vmem:[%s4710_s19 + $0x8] sm:$0xff] %v2774_v42 }
 0xa1e   :  { %2795 = vsyncpa [#allocation3], 1 }
 0xa1f   :  { %2796 = vsyncpa [#allocation5], 1 }
 0xa20   :  { %2797 = vsyncpa [#allocation8], 1 }
 0xa21   :  { %2798 = vsyncpa [#allocation11], 1 }
 0xa22   :  { %2799 = vsyncpa [#allocation14], 1 }
 0xa23   :  { %2800 = vsyncpa [#allocation17], 1 }
 0xa24   :  { %2801 = vsyncpa [#allocation20], 1 }
 0xa25   :  { %2802 = vsyncpa [#allocation23], 1 }
 0xa26   :  { %2803 = vsyncpa [#allocation26], 1 }
 0xa27   :  { %2804 = vsyncpa [#allocation29], 1 }
 0xa28   :  { %2805 = vsyncpa [#allocation32], 1 }
 0xa29   :  { %2806 = vsyncpa [#allocation35], 1 }
 0xa2a   :  { %2807 = vsyncpa [#allocation38], 1 }
 0xa2b   :  { %2808 = vsyncpa [#allocation41], 1 }
 0xa2c   :  { %2809 = vsyncpa [#allocation44], 1 }
 0xa2d   :  { %2810 = vsyncpa [#allocation47], 1 }

</bundles_post_ra>
